<compile_context>
chip_gen: v6e
topology: v6e:2x2x1
jax: 0.10.0
libtpu: 0.0.40
codegen_flags: <defaults>
</compile_context>

<pallas_src>
import functools

import jax
import jax.numpy as jnp
from jax.experimental import pallas as pl
from jax.experimental.pallas import tpu as pltpu


def _round_up(x, m):
    return ((x + m - 1) // m) * m


def _pick_tile(dim, candidates):
    for c in candidates:
        if dim >= c and dim % c == 0:
            return c
    return dim  # fall back to the full dimension (valid: block == full array dim)


def _pick_time_tile(t):
    for c in (16, 8, 4, 2):
        if t % c == 0:
            return c
    return 1


# -----------------------------------------------------------------------------
# Tiled matmul + bias kernel: y = x @ w_t + b    (w_t is pre-transposed: (K, N))
# -----------------------------------------------------------------------------
def _matmul_bias_kernel(x_ref, w_ref, b_ref, o_ref, acc_ref):
    k = pl.program_id(2)

    @pl.when(k == 0)
    def _():
        acc_ref[...] = jnp.zeros_like(acc_ref)

    acc_ref[...] += jnp.dot(x_ref[...], w_ref[...],
                            preferred_element_type=jnp.float32)

    @pl.when(k == pl.num_programs(2) - 1)
    def _():
        o_ref[...] = acc_ref[...] + b_ref[...]


def matmul_bias(x, w_t, b):
    """x: (M, K), w_t: (K, N), b: (1, N) -> (M, N) float32."""
    M, K = x.shape
    K2, N = w_t.shape
    assert K == K2 and b.shape == (1, N)
    tm = _pick_tile(M, (256, 128, 64, 32, 16, 8))
    tn = _pick_tile(N, (512, 256, 128))
    tk = _pick_tile(K, (512, 256, 128))
    grid = (M // tm, N // tn, K // tk)
    return pl.pallas_call(
        _matmul_bias_kernel,
        out_shape=jax.ShapeDtypeStruct((M, N), jnp.float32),
        grid_spec=pltpu.PrefetchScalarGridSpec(
            num_scalar_prefetch=0,
            grid=grid,
            in_specs=[
                pl.BlockSpec((tm, tk), lambda i, j, k: (i, k)),
                pl.BlockSpec((tk, tn), lambda i, j, k: (k, j)),
                pl.BlockSpec((1, tn), lambda i, j, k: (0, j)),
            ],
            out_specs=pl.BlockSpec((tm, tn), lambda i, j, k: (i, j)),
            scratch_shapes=[pltpu.VMEM((tm, tn), jnp.float32)],
        ),
        compiler_params=pltpu.CompilerParams(
            dimension_semantics=("parallel", "parallel", "arbitrary")),
    )(x, w_t, b)


# -----------------------------------------------------------------------------
# LSTM recurrence kernel.  The input projection has already been hoisted into a big
# matmul; per timestep only h_prev @ W_hh remains.  Grid iterates over chunks of TT
# timesteps; h/c state lives in VMEM scratch and persists across grid steps.
# Gate layout: 4 gate blocks of width h_pad each (lane-aligned, h_pad % 128 == 0).
# -----------------------------------------------------------------------------
def _lstm_recurrence_kernel(xp_ref, whh_ref, y_ref, h_sc, c_sc, *, h_pad, tt):
    step = pl.program_id(0)

    @pl.when(step == 0)
    def _():
        h_sc[...] = jnp.zeros_like(h_sc)
        c_sc[...] = jnp.zeros_like(c_sc)

    h = h_sc[...]            # (B, h_pad)
    c = c_sc[...]            # (B, h_pad)

    # Fully unrolled inner time loop (tt is small & static) -> amortizes per-grid-step
    # overhead and keeps h/c in vregs between consecutive timesteps.
    for i in range(tt):
        gates = xp_ref[i] + jnp.dot(h, whh_ref[...],
                                    preferred_element_type=jnp.float32)
        i_g = jax.nn.sigmoid(gates[:, 0 * h_pad:1 * h_pad])
        f_g = jax.nn.sigmoid(gates[:, 1 * h_pad:2 * h_pad])
        g_g = jnp.tanh(gates[:, 2 * h_pad:3 * h_pad])
        o_g = jax.nn.sigmoid(gates[:, 3 * h_pad:4 * h_pad])
        c = f_g * c + i_g * g_g
        h = o_g * jnp.tanh(c)
        y_ref[i] = h

    h_sc[...] = h
    c_sc[...] = c


def lstm_recurrence(x_proj, w_hh_t):
    """x_proj: (T, B, 4*h_pad) pre-projected inputs; w_hh_t: (h_pad, 4*h_pad).

    Returns hidden states, time-major, padded: (T, B, h_pad)."""
    T, B, G = x_proj.shape
    h_pad = w_hh_t.shape[0]
    assert G == 4 * h_pad
    tt = _pick_time_tile(T)
    kernel = functools.partial(_lstm_recurrence_kernel, h_pad=h_pad, tt=tt)
    return pl.pallas_call(
        kernel,
        out_shape=jax.ShapeDtypeStruct((T, B, h_pad), jnp.float32),
        grid_spec=pltpu.PrefetchScalarGridSpec(
            num_scalar_prefetch=0,
            grid=(T // tt,),
            in_specs=[
                pl.BlockSpec((tt, B, G), lambda s: (s, 0, 0)),
                pl.BlockSpec((h_pad, G), lambda s: (0, 0)),
            ],
            out_specs=pl.BlockSpec((tt, B, h_pad), lambda s: (s, 0, 0)),
            scratch_shapes=[
                pltpu.VMEM((B, h_pad), jnp.float32),
                pltpu.VMEM((B, h_pad), jnp.float32),
            ],
        ),
        compiler_params=pltpu.CompilerParams(
            dimension_semantics=("arbitrary",)),  # sequential recurrence over time
    )(x_proj, w_hh_t)


# -----------------------------------------------------------------------------
# Full model forward.  tokens: (B, T) int32 -> (outputs (B, V, T), emb (B, T*H)).
# -----------------------------------------------------------------------------
def stackoverflow_net_forward(tokens, params):
    B, T = tokens.shape
    H = params["linear_1"]["w_t"].shape[0]
    h_pad = params["lstm"][0]["w_hh_t"].shape[0]

    # Embedding gather directly in time-major layout (T, B, E); padding_idx row is 0.
    x_tm = params["embedding"][tokens.T]                        # (T, B, E)

    for layer in params["lstm"]:
        Tn, Bn, Fin = x_tm.shape
        # Hoisted, time-parallel input projection for ALL timesteps at once.
        x_flat = x_tm.reshape(T * B, Fin)
        xp = matmul_bias(x_flat, layer["w_ih_t"], layer["b"])   # (T*B, 4*h_pad)
        xp = xp.reshape(T, B, 4 * h_pad)
        # Sequential recurrent part (only h_prev @ W_hh per step).
        x_tm = lstm_recurrence(xp, layer["w_hh_t"])              # (T, B, h_pad)

    lstm_out = jnp.transpose(x_tm, (1, 0, 2))[:, :, :H]          # (B, T, H)

    # emb = torch.flatten(x, start_dim=1)
    emb = lstm_out.reshape(B, T * H)

    # linear_1 then linear_2, applied per token.
    flat = lstm_out.reshape(B * T, H)
    h1 = matmul_bias(flat, params["linear_1"]["w_t"], params["linear_1"]["b"])
    logits = matmul_bias(h1, params["linear_2"]["w_t"], params["linear_2"]["b"])
    V = logits.shape[-1]
    logits = logits.reshape(B, T, V)

    # outputs = torch.transpose(logits, 1, 2)  (left to XLA; short-T lane layout)
    outputs = jnp.transpose(logits, (0, 2, 1))                   # (B, V, T)
    return outputs, emb


# -----------------------------------------------------------------------------
# Parameter construction (PyTorch layout) + kernel-layout preparation
# -----------------------------------------------------------------------------
def init_raw_params(key, vocab_size, embedding_size, hidden_size, num_layers):
    def uniform(k, shape, scale=0.1):
        return jax.random.uniform(k, shape, jnp.float32, -scale, scale)

    keys = jax.random.split(key, 3 + 4 * num_layers)
    ki = iter(keys)

    emb_table = uniform(next(ki), (vocab_size, embedding_size))
    emb_table = emb_table.at[0].set(0.0)  # padding_idx=0

    lstm_layers = []
    for l in range(num_layers):
        in_size = embedding_size if l == 0 else hidden_size
        lstm_layers.append({
            "w_ih": uniform(next(ki), (4 * hidden_size, in_size)),
            "w_hh": uniform(next(ki), (4 * hidden_size, hidden_size)),
            "b_ih": uniform(next(ki), (4 * hidden_size,)),
            "b_hh": uniform(next(ki), (4 * hidden_size,)),
        })

    lin1_w = uniform(next(ki), (embedding_size, hidden_size))
    lin1_b = jnp.zeros((embedding_size,), jnp.float32)
    lin2_w = uniform(next(ki), (vocab_size, embedding_size))
    lin2_b = jnp.zeros((vocab_size,), jnp.float32)

    return {
        "embedding": emb_table,
        "lstm": lstm_layers,
        "linear_1": {"w": lin1_w, "b": lin1_b},
        "linear_2": {"w": lin2_w, "b": lin2_b},
    }


def _pack_gate_weight_t(w, h, h_pad, in_pad):
    """w: (4h, in_dim) PyTorch layout -> (in_pad, 4*h_pad) transposed, per-gate padded."""
    in_dim = w.shape[1]
    out = jnp.zeros((in_pad, 4 * h_pad), jnp.float32)
    for g in range(4):
        out = out.at[:in_dim, g * h_pad:g * h_pad + h].set(w[g * h:(g + 1) * h, :].T)
    return out


def _pack_gate_bias(b, h, h_pad):
    out = jnp.zeros((1, 4 * h_pad), jnp.float32)
    for g in range(4):
        out = out.at[0, g * h_pad:g * h_pad + h].set(b[g * h:(g + 1) * h])
    return out


def prepare_params(raw, hidden_size):
    """Pre-transpose / lane-pad weights into the kernel-friendly layout (host-side)."""
    h = hidden_size
    h_pad = _round_up(h, 128)
    lstm = []
    for l, layer in enumerate(raw["lstm"]):
        in_dim = layer["w_ih"].shape[1]
        in_pad = in_dim if l == 0 else h_pad  # layers >0 consume the padded hidden state
        lstm.append({
            "w_ih_t": _pack_gate_weight_t(layer["w_ih"], h, h_pad, in_pad),
            "w_hh_t": _pack_gate_weight_t(layer["w_hh"], h, h_pad, h_pad),
            "b": _pack_gate_bias(layer["b_ih"] + layer["b_hh"], h, h_pad),
        })
    return {
        "embedding": raw["embedding"],
        "lstm": lstm,
        "linear_1": {"w_t": raw["linear_1"]["w"].T,
                     "b": raw["linear_1"]["b"].reshape(1, -1)},
        "linear_2": {"w_t": raw["linear_2"]["w"].T,
                     "b": raw["linear_2"]["b"].reshape(1, -1)},
    }


# -----------------------------------------------------------------------------
# Pure-JAX reference (mirrors the PyTorch module) for a correctness check
# -----------------------------------------------------------------------------
def reference_forward(tokens, raw):
    x = raw["embedding"][tokens]                       # (B, T, E)
    B, T, _ = x.shape
    h_size = raw["lstm"][0]["w_hh"].shape[1]
    out = x
    for layer in raw["lstm"]:
        w_ih, w_hh = layer["w_ih"], layer["w_hh"]
        b = layer["b_ih"] + layer["b_hh"]

        def step(carry, x_t, w_ih=w_ih, w_hh=w_hh, b=b):
            h, c = carry
            gates = x_t @ w_ih.T + h @ w_hh.T + b
            i = jax.nn.sigmoid(gates[:, 0 * h_size:1 * h_size])
            f = jax.nn.sigmoid(gates[:, 1 * h_size:2 * h_size])
            g = jnp.tanh(gates[:, 2 * h_size:3 * h_size])
            o = jax.nn.sigmoid(gates[:, 3 * h_size:4 * h_size])
            c = f * c + i * g
            h = o * jnp.tanh(c)
            return (h, c), h

        init = (jnp.zeros((B, h_size), jnp.float32), jnp.zeros((B, h_size), jnp.float32))
        _, ys = jax.lax.scan(step, init, jnp.transpose(out, (1, 0, 2)))
        out = jnp.transpose(ys, (1, 0, 2))
    emb = out.reshape(B, T * h_size)
    x1 = out @ raw["linear_1"]["w"].T + raw["linear_1"]["b"]
    logits = x1 @ raw["linear_2"]["w"].T + raw["linear_2"]["b"]
    return jnp.transpose(logits, (0, 2, 1)), emb


if __name__ == "__main__":
    vocab_size = 32
    embedding_size = 16
    hidden_size = 32
    num_layers = 2
    batch = 2
    seq = 8

    key = jax.random.PRNGKey(0)
    pkey, tkey = jax.random.split(key)
    raw_params = init_raw_params(pkey, vocab_size, embedding_size, hidden_size, num_layers)
    params = prepare_params(raw_params, hidden_size)
    tokens = jax.random.randint(tkey, (batch, seq), 0, vocab_size, dtype=jnp.int32)

    outputs, emb = jax.jit(stackoverflow_net_forward)(tokens, params)
    jax.block_until_ready((outputs, emb))

    assert outputs.shape == (batch, vocab_size, seq)
    assert emb.shape == (batch, seq * hidden_size)

    ref_out, ref_emb = reference_forward(tokens, raw_params)
    assert float(jnp.max(jnp.abs(outputs - ref_out))) < 1e-3
    assert float(jnp.max(jnp.abs(emb - ref_emb))) < 1e-3

    print("KERNEL_OK")
</pallas_src>

<mosaic_0001>
module attributes {stable_mosaic.version = 11 : i64} {
  func.func @_matmul_bias_kernel(%arg0: i32, %arg1: i32, %arg2: i32, %arg3: memref<16x16xf32, #tpu.memory_space<vmem>>, %arg4: memref<16x512xf32, #tpu.memory_space<vmem>>, %arg5: memref<1x512xf32, #tpu.memory_space<vmem>>, %arg6: memref<16x512xf32, #tpu.memory_space<vmem>>, %arg7: memref<16x512xf32, #tpu.memory_space<vmem>>) attributes {dimension_semantics = [#tpu.dimension_semantics<parallel>, #tpu.dimension_semantics<parallel>, #tpu.dimension_semantics<arbitrary>], iteration_bounds = array<i64: 1, 1, 1>, scalar_prefetch = 0 : i64, scratch_operands = 1 : i64, tpu.core_type = #tpu.core_type<tc>, window_params = [{transform_indices = @transform_0, window_bounds = array<i64: 16, 16>}, {transform_indices = @transform_1, window_bounds = array<i64: 16, 512>}, {transform_indices = @transform_2, window_bounds = array<i64: 1, 512>}, {transform_indices = @transform_3, window_bounds = array<i64: 16, 512>}]} {
    %c0_i32 = arith.constant 0 : i32
    %0 = arith.cmpi eq, %arg2, %c0_i32 : i32
    %1 = arith.extui %0 : i1 to i32
    %c0_i32_0 = arith.constant 0 : i32
    %2 = arith.cmpi ne, %1, %c0_i32_0 : i32
    scf.if %2 {
      %cst_10 = arith.constant 0.000000e+00 : f32
      %12 = vector.broadcast %cst_10 : f32 to vector<16x512xf32>
      %c0_11 = arith.constant 0 : index
      %c0_12 = arith.constant 0 : index
      %13 = vector.load %arg7[%c0_11, %c0_12] : memref<16x512xf32, #tpu.memory_space<vmem>>, vector<16x512xf32>
      tpu.vector_store %arg7[%c0_11, %c0_12], %12 {strides = array<i32>} : memref<16x512xf32, #tpu.memory_space<vmem>>, vector<16x512xf32>,
    } else {
    }
    %c0 = arith.constant 0 : index
    %c0_1 = arith.constant 0 : index
    %3 = vector.load %arg7[%c0, %c0_1] : memref<16x512xf32, #tpu.memory_space<vmem>>, vector<16x512xf32>
    %c0_2 = arith.constant 0 : index
    %c0_3 = arith.constant 0 : index
    %4 = vector.load %arg3[%c0_2, %c0_3] : memref<16x16xf32, #tpu.memory_space<vmem>>, vector<16x16xf32>
    %c0_4 = arith.constant 0 : index
    %c0_5 = arith.constant 0 : index
    %5 = vector.load %arg4[%c0_4, %c0_5] : memref<16x512xf32, #tpu.memory_space<vmem>>, vector<16x512xf32>
    %cst = arith.constant dense<0.000000e+00> : vector<16x512xf32>
    %6 = tpu.matmul %4, %5, %cst {dimension_numbers = #tpu.dot_dimension_numbers<[1], [0], [0], [1], [0, 0, 1, 1], [], []>} : vector<16x16xf32>, vector<16x512xf32>, vector<16x512xf32> -> vector<16x512xf32>
    %7 = arith.addf %3, %6 : vector<16x512xf32>
    %c0_6 = arith.constant 0 : index
    %c0_7 = arith.constant 0 : index
    %8 = vector.load %arg7[%c0_6, %c0_7] : memref<16x512xf32, #tpu.memory_space<vmem>>, vector<16x512xf32>
    tpu.vector_store %arg7[%c0_6, %c0_7], %7 {strides = array<i32>} : memref<16x512xf32, #tpu.memory_space<vmem>>, vector<16x512xf32>,
    %c0_i32_8 = arith.constant 0 : i32
    %9 = arith.cmpi eq, %arg2, %c0_i32_8 : i32
    %10 = arith.extui %9 : i1 to i32
    %c0_i32_9 = arith.constant 0 : i32
    %11 = arith.cmpi ne, %10, %c0_i32_9 : i32
    scf.if %11 {
      %c0_10 = arith.constant 0 : index
      %c0_11 = arith.constant 0 : index
      %12 = vector.load %arg7[%c0_10, %c0_11] : memref<16x512xf32, #tpu.memory_space<vmem>>, vector<16x512xf32>
      %c0_12 = arith.constant 0 : index
      %c0_13 = arith.constant 0 : index
      %13 = vector.load %arg5[%c0_12, %c0_13] : memref<1x512xf32, #tpu.memory_space<vmem>>, vector<1x512xf32>
      %14 = vector.broadcast %13 : vector<1x512xf32> to vector<16x512xf32>
      %15 = arith.addf %12, %14 : vector<16x512xf32>
      %c0_14 = arith.constant 0 : index
      %c0_15 = arith.constant 0 : index
      %16 = vector.load %arg6[%c0_14, %c0_15] : memref<16x512xf32, #tpu.memory_space<vmem>>, vector<16x512xf32>
      tpu.vector_store %arg6[%c0_14, %c0_15], %15 {strides = array<i32>} : memref<16x512xf32, #tpu.memory_space<vmem>>, vector<16x512xf32>,
    } else {
    }
    return
  }
  func.func @transform_0(%arg0: i32, %arg1: i32, %arg2: i32) -> (i32, i32) {
    %c0_i32 = arith.constant 0 : i32
    return %arg0, %arg2 : i32, i32
  }
  func.func @transform_1(%arg0: i32, %arg1: i32, %arg2: i32) -> (i32, i32) {
    %c0_i32 = arith.constant 0 : i32
    return %arg2, %arg1 : i32, i32
  }
  func.func @transform_2(%arg0: i32, %arg1: i32, %arg2: i32) -> (i32, i32) {
    %c0_i32 = arith.constant 0 : i32
    %c0_i32_0 = arith.constant 0 : i32
    return %c0_i32, %arg1 : i32, i32
  }
  func.func @transform_3(%arg0: i32, %arg1: i32, %arg2: i32) -> (i32, i32) {
    %c0_i32 = arith.constant 0 : i32
    return %arg0, %arg1 : i32, i32
  }
}

module attributes {stable_mosaic.version = 11 : i64} {
  func.func @_lstm_recurrence_kernel(%arg0: i32, %arg1: memref<8x2x512xf32, #tpu.memory_space<vmem>>, %arg2: memref<128x512xf32, #tpu.memory_space<vmem>>, %arg3: memref<8x2x128xf32, #tpu.memory_space<vmem>>, %arg4: memref<2x128xf32, #tpu.memory_space<vmem>>, %arg5: memref<2x128xf32, #tpu.memory_space<vmem>>) attributes {dimension_semantics = [#tpu.dimension_semantics<arbitrary>], iteration_bounds = array<i64: 1>, scalar_prefetch = 0 : i64, scratch_operands = 2 : i64, tpu.core_type = #tpu.core_type<tc>, window_params = [{transform_indices = @transform_0, window_bounds = array<i64: 8, 2, 512>}, {pipeline_mode = #tpu.pipeline_mode<synchronous>, transform_indices = @transform_1, window_bounds = array<i64: 128, 512>}, {transform_indices = @transform_2, window_bounds = array<i64: 8, 2, 128>}]} {
    %c0_i32 = arith.constant 0 : i32
    %0 = arith.cmpi eq, %arg0, %c0_i32 : i32
    %1 = arith.extui %0 : i1 to i32
    %c0_i32_0 = arith.constant 0 : i32
    %2 = arith.cmpi ne, %1, %c0_i32_0 : i32
    scf.if %2 {
      %cst_96 = arith.constant 0.000000e+00 : f32
      %271 = vector.broadcast %cst_96 : f32 to vector<2x128xf32>
      %c0_97 = arith.constant 0 : index
      %c0_98 = arith.constant 0 : index
      %272 = vector.load %arg4[%c0_97, %c0_98] : memref<2x128xf32, #tpu.memory_space<vmem>>, vector<2x128xf32>
      tpu.vector_store %arg4[%c0_97, %c0_98], %271 {strides = array<i32>} : memref<2x128xf32, #tpu.memory_space<vmem>>, vector<2x128xf32>,
      %cst_99 = arith.constant 0.000000e+00 : f32
      %273 = vector.broadcast %cst_99 : f32 to vector<2x128xf32>
      %c0_100 = arith.constant 0 : index
      %c0_101 = arith.constant 0 : index
      %274 = vector.load %arg5[%c0_100, %c0_101] : memref<2x128xf32, #tpu.memory_space<vmem>>, vector<2x128xf32>
      tpu.vector_store %arg5[%c0_100, %c0_101], %273 {strides = array<i32>} : memref<2x128xf32, #tpu.memory_space<vmem>>, vector<2x128xf32>,
    } else {
    }
    %c0 = arith.constant 0 : index
    %c0_1 = arith.constant 0 : index
    %3 = vector.load %arg4[%c0, %c0_1] : memref<2x128xf32, #tpu.memory_space<vmem>>, vector<2x128xf32>
    %c0_2 = arith.constant 0 : index
    %c0_3 = arith.constant 0 : index
    %4 = vector.load %arg5[%c0_2, %c0_3] : memref<2x128xf32, #tpu.memory_space<vmem>>, vector<2x128xf32>
    %c0_4 = arith.constant 0 : index
    %c0_5 = arith.constant 0 : index
    %c0_6 = arith.constant 0 : index
    %5 = vector.load %arg1[%c0_4, %c0_5, %c0_6] : memref<8x2x512xf32, #tpu.memory_space<vmem>>, vector<1x2x512xf32>
    %6 = vector.shape_cast %5 : vector<1x2x512xf32> to vector<2x512xf32>
    %c0_7 = arith.constant 0 : index
    %c0_8 = arith.constant 0 : index
    %7 = vector.load %arg2[%c0_7, %c0_8] : memref<128x512xf32, #tpu.memory_space<vmem>>, vector<128x512xf32>
    %cst = arith.constant dense<0.000000e+00> : vector<2x512xf32>
    %8 = tpu.matmul %3, %7, %cst {dimension_numbers = #tpu.dot_dimension_numbers<[1], [0], [0], [1], [0, 0, 1, 1], [], []>} : vector<2x128xf32>, vector<128x512xf32>, vector<2x512xf32> -> vector<2x512xf32>
    %9 = arith.addf %6, %8 : vector<2x512xf32>
    %10 = vector.extract_strided_slice %9 {offsets = [0, 0], sizes = [2, 128], strides = [1, 1]} : vector<2x512xf32> to vector<2x128xf32>
    %11 = arith.negf %10 : vector<2x128xf32>
    %12 = math.exp %11 : vector<2x128xf32>
    %cst_9 = arith.constant 1.000000e+00 : f32
    %13 = vector.broadcast %cst_9 : f32 to vector<2x128xf32>
    %14 = arith.addf %13, %12 : vector<2x128xf32>
    %15 = arith.divf %13, %14 : vector<2x128xf32>
    %16 = vector.extract_strided_slice %9 {offsets = [0, 128], sizes = [2, 128], strides = [1, 1]} : vector<2x512xf32> to vector<2x128xf32>
    %17 = arith.negf %16 : vector<2x128xf32>
    %18 = math.exp %17 : vector<2x128xf32>
    %cst_10 = arith.constant 1.000000e+00 : f32
    %19 = vector.broadcast %cst_10 : f32 to vector<2x128xf32>
    %20 = arith.addf %19, %18 : vector<2x128xf32>
    %21 = arith.divf %19, %20 : vector<2x128xf32>
    %22 = vector.extract_strided_slice %9 {offsets = [0, 256], sizes = [2, 128], strides = [1, 1]} : vector<2x512xf32> to vector<2x128xf32>
    %23 = math.tanh %22 : vector<2x128xf32>
    %24 = vector.extract_strided_slice %9 {offsets = [0, 384], sizes = [2, 128], strides = [1, 1]} : vector<2x512xf32> to vector<2x128xf32>
    %25 = arith.negf %24 : vector<2x128xf32>
    %26 = math.exp %25 : vector<2x128xf32>
    %cst_11 = arith.constant 1.000000e+00 : f32
    %27 = vector.broadcast %cst_11 : f32 to vector<2x128xf32>
    %28 = arith.addf %27, %26 : vector<2x128xf32>
    %29 = arith.divf %27, %28 : vector<2x128xf32>
    %30 = arith.mulf %21, %4 : vector<2x128xf32>
    %31 = arith.mulf %15, %23 : vector<2x128xf32>
    %32 = arith.addf %30, %31 : vector<2x128xf32>
    %33 = math.tanh %32 : vector<2x128xf32>
    %34 = arith.mulf %29, %33 : vector<2x128xf32>
    %c0_12 = arith.constant 0 : index
    %c0_13 = arith.constant 0 : index
    %c0_14 = arith.constant 0 : index
    %35 = vector.load %arg3[%c0_12, %c0_13, %c0_14] : memref<8x2x128xf32, #tpu.memory_space<vmem>>, vector<1x2x128xf32>
    %36 = vector.shape_cast %35 : vector<1x2x128xf32> to vector<2x128xf32>
    %37 = vector.shape_cast %34 : vector<2x128xf32> to vector<1x2x128xf32>
    tpu.vector_store %arg3[%c0_12, %c0_13, %c0_14], %37 {strides = array<i32>} : memref<8x2x128xf32, #tpu.memory_space<vmem>>, vector<1x2x128xf32>,
    %c1 = arith.constant 1 : index
    %c0_15 = arith.constant 0 : index
    %c0_16 = arith.constant 0 : index
    %38 = vector.load %arg1[%c1, %c0_15, %c0_16] : memref<8x2x512xf32, #tpu.memory_space<vmem>>, vector<1x2x512xf32>
    %39 = vector.shape_cast %38 : vector<1x2x512xf32> to vector<2x512xf32>
    %c0_17 = arith.constant 0 : index
    %c0_18 = arith.constant 0 : index
    %40 = vector.load %arg2[%c0_17, %c0_18] : memref<128x512xf32, #tpu.memory_space<vmem>>, vector<128x512xf32>
    %cst_19 = arith.constant dense<0.000000e+00> : vector<2x512xf32>
    %41 = tpu.matmul %34, %40, %cst_19 {dimension_numbers = #tpu.dot_dimension_numbers<[1], [0], [0], [1], [0, 0, 1, 1], [], []>} : vector<2x128xf32>, vector<128x512xf32>, vector<2x512xf32> -> vector<2x512xf32>
    %42 = arith.addf %39, %41 : vector<2x512xf32>
    %43 = vector.extract_strided_slice %42 {offsets = [0, 0], sizes = [2, 128], strides = [1, 1]} : vector<2x512xf32> to vector<2x128xf32>
    %44 = arith.negf %43 : vector<2x128xf32>
    %45 = math.exp %44 : vector<2x128xf32>
    %cst_20 = arith.constant 1.000000e+00 : f32
    %46 = vector.broadcast %cst_20 : f32 to vector<2x128xf32>
    %47 = arith.addf %46, %45 : vector<2x128xf32>
    %48 = arith.divf %46, %47 : vector<2x128xf32>
    %49 = vector.extract_strided_slice %42 {offsets = [0, 128], sizes = [2, 128], strides = [1, 1]} : vector<2x512xf32> to vector<2x128xf32>
    %50 = arith.negf %49 : vector<2x128xf32>
    %51 = math.exp %50 : vector<2x128xf32>
    %cst_21 = arith.constant 1.000000e+00 : f32
    %52 = vector.broadcast %cst_21 : f32 to vector<2x128xf32>
    %53 = arith.addf %52, %51 : vector<2x128xf32>
    %54 = arith.divf %52, %53 : vector<2x128xf32>
    %55 = vector.extract_strided_slice %42 {offsets = [0, 256], sizes = [2, 128], strides = [1, 1]} : vector<2x512xf32> to vector<2x128xf32>
    %56 = math.tanh %55 : vector<2x128xf32>
    %57 = vector.extract_strided_slice %42 {offsets = [0, 384], sizes = [2, 128], strides = [1, 1]} : vector<2x512xf32> to vector<2x128xf32>
    %58 = arith.negf %57 : vector<2x128xf32>
    %59 = math.exp %58 : vector<2x128xf32>
    %cst_22 = arith.constant 1.000000e+00 : f32
    %60 = vector.broadcast %cst_22 : f32 to vector<2x128xf32>
    %61 = arith.addf %60, %59 : vector<2x128xf32>
    %62 = arith.divf %60, %61 : vector<2x128xf32>
    %63 = arith.mulf %54, %32 : vector<2x128xf32>
    %64 = arith.mulf %48, %56 : vector<2x128xf32>
    %65 = arith.addf %63, %64 : vector<2x128xf32>
    %66 = math.tanh %65 : vector<2x128xf32>
    %67 = arith.mulf %62, %66 : vector<2x128xf32>
    %c1_23 = arith.constant 1 : index
    %c0_24 = arith.constant 0 : index
    %c0_25 = arith.constant 0 : index
    %68 = vector.load %arg3[%c1_23, %c0_24, %c0_25] : memref<8x2x128xf32, #tpu.memory_space<vmem>>, vector<1x2x128xf32>
    %69 = vector.shape_cast %68 : vector<1x2x128xf32> to vector<2x128xf32>
    %70 = vector.shape_cast %67 : vector<2x128xf32> to vector<1x2x128xf32>
    tpu.vector_store %arg3[%c1_23, %c0_24, %c0_25], %70 {strides = array<i32>} : memref<8x2x128xf32, #tpu.memory_space<vmem>>, vector<1x2x128xf32>,
    %c2 = arith.constant 2 : index
    %c0_26 = arith.constant 0 : index
    %c0_27 = arith.constant 0 : index
    %71 = vector.load %arg1[%c2, %c0_26, %c0_27] : memref<8x2x512xf32, #tpu.memory_space<vmem>>, vector<1x2x512xf32>
    %72 = vector.shape_cast %71 : vector<1x2x512xf32> to vector<2x512xf32>
    %c0_28 = arith.constant 0 : index
    %c0_29 = arith.constant 0 : index
    %73 = vector.load %arg2[%c0_28, %c0_29] : memref<128x512xf32, #tpu.memory_space<vmem>>, vector<128x512xf32>
    %cst_30 = arith.constant dense<0.000000e+00> : vector<2x512xf32>
    %74 = tpu.matmul %67, %73, %cst_30 {dimension_numbers = #tpu.dot_dimension_numbers<[1], [0], [0], [1], [0, 0, 1, 1], [], []>} : vector<2x128xf32>, vector<128x512xf32>, vector<2x512xf32> -> vector<2x512xf32>
    %75 = arith.addf %72, %74 : vector<2x512xf32>
    %76 = vector.extract_strided_slice %75 {offsets = [0, 0], sizes = [2, 128], strides = [1, 1]} : vector<2x512xf32> to vector<2x128xf32>
    %77 = arith.negf %76 : vector<2x128xf32>
    %78 = math.exp %77 : vector<2x128xf32>
    %cst_31 = arith.constant 1.000000e+00 : f32
    %79 = vector.broadcast %cst_31 : f32 to vector<2x128xf32>
    %80 = arith.addf %79, %78 : vector<2x128xf32>
    %81 = arith.divf %79, %80 : vector<2x128xf32>
    %82 = vector.extract_strided_slice %75 {offsets = [0, 128], sizes = [2, 128], strides = [1, 1]} : vector<2x512xf32> to vector<2x128xf32>
    %83 = arith.negf %82 : vector<2x128xf32>
    %84 = math.exp %83 : vector<2x128xf32>
    %cst_32 = arith.constant 1.000000e+00 : f32
    %85 = vector.broadcast %cst_32 : f32 to vector<2x128xf32>
    %86 = arith.addf %85, %84 : vector<2x128xf32>
    %87 = arith.divf %85, %86 : vector<2x128xf32>
    %88 = vector.extract_strided_slice %75 {offsets = [0, 256], sizes = [2, 128], strides = [1, 1]} : vector<2x512xf32> to vector<2x128xf32>
    %89 = math.tanh %88 : vector<2x128xf32>
    %90 = vector.extract_strided_slice %75 {offsets = [0, 384], sizes = [2, 128], strides = [1, 1]} : vector<2x512xf32> to vector<2x128xf32>
    %91 = arith.negf %90 : vector<2x128xf32>
    %92 = math.exp %91 : vector<2x128xf32>
    %cst_33 = arith.constant 1.000000e+00 : f32
    %93 = vector.broadcast %cst_33 : f32 to vector<2x128xf32>
    %94 = arith.addf %93, %92 : vector<2x128xf32>
    %95 = arith.divf %93, %94 : vector<2x128xf32>
    %96 = arith.mulf %87, %65 : vector<2x128xf32>
    %97 = arith.mulf %81, %89 : vector<2x128xf32>
    %98 = arith.addf %96, %97 : vector<2x128xf32>
    %99 = math.tanh %98 : vector<2x128xf32>
    %100 = arith.mulf %95, %99 : vector<2x128xf32>
    %c2_34 = arith.constant 2 : index
    %c0_35 = arith.constant 0 : index
    %c0_36 = arith.constant 0 : index
    %101 = vector.load %arg3[%c2_34, %c0_35, %c0_36] : memref<8x2x128xf32, #tpu.memory_space<vmem>>, vector<1x2x128xf32>
    %102 = vector.shape_cast %101 : vector<1x2x128xf32> to vector<2x128xf32>
    %103 = vector.shape_cast %100 : vector<2x128xf32> to vector<1x2x128xf32>
    tpu.vector_store %arg3[%c2_34, %c0_35, %c0_36], %103 {strides = array<i32>} : memref<8x2x128xf32, #tpu.memory_space<vmem>>, vector<1x2x128xf32>,
    %c3 = arith.constant 3 : index
    %c0_37 = arith.constant 0 : index
    %c0_38 = arith.constant 0 : index
    %104 = vector.load %arg1[%c3, %c0_37, %c0_38] : memref<8x2x512xf32, #tpu.memory_space<vmem>>, vector<1x2x512xf32>
    %105 = vector.shape_cast %104 : vector<1x2x512xf32> to vector<2x512xf32>
    %c0_39 = arith.constant 0 : index
    %c0_40 = arith.constant 0 : index
    %106 = vector.load %arg2[%c0_39, %c0_40] : memref<128x512xf32, #tpu.memory_space<vmem>>, vector<128x512xf32>
    %cst_41 = arith.constant dense<0.000000e+00> : vector<2x512xf32>
    %107 = tpu.matmul %100, %106, %cst_41 {dimension_numbers = #tpu.dot_dimension_numbers<[1], [0], [0], [1], [0, 0, 1, 1], [], []>} : vector<2x128xf32>, vector<128x512xf32>, vector<2x512xf32> -> vector<2x512xf32>
    %108 = arith.addf %105, %107 : vector<2x512xf32>
    %109 = vector.extract_strided_slice %108 {offsets = [0, 0], sizes = [2, 128], strides = [1, 1]} : vector<2x512xf32> to vector<2x128xf32>
    %110 = arith.negf %109 : vector<2x128xf32>
    %111 = math.exp %110 : vector<2x128xf32>
    %cst_42 = arith.constant 1.000000e+00 : f32
    %112 = vector.broadcast %cst_42 : f32 to vector<2x128xf32>
    %113 = arith.addf %112, %111 : vector<2x128xf32>
    %114 = arith.divf %112, %113 : vector<2x128xf32>
    %115 = vector.extract_strided_slice %108 {offsets = [0, 128], sizes = [2, 128], strides = [1, 1]} : vector<2x512xf32> to vector<2x128xf32>
    %116 = arith.negf %115 : vector<2x128xf32>
    %117 = math.exp %116 : vector<2x128xf32>
    %cst_43 = arith.constant 1.000000e+00 : f32
    %118 = vector.broadcast %cst_43 : f32 to vector<2x128xf32>
    %119 = arith.addf %118, %117 : vector<2x128xf32>
    %120 = arith.divf %118, %119 : vector<2x128xf32>
    %121 = vector.extract_strided_slice %108 {offsets = [0, 256], sizes = [2, 128], strides = [1, 1]} : vector<2x512xf32> to vector<2x128xf32>
    %122 = math.tanh %121 : vector<2x128xf32>
    %123 = vector.extract_strided_slice %108 {offsets = [0, 384], sizes = [2, 128], strides = [1, 1]} : vector<2x512xf32> to vector<2x128xf32>
    %124 = arith.negf %123 : vector<2x128xf32>
    %125 = math.exp %124 : vector<2x128xf32>
    %cst_44 = arith.constant 1.000000e+00 : f32
    %126 = vector.broadcast %cst_44 : f32 to vector<2x128xf32>
    %127 = arith.addf %126, %125 : vector<2x128xf32>
    %128 = arith.divf %126, %127 : vector<2x128xf32>
    %129 = arith.mulf %120, %98 : vector<2x128xf32>
    %130 = arith.mulf %114, %122 : vector<2x128xf32>
    %131 = arith.addf %129, %130 : vector<2x128xf32>
    %132 = math.tanh %131 : vector<2x128xf32>
    %133 = arith.mulf %128, %132 : vector<2x128xf32>
    %c3_45 = arith.constant 3 : index
    %c0_46 = arith.constant 0 : index
    %c0_47 = arith.constant 0 : index
    %134 = vector.load %arg3[%c3_45, %c0_46, %c0_47] : memref<8x2x128xf32, #tpu.memory_space<vmem>>, vector<1x2x128xf32>
    %135 = vector.shape_cast %134 : vector<1x2x128xf32> to vector<2x128xf32>
    %136 = vector.shape_cast %133 : vector<2x128xf32> to vector<1x2x128xf32>
    tpu.vector_store %arg3[%c3_45, %c0_46, %c0_47], %136 {strides = array<i32>} : memref<8x2x128xf32, #tpu.memory_space<vmem>>, vector<1x2x128xf32>,
    %c4 = arith.constant 4 : index
    %c0_48 = arith.constant 0 : index
    %c0_49 = arith.constant 0 : index
    %137 = vector.load %arg1[%c4, %c0_48, %c0_49] : memref<8x2x512xf32, #tpu.memory_space<vmem>>, vector<1x2x512xf32>
    %138 = vector.shape_cast %137 : vector<1x2x512xf32> to vector<2x512xf32>
    %c0_50 = arith.constant 0 : index
    %c0_51 = arith.constant 0 : index
    %139 = vector.load %arg2[%c0_50, %c0_51] : memref<128x512xf32, #tpu.memory_space<vmem>>, vector<128x512xf32>
    %cst_52 = arith.constant dense<0.000000e+00> : vector<2x512xf32>
    %140 = tpu.matmul %133, %139, %cst_52 {dimension_numbers = #tpu.dot_dimension_numbers<[1], [0], [0], [1], [0, 0, 1, 1], [], []>} : vector<2x128xf32>, vector<128x512xf32>, vector<2x512xf32> -> vector<2x512xf32>
    %141 = arith.addf %138, %140 : vector<2x512xf32>
    %142 = vector.extract_strided_slice %141 {offsets = [0, 0], sizes = [2, 128], strides = [1, 1]} : vector<2x512xf32> to vector<2x128xf32>
    %143 = arith.negf %142 : vector<2x128xf32>
    %144 = math.exp %143 : vector<2x128xf32>
    %cst_53 = arith.constant 1.000000e+00 : f32
    %145 = vector.broadcast %cst_53 : f32 to vector<2x128xf32>
    %146 = arith.addf %145, %144 : vector<2x128xf32>
    %147 = arith.divf %145, %146 : vector<2x128xf32>
    %148 = vector.extract_strided_slice %141 {offsets = [0, 128], sizes = [2, 128], strides = [1, 1]} : vector<2x512xf32> to vector<2x128xf32>
    %149 = arith.negf %148 : vector<2x128xf32>
    %150 = math.exp %149 : vector<2x128xf32>
    %cst_54 = arith.constant 1.000000e+00 : f32
    %151 = vector.broadcast %cst_54 : f32 to vector<2x128xf32>
    %152 = arith.addf %151, %150 : vector<2x128xf32>
    %153 = arith.divf %151, %152 : vector<2x128xf32>
    %154 = vector.extract_strided_slice %141 {offsets = [0, 256], sizes = [2, 128], strides = [1, 1]} : vector<2x512xf32> to vector<2x128xf32>
    %155 = math.tanh %154 : vector<2x128xf32>
    %156 = vector.extract_strided_slice %141 {offsets = [0, 384], sizes = [2, 128], strides = [1, 1]} : vector<2x512xf32> to vector<2x128xf32>
    %157 = arith.negf %156 : vector<2x128xf32>
    %158 = math.exp %157 : vector<2x128xf32>
    %cst_55 = arith.constant 1.000000e+00 : f32
    %159 = vector.broadcast %cst_55 : f32 to vector<2x128xf32>
    %160 = arith.addf %159, %158 : vector<2x128xf32>
    %161 = arith.divf %159, %160 : vector<2x128xf32>
    %162 = arith.mulf %153, %131 : vector<2x128xf32>
    %163 = arith.mulf %147, %155 : vector<2x128xf32>
    %164 = arith.addf %162, %163 : vector<2x128xf32>
    %165 = math.tanh %164 : vector<2x128xf32>
    %166 = arith.mulf %161, %165 : vector<2x128xf32>
    %c4_56 = arith.constant 4 : index
    %c0_57 = arith.constant 0 : index
    %c0_58 = arith.constant 0 : index
    %167 = vector.load %arg3[%c4_56, %c0_57, %c0_58] : memref<8x2x128xf32, #tpu.memory_space<vmem>>, vector<1x2x128xf32>
    %168 = vector.shape_cast %167 : vector<1x2x128xf32> to vector<2x128xf32>
    %169 = vector.shape_cast %166 : vector<2x128xf32> to vector<1x2x128xf32>
    tpu.vector_store %arg3[%c4_56, %c0_57, %c0_58], %169 {strides = array<i32>} : memref<8x2x128xf32, #tpu.memory_space<vmem>>, vector<1x2x128xf32>,
    %c5 = arith.constant 5 : index
    %c0_59 = arith.constant 0 : index
    %c0_60 = arith.constant 0 : index
    %170 = vector.load %arg1[%c5, %c0_59, %c0_60] : memref<8x2x512xf32, #tpu.memory_space<vmem>>, vector<1x2x512xf32>
    %171 = vector.shape_cast %170 : vector<1x2x512xf32> to vector<2x512xf32>
    %c0_61 = arith.constant 0 : index
    %c0_62 = arith.constant 0 : index
    %172 = vector.load %arg2[%c0_61, %c0_62] : memref<128x512xf32, #tpu.memory_space<vmem>>, vector<128x512xf32>
    %cst_63 = arith.constant dense<0.000000e+00> : vector<2x512xf32>
    %173 = tpu.matmul %166, %172, %cst_63 {dimension_numbers = #tpu.dot_dimension_numbers<[1], [0], [0], [1], [0, 0, 1, 1], [], []>} : vector<2x128xf32>, vector<128x512xf32>, vector<2x512xf32> -> vector<2x512xf32>
    %174 = arith.addf %171, %173 : vector<2x512xf32>
    %175 = vector.extract_strided_slice %174 {offsets = [0, 0], sizes = [2, 128], strides = [1, 1]} : vector<2x512xf32> to vector<2x128xf32>
    %176 = arith.negf %175 : vector<2x128xf32>
    %177 = math.exp %176 : vector<2x128xf32>
    %cst_64 = arith.constant 1.000000e+00 : f32
    %178 = vector.broadcast %cst_64 : f32 to vector<2x128xf32>
    %179 = arith.addf %178, %177 : vector<2x128xf32>
    %180 = arith.divf %178, %179 : vector<2x128xf32>
    %181 = vector.extract_strided_slice %174 {offsets = [0, 128], sizes = [2, 128], strides = [1, 1]} : vector<2x512xf32> to vector<2x128xf32>
    %182 = arith.negf %181 : vector<2x128xf32>
    %183 = math.exp %182 : vector<2x128xf32>
    %cst_65 = arith.constant 1.000000e+00 : f32
    %184 = vector.broadcast %cst_65 : f32 to vector<2x128xf32>
    %185 = arith.addf %184, %183 : vector<2x128xf32>
    %186 = arith.divf %184, %185 : vector<2x128xf32>
    %187 = vector.extract_strided_slice %174 {offsets = [0, 256], sizes = [2, 128], strides = [1, 1]} : vector<2x512xf32> to vector<2x128xf32>
    %188 = math.tanh %187 : vector<2x128xf32>
    %189 = vector.extract_strided_slice %174 {offsets = [0, 384], sizes = [2, 128], strides = [1, 1]} : vector<2x512xf32> to vector<2x128xf32>
    %190 = arith.negf %189 : vector<2x128xf32>
    %191 = math.exp %190 : vector<2x128xf32>
    %cst_66 = arith.constant 1.000000e+00 : f32
    %192 = vector.broadcast %cst_66 : f32 to vector<2x128xf32>
    %193 = arith.addf %192, %191 : vector<2x128xf32>
    %194 = arith.divf %192, %193 : vector<2x128xf32>
    %195 = arith.mulf %186, %164 : vector<2x128xf32>
    %196 = arith.mulf %180, %188 : vector<2x128xf32>
    %197 = arith.addf %195, %196 : vector<2x128xf32>
    %198 = math.tanh %197 : vector<2x128xf32>
    %199 = arith.mulf %194, %198 : vector<2x128xf32>
    %c5_67 = arith.constant 5 : index
    %c0_68 = arith.constant 0 : index
    %c0_69 = arith.constant 0 : index
    %200 = vector.load %arg3[%c5_67, %c0_68, %c0_69] : memref<8x2x128xf32, #tpu.memory_space<vmem>>, vector<1x2x128xf32>
    %201 = vector.shape_cast %200 : vector<1x2x128xf32> to vector<2x128xf32>
    %202 = vector.shape_cast %199 : vector<2x128xf32> to vector<1x2x128xf32>
    tpu.vector_store %arg3[%c5_67, %c0_68, %c0_69], %202 {strides = array<i32>} : memref<8x2x128xf32, #tpu.memory_space<vmem>>, vector<1x2x128xf32>,
    %c6 = arith.constant 6 : index
    %c0_70 = arith.constant 0 : index
    %c0_71 = arith.constant 0 : index
    %203 = vector.load %arg1[%c6, %c0_70, %c0_71] : memref<8x2x512xf32, #tpu.memory_space<vmem>>, vector<1x2x512xf32>
    %204 = vector.shape_cast %203 : vector<1x2x512xf32> to vector<2x512xf32>
    %c0_72 = arith.constant 0 : index
    %c0_73 = arith.constant 0 : index
    %205 = vector.load %arg2[%c0_72, %c0_73] : memref<128x512xf32, #tpu.memory_space<vmem>>, vector<128x512xf32>
    %cst_74 = arith.constant dense<0.000000e+00> : vector<2x512xf32>
    %206 = tpu.matmul %199, %205, %cst_74 {dimension_numbers = #tpu.dot_dimension_numbers<[1], [0], [0], [1], [0, 0, 1, 1], [], []>} : vector<2x128xf32>, vector<128x512xf32>, vector<2x512xf32> -> vector<2x512xf32>
    %207 = arith.addf %204, %206 : vector<2x512xf32>
    %208 = vector.extract_strided_slice %207 {offsets = [0, 0], sizes = [2, 128], strides = [1, 1]} : vector<2x512xf32> to vector<2x128xf32>
    %209 = arith.negf %208 : vector<2x128xf32>
    %210 = math.exp %209 : vector<2x128xf32>
    %cst_75 = arith.constant 1.000000e+00 : f32
    %211 = vector.broadcast %cst_75 : f32 to vector<2x128xf32>
    %212 = arith.addf %211, %210 : vector<2x128xf32>
    %213 = arith.divf %211, %212 : vector<2x128xf32>
    %214 = vector.extract_strided_slice %207 {offsets = [0, 128], sizes = [2, 128], strides = [1, 1]} : vector<2x512xf32> to vector<2x128xf32>
    %215 = arith.negf %214 : vector<2x128xf32>
    %216 = math.exp %215 : vector<2x128xf32>
    %cst_76 = arith.constant 1.000000e+00 : f32
    %217 = vector.broadcast %cst_76 : f32 to vector<2x128xf32>
    %218 = arith.addf %217, %216 : vector<2x128xf32>
    %219 = arith.divf %217, %218 : vector<2x128xf32>
    %220 = vector.extract_strided_slice %207 {offsets = [0, 256], sizes = [2, 128], strides = [1, 1]} : vector<2x512xf32> to vector<2x128xf32>
    %221 = math.tanh %220 : vector<2x128xf32>
    %222 = vector.extract_strided_slice %207 {offsets = [0, 384], sizes = [2, 128], strides = [1, 1]} : vector<2x512xf32> to vector<2x128xf32>
    %223 = arith.negf %222 : vector<2x128xf32>
    %224 = math.exp %223 : vector<2x128xf32>
    %cst_77 = arith.constant 1.000000e+00 : f32
    %225 = vector.broadcast %cst_77 : f32 to vector<2x128xf32>
    %226 = arith.addf %225, %224 : vector<2x128xf32>
    %227 = arith.divf %225, %226 : vector<2x128xf32>
    %228 = arith.mulf %219, %197 : vector<2x128xf32>
    %229 = arith.mulf %213, %221 : vector<2x128xf32>
    %230 = arith.addf %228, %229 : vector<2x128xf32>
    %231 = math.tanh %230 : vector<2x128xf32>
    %232 = arith.mulf %227, %231 : vector<2x128xf32>
    %c6_78 = arith.constant 6 : index
    %c0_79 = arith.constant 0 : index
    %c0_80 = arith.constant 0 : index
    %233 = vector.load %arg3[%c6_78, %c0_79, %c0_80] : memref<8x2x128xf32, #tpu.memory_space<vmem>>, vector<1x2x128xf32>
    %234 = vector.shape_cast %233 : vector<1x2x128xf32> to vector<2x128xf32>
    %235 = vector.shape_cast %232 : vector<2x128xf32> to vector<1x2x128xf32>
    tpu.vector_store %arg3[%c6_78, %c0_79, %c0_80], %235 {strides = array<i32>} : memref<8x2x128xf32, #tpu.memory_space<vmem>>, vector<1x2x128xf32>,
    %c7 = arith.constant 7 : index
    %c0_81 = arith.constant 0 : index
    %c0_82 = arith.constant 0 : index
    %236 = vector.load %arg1[%c7, %c0_81, %c0_82] : memref<8x2x512xf32, #tpu.memory_space<vmem>>, vector<1x2x512xf32>
    %237 = vector.shape_cast %236 : vector<1x2x512xf32> to vector<2x512xf32>
    %c0_83 = arith.constant 0 : index
    %c0_84 = arith.constant 0 : index
    %238 = vector.load %arg2[%c0_83, %c0_84] : memref<128x512xf32, #tpu.memory_space<vmem>>, vector<128x512xf32>
    %cst_85 = arith.constant dense<0.000000e+00> : vector<2x512xf32>
    %239 = tpu.matmul %232, %238, %cst_85 {dimension_numbers = #tpu.dot_dimension_numbers<[1], [0], [0], [1], [0, 0, 1, 1], [], []>} : vector<2x128xf32>, vector<128x512xf32>, vector<2x512xf32> -> vector<2x512xf32>
    %240 = arith.addf %237, %239 : vector<2x512xf32>
    %241 = vector.extract_strided_slice %240 {offsets = [0, 0], sizes = [2, 128], strides = [1, 1]} : vector<2x512xf32> to vector<2x128xf32>
    %242 = arith.negf %241 : vector<2x128xf32>
    %243 = math.exp %242 : vector<2x128xf32>
    %cst_86 = arith.constant 1.000000e+00 : f32
    %244 = vector.broadcast %cst_86 : f32 to vector<2x128xf32>
    %245 = arith.addf %244, %243 : vector<2x128xf32>
    %246 = arith.divf %244, %245 : vector<2x128xf32>
    %247 = vector.extract_strided_slice %240 {offsets = [0, 128], sizes = [2, 128], strides = [1, 1]} : vector<2x512xf32> to vector<2x128xf32>
    %248 = arith.negf %247 : vector<2x128xf32>
    %249 = math.exp %248 : vector<2x128xf32>
    %cst_87 = arith.constant 1.000000e+00 : f32
    %250 = vector.broadcast %cst_87 : f32 to vector<2x128xf32>
    %251 = arith.addf %250, %249 : vector<2x128xf32>
    %252 = arith.divf %250, %251 : vector<2x128xf32>
    %253 = vector.extract_strided_slice %240 {offsets = [0, 256], sizes = [2, 128], strides = [1, 1]} : vector<2x512xf32> to vector<2x128xf32>
    %254 = math.tanh %253 : vector<2x128xf32>
    %255 = vector.extract_strided_slice %240 {offsets = [0, 384], sizes = [2, 128], strides = [1, 1]} : vector<2x512xf32> to vector<2x128xf32>
    %256 = arith.negf %255 : vector<2x128xf32>
    %257 = math.exp %256 : vector<2x128xf32>
    %cst_88 = arith.constant 1.000000e+00 : f32
    %258 = vector.broadcast %cst_88 : f32 to vector<2x128xf32>
    %259 = arith.addf %258, %257 : vector<2x128xf32>
    %260 = arith.divf %258, %259 : vector<2x128xf32>
    %261 = arith.mulf %252, %230 : vector<2x128xf32>
    %262 = arith.mulf %246, %254 : vector<2x128xf32>
    %263 = arith.addf %261, %262 : vector<2x128xf32>
    %264 = math.tanh %263 : vector<2x128xf32>
    %265 = arith.mulf %260, %264 : vector<2x128xf32>
    %c7_89 = arith.constant 7 : index
    %c0_90 = arith.constant 0 : index
    %c0_91 = arith.constant 0 : index
    %266 = vector.load %arg3[%c7_89, %c0_90, %c0_91] : memref<8x2x128xf32, #tpu.memory_space<vmem>>, vector<1x2x128xf32>
    %267 = vector.shape_cast %266 : vector<1x2x128xf32> to vector<2x128xf32>
    %268 = vector.shape_cast %265 : vector<2x128xf32> to vector<1x2x128xf32>
    tpu.vector_store %arg3[%c7_89, %c0_90, %c0_91], %268 {strides = array<i32>} : memref<8x2x128xf32, #tpu.memory_space<vmem>>, vector<1x2x128xf32>,
    %c0_92 = arith.constant 0 : index
    %c0_93 = arith.constant 0 : index
    %269 = vector.load %arg4[%c0_92, %c0_93] : memref<2x128xf32, #tpu.memory_space<vmem>>, vector<2x128xf32>
    tpu.vector_store %arg4[%c0_92, %c0_93], %265 {strides = array<i32>} : memref<2x128xf32, #tpu.memory_space<vmem>>, vector<2x128xf32>,
    %c0_94 = arith.constant 0 : index
    %c0_95 = arith.constant 0 : index
    %270 = vector.load %arg5[%c0_94, %c0_95] : memref<2x128xf32, #tpu.memory_space<vmem>>, vector<2x128xf32>
    tpu.vector_store %arg5[%c0_94, %c0_95], %263 {strides = array<i32>} : memref<2x128xf32, #tpu.memory_space<vmem>>, vector<2x128xf32>,
    return
  }
  func.func @transform_0(%arg0: i32) -> (i32, i32, i32) {
    %c0_i32 = arith.constant 0 : i32
    %c0_i32_0 = arith.constant 0 : i32
    %c0_i32_1 = arith.constant 0 : i32
    return %arg0, %c0_i32, %c0_i32_0 : i32, i32, i32
  }
  func.func @transform_1(%arg0: i32) -> (i32, i32) {
    %c0_i32 = arith.constant 0 : i32
    %c0_i32_0 = arith.constant 0 : i32
    %c0_i32_1 = arith.constant 0 : i32
    return %c0_i32, %c0_i32_0 : i32, i32
  }
  func.func @transform_2(%arg0: i32) -> (i32, i32, i32) {
    %c0_i32 = arith.constant 0 : i32
    %c0_i32_0 = arith.constant 0 : i32
    %c0_i32_1 = arith.constant 0 : i32
    return %arg0, %c0_i32, %c0_i32_0 : i32, i32, i32
  }
}

module attributes {stable_mosaic.version = 11 : i64} {
  func.func @_matmul_bias_kernel(%arg0: i32, %arg1: i32, %arg2: i32, %arg3: memref<16x32xf32, #tpu.memory_space<vmem>>, %arg4: memref<32x16xf32, #tpu.memory_space<vmem>>, %arg5: memref<1x16xf32, #tpu.memory_space<vmem>>, %arg6: memref<16x16xf32, #tpu.memory_space<vmem>>, %arg7: memref<16x16xf32, #tpu.memory_space<vmem>>) attributes {dimension_semantics = [#tpu.dimension_semantics<parallel>, #tpu.dimension_semantics<parallel>, #tpu.dimension_semantics<arbitrary>], iteration_bounds = array<i64: 1, 1, 1>, scalar_prefetch = 0 : i64, scratch_operands = 1 : i64, tpu.core_type = #tpu.core_type<tc>, window_params = [{transform_indices = @transform_0, window_bounds = array<i64: 16, 32>}, {transform_indices = @transform_1, window_bounds = array<i64: 32, 16>}, {transform_indices = @transform_2, window_bounds = array<i64: 1, 16>}, {transform_indices = @transform_3, window_bounds = array<i64: 16, 16>}]} {
    %c0_i32 = arith.constant 0 : i32
    %0 = arith.cmpi eq, %arg2, %c0_i32 : i32
    %1 = arith.extui %0 : i1 to i32
    %c0_i32_0 = arith.constant 0 : i32
    %2 = arith.cmpi ne, %1, %c0_i32_0 : i32
    scf.if %2 {
      %cst_10 = arith.constant 0.000000e+00 : f32
      %12 = vector.broadcast %cst_10 : f32 to vector<16x16xf32>
      %c0_11 = arith.constant 0 : index
      %c0_12 = arith.constant 0 : index
      %13 = vector.load %arg7[%c0_11, %c0_12] : memref<16x16xf32, #tpu.memory_space<vmem>>, vector<16x16xf32>
      tpu.vector_store %arg7[%c0_11, %c0_12], %12 {strides = array<i32>} : memref<16x16xf32, #tpu.memory_space<vmem>>, vector<16x16xf32>,
    } else {
    }
    %c0 = arith.constant 0 : index
    %c0_1 = arith.constant 0 : index
    %3 = vector.load %arg7[%c0, %c0_1] : memref<16x16xf32, #tpu.memory_space<vmem>>, vector<16x16xf32>
    %c0_2 = arith.constant 0 : index
    %c0_3 = arith.constant 0 : index
    %4 = vector.load %arg3[%c0_2, %c0_3] : memref<16x32xf32, #tpu.memory_space<vmem>>, vector<16x32xf32>
    %c0_4 = arith.constant 0 : index
    %c0_5 = arith.constant 0 : index
    %5 = vector.load %arg4[%c0_4, %c0_5] : memref<32x16xf32, #tpu.memory_space<vmem>>, vector<32x16xf32>
    %cst = arith.constant dense<0.000000e+00> : vector<16x16xf32>
    %6 = tpu.matmul %4, %5, %cst {dimension_numbers = #tpu.dot_dimension_numbers<[1], [0], [0], [1], [0, 0, 1, 1], [], []>} : vector<16x32xf32>, vector<32x16xf32>, vector<16x16xf32> -> vector<16x16xf32>
    %7 = arith.addf %3, %6 : vector<16x16xf32>
    %c0_6 = arith.constant 0 : index
    %c0_7 = arith.constant 0 : index
    %8 = vector.load %arg7[%c0_6, %c0_7] : memref<16x16xf32, #tpu.memory_space<vmem>>, vector<16x16xf32>
    tpu.vector_store %arg7[%c0_6, %c0_7], %7 {strides = array<i32>} : memref<16x16xf32, #tpu.memory_space<vmem>>, vector<16x16xf32>,
    %c0_i32_8 = arith.constant 0 : i32
    %9 = arith.cmpi eq, %arg2, %c0_i32_8 : i32
    %10 = arith.extui %9 : i1 to i32
    %c0_i32_9 = arith.constant 0 : i32
    %11 = arith.cmpi ne, %10, %c0_i32_9 : i32
    scf.if %11 {
      %c0_10 = arith.constant 0 : index
      %c0_11 = arith.constant 0 : index
      %12 = vector.load %arg7[%c0_10, %c0_11] : memref<16x16xf32, #tpu.memory_space<vmem>>, vector<16x16xf32>
      %c0_12 = arith.constant 0 : index
      %c0_13 = arith.constant 0 : index
      %13 = vector.load %arg5[%c0_12, %c0_13] : memref<1x16xf32, #tpu.memory_space<vmem>>, vector<1x16xf32>
      %14 = vector.broadcast %13 : vector<1x16xf32> to vector<16x16xf32>
      %15 = arith.addf %12, %14 : vector<16x16xf32>
      %c0_14 = arith.constant 0 : index
      %c0_15 = arith.constant 0 : index
      %16 = vector.load %arg6[%c0_14, %c0_15] : memref<16x16xf32, #tpu.memory_space<vmem>>, vector<16x16xf32>
      tpu.vector_store %arg6[%c0_14, %c0_15], %15 {strides = array<i32>} : memref<16x16xf32, #tpu.memory_space<vmem>>, vector<16x16xf32>,
    } else {
    }
    return
  }
  func.func @transform_0(%arg0: i32, %arg1: i32, %arg2: i32) -> (i32, i32) {
    %c0_i32 = arith.constant 0 : i32
    return %arg0, %arg2 : i32, i32
  }
  func.func @transform_1(%arg0: i32, %arg1: i32, %arg2: i32) -> (i32, i32) {
    %c0_i32 = arith.constant 0 : i32
    return %arg2, %arg1 : i32, i32
  }
  func.func @transform_2(%arg0: i32, %arg1: i32, %arg2: i32) -> (i32, i32) {
    %c0_i32 = arith.constant 0 : i32
    %c0_i32_0 = arith.constant 0 : i32
    return %c0_i32, %arg1 : i32, i32
  }
  func.func @transform_3(%arg0: i32, %arg1: i32, %arg2: i32) -> (i32, i32) {
    %c0_i32 = arith.constant 0 : i32
    return %arg0, %arg1 : i32, i32
  }
}

module attributes {stable_mosaic.version = 11 : i64} {
  func.func @_matmul_bias_kernel(%arg0: i32, %arg1: i32, %arg2: i32, %arg3: memref<16x128xf32, #tpu.memory_space<vmem>>, %arg4: memref<128x512xf32, #tpu.memory_space<vmem>>, %arg5: memref<1x512xf32, #tpu.memory_space<vmem>>, %arg6: memref<16x512xf32, #tpu.memory_space<vmem>>, %arg7: memref<16x512xf32, #tpu.memory_space<vmem>>) attributes {dimension_semantics = [#tpu.dimension_semantics<parallel>, #tpu.dimension_semantics<parallel>, #tpu.dimension_semantics<arbitrary>], iteration_bounds = array<i64: 1, 1, 1>, scalar_prefetch = 0 : i64, scratch_operands = 1 : i64, tpu.core_type = #tpu.core_type<tc>, window_params = [{transform_indices = @transform_0, window_bounds = array<i64: 16, 128>}, {transform_indices = @transform_1, window_bounds = array<i64: 128, 512>}, {transform_indices = @transform_2, window_bounds = array<i64: 1, 512>}, {transform_indices = @transform_3, window_bounds = array<i64: 16, 512>}]} {
    %c0_i32 = arith.constant 0 : i32
    %0 = arith.cmpi eq, %arg2, %c0_i32 : i32
    %1 = arith.extui %0 : i1 to i32
    %c0_i32_0 = arith.constant 0 : i32
    %2 = arith.cmpi ne, %1, %c0_i32_0 : i32
    scf.if %2 {
      %cst_10 = arith.constant 0.000000e+00 : f32
      %12 = vector.broadcast %cst_10 : f32 to vector<16x512xf32>
      %c0_11 = arith.constant 0 : index
      %c0_12 = arith.constant 0 : index
      %13 = vector.load %arg7[%c0_11, %c0_12] : memref<16x512xf32, #tpu.memory_space<vmem>>, vector<16x512xf32>
      tpu.vector_store %arg7[%c0_11, %c0_12], %12 {strides = array<i32>} : memref<16x512xf32, #tpu.memory_space<vmem>>, vector<16x512xf32>,
    } else {
    }
    %c0 = arith.constant 0 : index
    %c0_1 = arith.constant 0 : index
    %3 = vector.load %arg7[%c0, %c0_1] : memref<16x512xf32, #tpu.memory_space<vmem>>, vector<16x512xf32>
    %c0_2 = arith.constant 0 : index
    %c0_3 = arith.constant 0 : index
    %4 = vector.load %arg3[%c0_2, %c0_3] : memref<16x128xf32, #tpu.memory_space<vmem>>, vector<16x128xf32>
    %c0_4 = arith.constant 0 : index
    %c0_5 = arith.constant 0 : index
    %5 = vector.load %arg4[%c0_4, %c0_5] : memref<128x512xf32, #tpu.memory_space<vmem>>, vector<128x512xf32>
    %cst = arith.constant dense<0.000000e+00> : vector<16x512xf32>
    %6 = tpu.matmul %4, %5, %cst {dimension_numbers = #tpu.dot_dimension_numbers<[1], [0], [0], [1], [0, 0, 1, 1], [], []>} : vector<16x128xf32>, vector<128x512xf32>, vector<16x512xf32> -> vector<16x512xf32>
    %7 = arith.addf %3, %6 : vector<16x512xf32>
    %c0_6 = arith.constant 0 : index
    %c0_7 = arith.constant 0 : index
    %8 = vector.load %arg7[%c0_6, %c0_7] : memref<16x512xf32, #tpu.memory_space<vmem>>, vector<16x512xf32>
    tpu.vector_store %arg7[%c0_6, %c0_7], %7 {strides = array<i32>} : memref<16x512xf32, #tpu.memory_space<vmem>>, vector<16x512xf32>,
    %c0_i32_8 = arith.constant 0 : i32
    %9 = arith.cmpi eq, %arg2, %c0_i32_8 : i32
    %10 = arith.extui %9 : i1 to i32
    %c0_i32_9 = arith.constant 0 : i32
    %11 = arith.cmpi ne, %10, %c0_i32_9 : i32
    scf.if %11 {
      %c0_10 = arith.constant 0 : index
      %c0_11 = arith.constant 0 : index
      %12 = vector.load %arg7[%c0_10, %c0_11] : memref<16x512xf32, #tpu.memory_space<vmem>>, vector<16x512xf32>
      %c0_12 = arith.constant 0 : index
      %c0_13 = arith.constant 0 : index
      %13 = vector.load %arg5[%c0_12, %c0_13] : memref<1x512xf32, #tpu.memory_space<vmem>>, vector<1x512xf32>
      %14 = vector.broadcast %13 : vector<1x512xf32> to vector<16x512xf32>
      %15 = arith.addf %12, %14 : vector<16x512xf32>
      %c0_14 = arith.constant 0 : index
      %c0_15 = arith.constant 0 : index
      %16 = vector.load %arg6[%c0_14, %c0_15] : memref<16x512xf32, #tpu.memory_space<vmem>>, vector<16x512xf32>
      tpu.vector_store %arg6[%c0_14, %c0_15], %15 {strides = array<i32>} : memref<16x512xf32, #tpu.memory_space<vmem>>, vector<16x512xf32>,
    } else {
    }
    return
  }
  func.func @transform_0(%arg0: i32, %arg1: i32, %arg2: i32) -> (i32, i32) {
    %c0_i32 = arith.constant 0 : i32
    return %arg0, %arg2 : i32, i32
  }
  func.func @transform_1(%arg0: i32, %arg1: i32, %arg2: i32) -> (i32, i32) {
    %c0_i32 = arith.constant 0 : i32
    return %arg2, %arg1 : i32, i32
  }
  func.func @transform_2(%arg0: i32, %arg1: i32, %arg2: i32) -> (i32, i32) {
    %c0_i32 = arith.constant 0 : i32
    %c0_i32_0 = arith.constant 0 : i32
    return %c0_i32, %arg1 : i32, i32
  }
  func.func @transform_3(%arg0: i32, %arg1: i32, %arg2: i32) -> (i32, i32) {
    %c0_i32 = arith.constant 0 : i32
    return %arg0, %arg1 : i32, i32
  }
}

module attributes {stable_mosaic.version = 11 : i64} {
  func.func @_matmul_bias_kernel(%arg0: i32, %arg1: i32, %arg2: i32, %arg3: memref<16x16xf32, #tpu.memory_space<vmem>>, %arg4: memref<16x32xf32, #tpu.memory_space<vmem>>, %arg5: memref<1x32xf32, #tpu.memory_space<vmem>>, %arg6: memref<16x32xf32, #tpu.memory_space<vmem>>, %arg7: memref<16x32xf32, #tpu.memory_space<vmem>>) attributes {dimension_semantics = [#tpu.dimension_semantics<parallel>, #tpu.dimension_semantics<parallel>, #tpu.dimension_semantics<arbitrary>], iteration_bounds = array<i64: 1, 1, 1>, scalar_prefetch = 0 : i64, scratch_operands = 1 : i64, tpu.core_type = #tpu.core_type<tc>, window_params = [{transform_indices = @transform_0, window_bounds = array<i64: 16, 16>}, {transform_indices = @transform_1, window_bounds = array<i64: 16, 32>}, {transform_indices = @transform_2, window_bounds = array<i64: 1, 32>}, {transform_indices = @transform_3, window_bounds = array<i64: 16, 32>}]} {
    %c0_i32 = arith.constant 0 : i32
    %0 = arith.cmpi eq, %arg2, %c0_i32 : i32
    %1 = arith.extui %0 : i1 to i32
    %c0_i32_0 = arith.constant 0 : i32
    %2 = arith.cmpi ne, %1, %c0_i32_0 : i32
    scf.if %2 {
      %cst_10 = arith.constant 0.000000e+00 : f32
      %12 = vector.broadcast %cst_10 : f32 to vector<16x32xf32>
      %c0_11 = arith.constant 0 : index
      %c0_12 = arith.constant 0 : index
      %13 = vector.load %arg7[%c0_11, %c0_12] : memref<16x32xf32, #tpu.memory_space<vmem>>, vector<16x32xf32>
      tpu.vector_store %arg7[%c0_11, %c0_12], %12 {strides = array<i32>} : memref<16x32xf32, #tpu.memory_space<vmem>>, vector<16x32xf32>,
    } else {
    }
    %c0 = arith.constant 0 : index
    %c0_1 = arith.constant 0 : index
    %3 = vector.load %arg7[%c0, %c0_1] : memref<16x32xf32, #tpu.memory_space<vmem>>, vector<16x32xf32>
    %c0_2 = arith.constant 0 : index
    %c0_3 = arith.constant 0 : index
    %4 = vector.load %arg3[%c0_2, %c0_3] : memref<16x16xf32, #tpu.memory_space<vmem>>, vector<16x16xf32>
    %c0_4 = arith.constant 0 : index
    %c0_5 = arith.constant 0 : index
    %5 = vector.load %arg4[%c0_4, %c0_5] : memref<16x32xf32, #tpu.memory_space<vmem>>, vector<16x32xf32>
    %cst = arith.constant dense<0.000000e+00> : vector<16x32xf32>
    %6 = tpu.matmul %4, %5, %cst {dimension_numbers = #tpu.dot_dimension_numbers<[1], [0], [0], [1], [0, 0, 1, 1], [], []>} : vector<16x16xf32>, vector<16x32xf32>, vector<16x32xf32> -> vector<16x32xf32>
    %7 = arith.addf %3, %6 : vector<16x32xf32>
    %c0_6 = arith.constant 0 : index
    %c0_7 = arith.constant 0 : index
    %8 = vector.load %arg7[%c0_6, %c0_7] : memref<16x32xf32, #tpu.memory_space<vmem>>, vector<16x32xf32>
    tpu.vector_store %arg7[%c0_6, %c0_7], %7 {strides = array<i32>} : memref<16x32xf32, #tpu.memory_space<vmem>>, vector<16x32xf32>,
    %c0_i32_8 = arith.constant 0 : i32
    %9 = arith.cmpi eq, %arg2, %c0_i32_8 : i32
    %10 = arith.extui %9 : i1 to i32
    %c0_i32_9 = arith.constant 0 : i32
    %11 = arith.cmpi ne, %10, %c0_i32_9 : i32
    scf.if %11 {
      %c0_10 = arith.constant 0 : index
      %c0_11 = arith.constant 0 : index
      %12 = vector.load %arg7[%c0_10, %c0_11] : memref<16x32xf32, #tpu.memory_space<vmem>>, vector<16x32xf32>
      %c0_12 = arith.constant 0 : index
      %c0_13 = arith.constant 0 : index
      %13 = vector.load %arg5[%c0_12, %c0_13] : memref<1x32xf32, #tpu.memory_space<vmem>>, vector<1x32xf32>
      %14 = vector.broadcast %13 : vector<1x32xf32> to vector<16x32xf32>
      %15 = arith.addf %12, %14 : vector<16x32xf32>
      %c0_14 = arith.constant 0 : index
      %c0_15 = arith.constant 0 : index
      %16 = vector.load %arg6[%c0_14, %c0_15] : memref<16x32xf32, #tpu.memory_space<vmem>>, vector<16x32xf32>
      tpu.vector_store %arg6[%c0_14, %c0_15], %15 {strides = array<i32>} : memref<16x32xf32, #tpu.memory_space<vmem>>, vector<16x32xf32>,
    } else {
    }
    return
  }
  func.func @transform_0(%arg0: i32, %arg1: i32, %arg2: i32) -> (i32, i32) {
    %c0_i32 = arith.constant 0 : i32
    return %arg0, %arg2 : i32, i32
  }
  func.func @transform_1(%arg0: i32, %arg1: i32, %arg2: i32) -> (i32, i32) {
    %c0_i32 = arith.constant 0 : i32
    return %arg2, %arg1 : i32, i32
  }
  func.func @transform_2(%arg0: i32, %arg1: i32, %arg2: i32) -> (i32, i32) {
    %c0_i32 = arith.constant 0 : i32
    %c0_i32_0 = arith.constant 0 : i32
    return %c0_i32, %arg1 : i32, i32
  }
  func.func @transform_3(%arg0: i32, %arg1: i32, %arg2: i32) -> (i32, i32) {
    %c0_i32 = arith.constant 0 : i32
    return %arg0, %arg1 : i32, i32
  }
}

</mosaic_0001>

<bundles_post_ra>
// kernel: stackoverflow_net_forward.10
= control target key start
LH: loop header
LB: loop body
LE: loop exit
PB: predicated region body
PF: predicated region fallthrough
CT: control target
= control target key end

     0   :  { %vm29_vm0 = vcmask 261120   ;;  %vm18_vm1 = vcmask 130048   ;;  %v157_v2 = vmov 0.0   ;;  %s213_s1 = inlined_call_operand.vmem [shape: f32[32,16], index: 1, kind: input, shape index: {}]   ;;  %s214_s0 = inlined_call_operand.vmem [shape: f32[16,32], index: 0, kind: input, shape index: {}]   ;;  %s215_s2 = inlined_call_operand.vmem [shape: f32[1,16], index: 2, kind: input, shape index: {}]   ;;  %s216_s3 = inlined_call_operand.vmem [shape: f32[16,16], index: 3, kind: output, shape index: {}]  }
   0x1   :  { %v28_v0 = vld [vmem:[%s213_s1 + $0x18] sm:$0xff]  ;;  %v27_v1 = vld [vmem:[%s213_s1 + $0x10] sm:$0xff]  ;;  %20 = vst.msk [vmem:[#allocation2 + $0x8] sm:$0xff] %vm18_vm1, %v157_v2  ;;  %19 = vst.msk [vmem:[#allocation2] sm:$0xff] %vm18_vm1, %v157_v2 }
   0x2   :  { %145 = vmatprep.subr.mxu0 %v28_v0  ;;  %v23_v3 = vld [vmem:[%s214_s0] sm:$0xff]  ;;  %v26_v4 = vld [vmem:[%s213_s1 + $0x8] sm:$0xff] }
   0x3   :  { %146 = vmatpush3.msra.mxu0 %v28_v0  ;;  %153 = vmatprep.mubr.msk.f32.mxu0 %vm29_vm0, %v23_v3  ;;  %v25_v5 = vld [vmem:[%s213_s1] sm:$0xff]  ;;  %v24_v6 = vld [vmem:[%s214_s0 + $0x8] sm:$0xff] }
   0x4   :  { %147 = vmatprep.subr.mxu0 %v27_v1  ;;  %v138_v13 = vld [vmem:[%s215_s2] ss:$0 sm:$0xff] }
   0x5   :  { %148 = vmatpush3.msra.mxu0 %v27_v1 }
   0x6   :  { %149 = vmatprep.subr.mxu0 %v26_v4 }
   0x7   :  { %150 = vmatpush3.msra.mxu0 %v26_v4 }
   0x8   :  { %151 = vmatprep.subr.mxu0 %v25_v5  ;;  %v22_v7 = vld [vmem:[#allocation2 + $0x8] sm:$0xff]  ;;  %v21_v9 = vld [vmem:[#allocation2] sm:$0xff] }
   0x9   :  { %152 = vmatpush3.msra.mxu0 %v25_v5 }
   0xa   :  { %154 = vmatmul.mubr.msk.f32.vlgmr.msra.gmra.mxu0 %vm29_vm0, %v24_v6 }
  0xca   :  { %v155_v8 = vpop.f32.mrf.mxu0 }
  0xcb   :  { %v112_v10 = vadd.f32 %v155_v8, %v22_v7 }
  0xcc   :  { %v102_v11 = vpop.f32.mrf.mxu0 }
  0xcd   :  { %115 = vst.msk [vmem:[#allocation2 + $0x8] sm:$0xff] %vm18_vm1, %v112_v10  ;;  %v111_v12 = vadd.f32 %v102_v11, %v21_v9 }
  0xcf   :  { %114 = vst.msk [vmem:[#allocation2] sm:$0xff] %vm18_vm1, %v111_v12 }
  0xd4   :  { %v120_v14 = vld [vmem:[#allocation2 + $0x8] sm:$0xff] }
  0xd5   :  { %v129_v15 = vadd.f32 %v138_v13, %v120_v14 }
  0xd6   :  { %v119_v16 = vld [vmem:[#allocation2] sm:$0xff] }
  0xd7   :  { %131 = vst.msk [vmem:[%s216_s3 + $0x8] sm:$0xff] %vm18_vm1, %v129_v15  ;;  %v128_v17 = vadd.f32 %v138_v13, %v119_v16 }
  0xd9   :  { %130 = vst.msk [vmem:[%s216_s3] sm:$0xff] %vm18_vm1, %v128_v17 }

// kernel: stackoverflow_net_forward.6
= control target key start
LH: loop header
LB: loop body
LE: loop exit
PB: predicated region body
PF: predicated region fallthrough
CT: control target
= control target key end

     0   :  { %8 = vsyncpa [#allocation4], 0  ;;  %s416_s0 = inlined_call_operand.vmem [shape: f32[16,16], index: 0, kind: input, shape index: {}]   ;;  %s417_s1 = inlined_call_operand.hbm [shape: f32[16,512], index: 1, kind: input, shape index: {}]   ;;  %s418_s2 = inlined_call_operand.hbm [shape: f32[1,512], index: 2, kind: input, shape index: {}]   ;;  %s419_s3 = inlined_call_operand.vmem [shape: f32[16,512], index: 3, kind: output, shape index: {}]  }
   0x1   :  { %9 = vsyncpa [#allocation6], 0  ;;  %s355_s12 = smov [#allocation3]  }
   0x2   :  { %s17_s13 = sshll.u32 %s355_s12, 4  ;;  %s18_s13 = int_to_ptr.vmem [resolvable:$true] %s17_s13 }
   0x3   :  { %s319_s14 = scalar_lea.vmem %s18_s13, 1024  ;;  %p324_p1 = scmp.lt.s32.totalorder %s18_s13, %s18_s13 }
   0x4   :  { %p320_p0 = scmp.ne.s32.totalorder %s18_s13, %s319_s14  ;;  %p325_p2 = scmp.lt.s32.totalorder %s319_s14, %s319_s14 }
   0x6   :  { %p326_p3 = por %p325_p2, %p324_p1 }
   0x8   :  { %p327_p4 = pnand %p326_p3, %p320_p0 }
   0xa   :  { %330 = shalt.err (!%p327_p4)
}
   0xb   :  { %s356_s15 = smov 512   ;;  %s357_s16 = smov 32  }
   0xc   :  { %23 = dma.hbm_to_vmem [thread:$0]  %s417_s1, 1024, %s18_s13, [#allocation4], %s356_s15, %s356_s15, %s357_s16  }
   0xd   :  { %s358_s19 = smov [#allocation5]  }
   0xe   :  { %s30_s20 = sshll.u32 %s358_s19, 4  ;;  %s31_s20 = int_to_ptr.vmem [resolvable:$true] %s30_s20 }
   0xf   :  { %s339_s21 = scalar_lea.vmem %s31_s20, 64  ;;  %p344_p6 = scmp.lt.s32.totalorder %s31_s20, %s31_s20 }
  0x10   :  { %p340_p5 = scmp.ne.s32.totalorder %s31_s20, %s339_s21  ;;  %p345_p7 = scmp.lt.s32.totalorder %s339_s21, %s339_s21 }
  0x12   :  { %p346_p8 = por %p345_p7, %p344_p6 }
  0x14   :  { %p347_p9 = pnand %p346_p8, %p340_p5 }
  0x16   :  { %350 = shalt.err (!%p347_p9)
}
  0x17   :  { %33 = dma.hbm_to_vmem [thread:$0]  %s418_s2, 64, %s31_s20, [#allocation6]  }
  0x18   :  { %351 = dma.done.wait [#allocation4], 1024  }
  0x19   :  { %352 = vsyncadd [#allocation4], 4294966272 }
  0x1a   :  { %353 = dma.done.wait [#allocation6], 64  }
  0x1b   :  { %354 = vsyncadd [#allocation6], 4294967232  ;;  %v359_v0 = vmov 0.0   ;;  %v67_v1 = vld [vmem:[#allocation3 + $0x28] sm:$0xff]  ;;  %v69_v2 = vld [vmem:[#allocation3 + $0x38] sm:$0xff]  ;;  %vm70_vm0 = vcmask 130048   ;;  %v260_v11 = vlaneseq }
  0x1c   :  { %141 = vmatprep.mubr.f32.mxu0 %v359_v0  ;;  %218 = vmatprep.mubr.f32.mxu1 %v359_v0  ;;  %v66_v3 = vld [vmem:[#allocation3 + $0x20] sm:$0xff]  ;;  %v68_v4 = vld [vmem:[#allocation3 + $0x30] sm:$0xff]  ;;  %v63_v5 = vld [vmem:[#allocation3 + $0x8] sm:$0xff] }
  0x1d   :  { %105 = vmatprep.subr.mxu0 %v67_v1  ;;  %182 = vmatprep.subr.mxu1 %v69_v2  ;;  %v65_v6 = vld [vmem:[#allocation3 + $0x18] sm:$0xff]  ;;  %v62_v7 = vld [vmem:[#allocation3] sm:$0xff]  ;;  %v64_v8 = vld [vmem:[#allocation3 + $0x10] sm:$0xff]  ;;  %v261_v12 = vshrl.u32 %v260_v11, 7 }
  0x1e   :  { %106 = vmatpush1.msra.mxu0 %v66_v3  ;;  %183 = vmatpush1.msra.mxu1 %v68_v4  ;;  %v60_v9 = vld [vmem:[%s416_s0] sm:$0xff]  ;;  %v61_v10 = vld [vmem:[%s416_s0 + $0x8] sm:$0xff] }
  0x1f   :  { %107 = vmatprep.subr.mxu0 %v63_v5  ;;  %184 = vmatprep.subr.mxu1 %v65_v6  ;;  %v262_v13 = vsub.s32 0, %v261_v12  ;;  %v270_v14 = vsub.s32 2, %v261_v12  ;;  %v258_v15 = vld [vmem:[#allocation5] sm:$0xf]  ;;  %v266_v16 = vsub.s32 1, %v261_v12  ;;  %v274_v17 = vsub.s32 3, %v261_v12 }
  0x20   :  { %108 = vmatpush1.msra.mxu0 %v62_v7  ;;  %185 = vmatpush1.msra.mxu1 %v64_v8 }
  0x21   :  { %302 = vmatmul.mubr.msk.f32.vlgmr.msra.gmra.mxu0 %vm70_vm0, %v60_v9  ;;  %304 = vmatmul.mubr.msk.f32.vlgmr.msra.gmra.mxu1 %vm70_vm0, %v60_v9  ;;  %v263_v18 = vrot.slane %v258_v15, %v262_v13  ;;  %v271_v19 = vrot.slane %v258_v15, %v270_v14  ;;  %v267_v20 = vrot.slane %v258_v15, %v266_v16 }
  0x22   :  { %147 = vmatprep.mubr.f32.mxu0 %v359_v0  ;;  %224 = vmatprep.mubr.f32.mxu1 %v359_v0  ;;  %v275_v21 = vrot.slane %v258_v15, %v274_v17 }
  0x25   :  { %303 = vmatmul.mubr.msk.f32.gmra.mxu0 %vm70_vm0, %v61_v10  ;;  %305 = vmatmul.mubr.msk.f32.gmra.mxu1 %vm70_vm0, %v61_v10 }
  0xe1   :  { %v143_v22 = vpop.f32.mrf.mxu0  ;;  %v220_v23 = vpop.f32.mrf.mxu1 }
  0xe2   :  { %v280_v24 = vadd.f32 %v263_v18, %v143_v22  ;;  %v282_v25 = vadd.f32 %v271_v19, %v220_v23 }
  0xe3   :  { %v145_v26 = vpop.f32.mrf.mxu0  ;;  %v222_v27 = vpop.f32.mrf.mxu1 }
  0xe4   :  { %288 = vst [vmem:[%s419_s3] sm:$0xff] %v280_v24  ;;  %290 = vst [vmem:[%s419_s3 + $0x10] sm:$0xff] %v282_v25  ;;  %v281_v28 = vadd.f32 %v267_v20, %v145_v26  ;;  %v283_v29 = vadd.f32 %v275_v21, %v222_v27 }
  0xe5   :  { %v149_v30 = vpop.f32.mrf.mxu0  ;;  %v226_v31 = vpop.f32.mrf.mxu1 }
  0xe6   :  { %289 = vst [vmem:[%s419_s3 + $0x8] sm:$0xff] %v281_v28  ;;  %291 = vst [vmem:[%s419_s3 + $0x18] sm:$0xff] %v283_v29  ;;  %v284_v32 = vadd.f32 %v263_v18, %v149_v30  ;;  %v286_v33 = vadd.f32 %v271_v19, %v226_v31 }
  0xe7   :  { %v151_v34 = vpop.f32.mrf.mxu0  ;;  %v228_v35 = vpop.f32.mrf.mxu1 }
  0xe8   :  { %292 = vst [vmem:[%s419_s3 + $0x20] sm:$0xff] %v284_v32  ;;  %294 = vst [vmem:[%s419_s3 + $0x30] sm:$0xff] %v286_v33  ;;  %v285_v36 = vadd.f32 %v267_v20, %v151_v34  ;;  %v287_v37 = vadd.f32 %v275_v21, %v228_v35 }
  0xea   :  { %293 = vst [vmem:[%s419_s3 + $0x28] sm:$0xff] %v285_v36  ;;  %295 = vst [vmem:[%s419_s3 + $0x38] sm:$0xff] %v287_v37 }
  0xeb   :  { %300 = vsyncpa [#allocation4], 1 }
  0xec   :  { %301 = vsyncpa [#allocation6], 1 }

// kernel: stackoverflow_net_forward.8
= control target key start
LH: loop header
LB: loop body
LE: loop exit
PB: predicated region body
PF: predicated region fallthrough
CT: control target
= control target key end

     0   :  { %v324_v3 = vmov 0.0   ;;  %s574_s1 = inlined_call_operand.vmem [shape: f32[128,512], index: 1, kind: input, shape index: {}]   ;;  %s575_s0 = inlined_call_operand.vmem [shape: f32[16,128], index: 0, kind: input, shape index: {}]   ;;  %s576_s2 = inlined_call_operand.vmem [shape: f32[1,512], index: 2, kind: input, shape index: {}]   ;;  %s577_s3 = inlined_call_operand.vmem [shape: f32[16,512], index: 3, kind: output, shape index: {}]  }
   0x1   :  { %v97_v0 = vld [vmem:[%s574_s1 + $0x1e8] sm:$0xff]  ;;  %v99_v1 = vld [vmem:[%s574_s1 + $0x1f8] sm:$0xff]  ;;  %v96_v2 = vld [vmem:[%s574_s1 + $0x1e0] sm:$0xff]  ;;  %164 = vmatprep.mubr.f32.mxu0 %v324_v3  ;;  %241 = vmatprep.mubr.f32.mxu1 %v324_v3 }
   0x2   :  { %100 = vmatprep.subr.mxu0 %v97_v0  ;;  %177 = vmatprep.subr.mxu1 %v99_v1  ;;  %v98_v4 = vld [vmem:[%s574_s1 + $0x1f0] sm:$0xff]  ;;  %v93_v5 = vld [vmem:[%s574_s1 + $0x1c8] sm:$0xff]  ;;  %v95_v6 = vld [vmem:[%s574_s1 + $0x1d8] sm:$0xff] }
   0x3   :  { %101 = vmatpush1.msra.mxu0 %v96_v2  ;;  %178 = vmatpush1.msra.mxu1 %v98_v4  ;;  %v92_v7 = vld [vmem:[%s574_s1 + $0x1c0] sm:$0xff]  ;;  %v94_v8 = vld [vmem:[%s574_s1 + $0x1d0] sm:$0xff]  ;;  %v89_v9 = vld [vmem:[%s574_s1 + $0x1a8] sm:$0xff]  ;;  %v283_v4 = vlaneseq }
   0x4   :  { %102 = vmatprep.subr.mxu0 %v93_v5  ;;  %179 = vmatprep.subr.mxu1 %v95_v6  ;;  %v91_v10 = vld [vmem:[%s574_s1 + $0x1b8] sm:$0xff]  ;;  %v88_v11 = vld [vmem:[%s574_s1 + $0x1a0] sm:$0xff]  ;;  %v90_v12 = vld [vmem:[%s574_s1 + $0x1b0] sm:$0xff] }
   0x5   :  { %103 = vmatpush1.msra.mxu0 %v92_v7  ;;  %180 = vmatpush1.msra.mxu1 %v94_v8  ;;  %v85_v13 = vld [vmem:[%s574_s1 + $0x188] sm:$0xff]  ;;  %v87_v14 = vld [vmem:[%s574_s1 + $0x198] sm:$0xff]  ;;  %v84_v15 = vld [vmem:[%s574_s1 + $0x180] sm:$0xff]  ;;  %v284_v5 = vshrl.u32 %v283_v4, 7 }
   0x6   :  { %104 = vmatprep.subr.mxu0 %v89_v9  ;;  %181 = vmatprep.subr.mxu1 %v91_v10  ;;  %v86_v16 = vld [vmem:[%s574_s1 + $0x190] sm:$0xff]  ;;  %v81_v17 = vld [vmem:[%s574_s1 + $0x168] sm:$0xff]  ;;  %v83_v18 = vld [vmem:[%s574_s1 + $0x178] sm:$0xff] }
   0x7   :  { %105 = vmatpush1.msra.mxu0 %v88_v11  ;;  %182 = vmatpush1.msra.mxu1 %v90_v12  ;;  %v80_v19 = vld [vmem:[%s574_s1 + $0x160] sm:$0xff]  ;;  %v82_v20 = vld [vmem:[%s574_s1 + $0x170] sm:$0xff]  ;;  %v77_v21 = vld [vmem:[%s574_s1 + $0x148] sm:$0xff]  ;;  %v285_v6 = vsub.s32 0, %v284_v5  ;;  %v293_v7 = vsub.s32 2, %v284_v5  ;;  %v289_v9 = vsub.s32 1, %v284_v5 }
   0x8   :  { %106 = vmatprep.subr.mxu0 %v85_v13  ;;  %183 = vmatprep.subr.mxu1 %v87_v14  ;;  %v79_v22 = vld [vmem:[%s574_s1 + $0x158] sm:$0xff]  ;;  %v76_v23 = vld [vmem:[%s574_s1 + $0x140] sm:$0xff]  ;;  %v78_v24 = vld [vmem:[%s574_s1 + $0x150] sm:$0xff]  ;;  %v297_v10 = vsub.s32 3, %v284_v5 }
   0x9   :  { %107 = vmatpush1.msra.mxu0 %v84_v15  ;;  %184 = vmatpush1.msra.mxu1 %v86_v16  ;;  %v73_v25 = vld [vmem:[%s574_s1 + $0x128] sm:$0xff]  ;;  %v75_v26 = vld [vmem:[%s574_s1 + $0x138] sm:$0xff]  ;;  %v72_v27 = vld [vmem:[%s574_s1 + $0x120] sm:$0xff] }
   0xa   :  { %108 = vmatprep.subr.mxu0 %v81_v17  ;;  %185 = vmatprep.subr.mxu1 %v83_v18  ;;  %v74_v28 = vld [vmem:[%s574_s1 + $0x130] sm:$0xff]  ;;  %v69_v29 = vld [vmem:[%s574_s1 + $0x108] sm:$0xff]  ;;  %v71_v30 = vld [vmem:[%s574_s1 + $0x118] sm:$0xff] }
   0xb   :  { %109 = vmatpush1.msra.mxu0 %v80_v19  ;;  %186 = vmatpush1.msra.mxu1 %v82_v20  ;;  %v68_v31 = vld [vmem:[%s574_s1 + $0x100] sm:$0xff]  ;;  %v70_v32 = vld [vmem:[%s574_s1 + $0x110] sm:$0xff]  ;;  %v65_v33 = vld [vmem:[%s574_s1 + $0xe8] sm:$0xff] }
   0xc   :  { %110 = vmatprep.subr.mxu0 %v77_v21  ;;  %187 = vmatprep.subr.mxu1 %v79_v22  ;;  %v67_v34 = vld [vmem:[%s574_s1 + $0xf8] sm:$0xff]  ;;  %v64_v35 = vld [vmem:[%s574_s1 + $0xe0] sm:$0xff]  ;;  %v66_v36 = vld [vmem:[%s574_s1 + $0xf0] sm:$0xff] }
   0xd   :  { %111 = vmatpush1.msra.mxu0 %v76_v23  ;;  %188 = vmatpush1.msra.mxu1 %v78_v24  ;;  %v61_v37 = vld [vmem:[%s574_s1 + $0xc8] sm:$0xff]  ;;  %v63_v38 = vld [vmem:[%s574_s1 + $0xd8] sm:$0xff]  ;;  %v60_v39 = vld [vmem:[%s574_s1 + $0xc0] sm:$0xff] }
   0xe   :  { %112 = vmatprep.subr.mxu0 %v73_v25  ;;  %189 = vmatprep.subr.mxu1 %v75_v26  ;;  %v62_v40 = vld [vmem:[%s574_s1 + $0xd0] sm:$0xff]  ;;  %v57_v41 = vld [vmem:[%s574_s1 + $0xa8] sm:$0xff]  ;;  %v59_v42 = vld [vmem:[%s574_s1 + $0xb8] sm:$0xff] }
   0xf   :  { %113 = vmatpush1.msra.mxu0 %v72_v27  ;;  %190 = vmatpush1.msra.mxu1 %v74_v28  ;;  %v56_v43 = vld [vmem:[%s574_s1 + $0xa0] sm:$0xff]  ;;  %v58_v44 = vld [vmem:[%s574_s1 + $0xb0] sm:$0xff]  ;;  %v53_v45 = vld [vmem:[%s574_s1 + $0x88] sm:$0xff] }
  0x10   :  { %114 = vmatprep.subr.mxu0 %v69_v29  ;;  %191 = vmatprep.subr.mxu1 %v71_v30  ;;  %v55_v46 = vld [vmem:[%s574_s1 + $0x98] sm:$0xff]  ;;  %v52_v47 = vld [vmem:[%s574_s1 + $0x80] sm:$0xff]  ;;  %v54_v48 = vld [vmem:[%s574_s1 + $0x90] sm:$0xff] }
  0x11   :  { %115 = vmatpush1.msra.mxu0 %v68_v31  ;;  %192 = vmatpush1.msra.mxu1 %v70_v32  ;;  %v49_v49 = vld [vmem:[%s574_s1 + $0x68] sm:$0xff]  ;;  %v51_v50 = vld [vmem:[%s574_s1 + $0x78] sm:$0xff]  ;;  %v48_v51 = vld [vmem:[%s574_s1 + $0x60] sm:$0xff] }
  0x12   :  { %116 = vmatprep.subr.mxu0 %v65_v33  ;;  %193 = vmatprep.subr.mxu1 %v67_v34  ;;  %v50_v52 = vld [vmem:[%s574_s1 + $0x70] sm:$0xff]  ;;  %v45_v53 = vld [vmem:[%s574_s1 + $0x48] sm:$0xff]  ;;  %v47_v54 = vld [vmem:[%s574_s1 + $0x58] sm:$0xff] }
  0x13   :  { %117 = vmatpush1.msra.mxu0 %v64_v35  ;;  %194 = vmatpush1.msra.mxu1 %v66_v36  ;;  %v44_v55 = vld [vmem:[%s574_s1 + $0x40] sm:$0xff]  ;;  %v46_v56 = vld [vmem:[%s574_s1 + $0x50] sm:$0xff]  ;;  %v41_v57 = vld [vmem:[%s574_s1 + $0x28] sm:$0xff] }
  0x14   :  { %118 = vmatprep.subr.mxu0 %v61_v37  ;;  %195 = vmatprep.subr.mxu1 %v63_v38  ;;  %v43_v58 = vld [vmem:[%s574_s1 + $0x38] sm:$0xff]  ;;  %v40_v59 = vld [vmem:[%s574_s1 + $0x20] sm:$0xff]  ;;  %v42_v60 = vld [vmem:[%s574_s1 + $0x30] sm:$0xff] }
  0x15   :  { %119 = vmatpush1.msra.mxu0 %v60_v39  ;;  %196 = vmatpush1.msra.mxu1 %v62_v40  ;;  %v37_v61 = vld [vmem:[%s574_s1 + $0x8] sm:$0xff]  ;;  %v39_v62 = vld [vmem:[%s574_s1 + $0x18] sm:$0xff]  ;;  %v36_v63 = vld [vmem:[%s574_s1] sm:$0xff] }
  0x16   :  { %120 = vmatprep.subr.mxu0 %v57_v41  ;;  %197 = vmatprep.subr.mxu1 %v59_v42  ;;  %v38_v0 = vld [vmem:[%s574_s1 + $0x10] sm:$0xff]  ;;  %v34_v1 = vld [vmem:[%s575_s0] sm:$0xff]  ;;  %v35_v2 = vld [vmem:[%s575_s0 + $0x8] sm:$0xff] }
  0x17   :  { %121 = vmatpush1.msra.mxu0 %v56_v43  ;;  %198 = vmatpush1.msra.mxu1 %v58_v44  ;;  %v281_v8 = vld [vmem:[%s576_s2] sm:$0xf] }
  0x18   :  { %122 = vmatprep.subr.mxu0 %v53_v45  ;;  %199 = vmatprep.subr.mxu1 %v55_v46  ;;  %v286_v11 = vrot.slane %v281_v8, %v285_v6  ;;  %v294_v12 = vrot.slane %v281_v8, %v293_v7  ;;  %v290_v13 = vrot.slane %v281_v8, %v289_v9 }
  0x19   :  { %123 = vmatpush1.msra.mxu0 %v52_v47  ;;  %200 = vmatpush1.msra.mxu1 %v54_v48 }
  0x1a   :  { %124 = vmatprep.subr.mxu0 %v49_v49  ;;  %201 = vmatprep.subr.mxu1 %v51_v50 }
  0x1b   :  { %125 = vmatpush1.msra.mxu0 %v48_v51  ;;  %202 = vmatpush1.msra.mxu1 %v50_v52 }
  0x1c   :  { %126 = vmatprep.subr.mxu0 %v45_v53  ;;  %203 = vmatprep.subr.mxu1 %v47_v54 }
  0x1d   :  { %127 = vmatpush1.msra.mxu0 %v44_v55  ;;  %204 = vmatpush1.msra.mxu1 %v46_v56 }
  0x1e   :  { %128 = vmatprep.subr.mxu0 %v41_v57  ;;  %205 = vmatprep.subr.mxu1 %v43_v58 }
  0x1f   :  { %129 = vmatpush1.msra.mxu0 %v40_v59  ;;  %206 = vmatpush1.msra.mxu1 %v42_v60 }
  0x20   :  { %130 = vmatprep.subr.mxu0 %v37_v61  ;;  %207 = vmatprep.subr.mxu1 %v39_v62 }
  0x21   :  { %131 = vmatpush1.msra.mxu0 %v36_v63  ;;  %208 = vmatpush1.msra.mxu1 %v38_v0 }
  0x22   :  { %165 = vmatmul.mubr.f32.vlgmr.msra.gmra.mxu0 %v34_v1  ;;  %242 = vmatmul.mubr.f32.vlgmr.msra.gmra.mxu1 %v34_v1 }
  0x23   :  { %170 = vmatprep.mubr.f32.mxu0 %v324_v3  ;;  %247 = vmatprep.mubr.f32.mxu1 %v324_v3  ;;  %v298_v3 = vrot.slane %v281_v8, %v297_v10 }
  0x26   :  { %171 = vmatmul.mubr.f32.gmra.mxu0 %v35_v2  ;;  %248 = vmatmul.mubr.f32.gmra.mxu1 %v35_v2 }
  0xe2   :  { %v166_v14 = vpop.f32.mrf.mxu0  ;;  %v243_v15 = vpop.f32.mrf.mxu1 }
  0xe3   :  { %v303_v16 = vadd.f32 %v286_v11, %v166_v14  ;;  %v305_v17 = vadd.f32 %v294_v12, %v243_v15 }
  0xe4   :  { %v168_v18 = vpop.f32.mrf.mxu0  ;;  %v245_v19 = vpop.f32.mrf.mxu1 }
  0xe5   :  { %311 = vst [vmem:[%s577_s3] sm:$0xff] %v303_v16  ;;  %313 = vst [vmem:[%s577_s3 + $0x10] sm:$0xff] %v305_v17  ;;  %v304_v20 = vadd.f32 %v290_v13, %v168_v18  ;;  %v306_v21 = vadd.f32 %v298_v3, %v245_v19 }
  0xe6   :  { %v172_v22 = vpop.f32.mrf.mxu0  ;;  %v249_v23 = vpop.f32.mrf.mxu1 }
  0xe7   :  { %312 = vst [vmem:[%s577_s3 + $0x8] sm:$0xff] %v304_v20  ;;  %314 = vst [vmem:[%s577_s3 + $0x18] sm:$0xff] %v306_v21  ;;  %v307_v24 = vadd.f32 %v286_v11, %v172_v22  ;;  %v309_v25 = vadd.f32 %v294_v12, %v249_v23 }
  0xe8   :  { %v174_v26 = vpop.f32.mrf.mxu0  ;;  %v251_v27 = vpop.f32.mrf.mxu1 }
  0xe9   :  { %315 = vst [vmem:[%s577_s3 + $0x20] sm:$0xff] %v307_v24  ;;  %317 = vst [vmem:[%s577_s3 + $0x30] sm:$0xff] %v309_v25  ;;  %v308_v28 = vadd.f32 %v290_v13, %v174_v26  ;;  %v310_v29 = vadd.f32 %v298_v3, %v251_v27 }
  0xeb   :  { %316 = vst [vmem:[%s577_s3 + $0x28] sm:$0xff] %v308_v28  ;;  %318 = vst [vmem:[%s577_s3 + $0x38] sm:$0xff] %v310_v29 }

// kernel: stackoverflow_net_forward.11
= control target key start
LH: loop header
LB: loop body
LE: loop exit
PB: predicated region body
PF: predicated region fallthrough
CT: control target
= control target key end

     0   :  { %vm28_vm0 = vcmask 130048   ;;  %vm19_vm1 = vcmask 261120   ;;  %v187_v3 = vmov 0.0   ;;  %s235_s0 = inlined_call_operand.vmem [shape: f32[16,16], index: 0, kind: input, shape index: {}]   ;;  %s236_s1 = inlined_call_operand.vmem [shape: f32[16,32], index: 1, kind: input, shape index: {}]   ;;  %s237_s2 = inlined_call_operand.vmem [shape: f32[1,32], index: 2, kind: input, shape index: {}]   ;;  %s238_s3 = inlined_call_operand.hbm [shape: f32[16,32], index: 3, kind: output, shape index: {}]  }
   0x1   :  { %v27_v0 = vld [vmem:[%s236_s1 + $0x8] sm:$0xff]  ;;  %v26_v1 = vld [vmem:[%s236_s1] sm:$0xff]  ;;  %21 = vst.msk [vmem:[#allocation2 + $0x8] sm:$0xff] %vm19_vm1, %v187_v3  ;;  %20 = vst.msk [vmem:[#allocation2] sm:$0xff] %vm19_vm1, %v187_v3 }
   0x2   :  { %v24_v2 = vld [vmem:[%s235_s0] sm:$0xff]  ;;  %154 = vmatprep.subr.mxu0 %v27_v0 }
   0x3   :  { %158 = vmatprep.mubr.msk.f32.mxu0 %vm28_vm0, %v24_v2 }
   0x4   :  { %8 = vsyncpa [#allocation4], 0  ;;  %155 = vmatpush3.msra.mxu0 %v27_v0  ;;  %v25_v4 = vld [vmem:[%s235_s0 + $0x8] sm:$0xff]  ;;  %v149_v11 = vld [vmem:[%s237_s2] ss:$0 sm:$0xff]  ;;  %s188_s21 = smov [#allocation3]  }
   0x5   :  { %156 = vmatprep.subr.mxu0 %v26_v1  ;;  %s136_s22 = sshll.u32 %s188_s21, 4  ;;  %s137_s22 = int_to_ptr.vmem [resolvable:$true] %s136_s22 }
   0x6   :  { %157 = vmatpush3.msra.mxu0 %v26_v1  ;;  %s165_s0 = scalar_lea.vmem %s137_s22, 256  ;;  %p170_p1 = scmp.lt.s32.totalorder %s137_s22, %s137_s22 }
   0x7   :  { %159 = vmatmul.mubr.msk.f32.vlgmr.msra.gmra.mxu0 %vm28_vm0, %v25_v4  ;;  %p166_p0 = scmp.ne.s32.totalorder %s137_s22, %s165_s0  ;;  %p171_p2 = scmp.lt.s32.totalorder %s165_s0, %s165_s0 }
   0x8   :  { %v23_v5 = vld [vmem:[#allocation2 + $0x8] sm:$0xff]  ;;  %v22_v7 = vld [vmem:[#allocation2] sm:$0xff] }
   0x9   :  { %p172_p3 = por %p171_p2, %p170_p1 }
   0xb   :  { %p173_p4 = pnand %p172_p3, %p166_p0 }
  0xc7   :  { %v160_v6 = vpop.f32.mrf.mxu0 }
  0xc8   :  { %v111_v8 = vadd.f32 %v160_v6, %v23_v5 }
  0xc9   :  { %v101_v9 = vpop.f32.mrf.mxu0 }
  0xca   :  { %114 = vst.msk [vmem:[#allocation2 + $0x8] sm:$0xff] %vm19_vm1, %v111_v8  ;;  %v110_v10 = vadd.f32 %v101_v9, %v22_v7 }
  0xcc   :  { %113 = vst.msk [vmem:[#allocation2] sm:$0xff] %vm19_vm1, %v110_v10 }
  0xd1   :  { %v119_v12 = vld [vmem:[#allocation2 + $0x8] sm:$0xff] }
  0xd2   :  { %v128_v13 = vadd.f32 %v149_v11, %v119_v12 }
  0xd3   :  { %v118_v14 = vld [vmem:[#allocation2] sm:$0xff] }
  0xd4   :  { %v127_v15 = vadd.f32 %v149_v11, %v118_v14  ;;  %130 = vst.msk [vmem:[#allocation3 + $0x8] sm:$0xff] %vm19_vm1, %v128_v13 }
  0xd6   :  { %129 = vst.msk [vmem:[#allocation3] sm:$0xff] %vm19_vm1, %v127_v15 }
  0xd7   :  { %176 = shalt.err (!%p173_p4)
}
  0xd8   :  { %s189_s23 = smov 128   ;;  %s190_s2 = smov 8  }
  0xd9   :  { %142 = dma.vmem_to_hbm [thread:$0]  %s137_s22, 256, %s238_s3, [#allocation4], %s189_s23, %s189_s23, %s190_s2  }
  0xda   :  { %185 = dma.done.wait [#allocation4], 256  }
  0xdb   :  { %186 = vsyncadd [#allocation4], 4294967040 }
  0xdc   :  { %146 = vsyncpa [#allocation4], 1 }

// kernel: stackoverflow_net_forward.7
= control target key start
LH: loop header
LB: loop body
LE: loop exit
PB: predicated region body
PF: predicated region fallthrough
CT: control target
= control target key end

     0   :  { %v3583_v3 = vmov 0.0   ;;  %s3580_s1 = inlined_call_operand.vmem [shape: f32[128,512], index: 1, kind: input, shape index: {}]   ;;  %s3581_s0 = inlined_call_operand.vmem [shape: f32[8,2,512], index: 0, kind: input, shape index: {}]   ;;  %s3582_s2 = inlined_call_operand.vmem [shape: f32[8,2,128], index: 2, kind: output, shape index: {}]  }
   0x1   :  { %v2323_v0 = vld [vmem:[%s3580_s1 + $0x1e8] sm:$0xff]  ;;  %v2328_v1 = vld [vmem:[%s3580_s1 + $0x1f8] sm:$0xff]  ;;  %v2333_v2 = vld [vmem:[%s3580_s1 + $0x1e0] sm:$0xff]  ;;  %148 = vmatprep.mubr.f32.mxu0 %v3583_v3  ;;  %15 = vst [vmem:[#allocation2] sm:$0x3] %v3583_v3  ;;  %219 = vmatprep.mubr.f32.mxu1 %v3583_v3 }
   0x2   :  { %3663 = vst [vmem:[#allocation4_spill] sm:$0xff] %v2323_v0  ;;  %3664 = vst [vmem:[#allocation5_spill] sm:$0xff] %v2328_v1  ;;  %84 = vmatprep.subr.mxu0 %v2323_v0  ;;  %155 = vmatprep.subr.mxu1 %v2328_v1  ;;  %v2344_v4 = vld [vmem:[%s3580_s1 + $0x1f0] sm:$0xff]  ;;  %v2349_v5 = vld [vmem:[%s3580_s1 + $0x1c8] sm:$0xff] }
   0x3   :  { %16 = vst [vmem:[#allocation3] sm:$0x3] %v3583_v3  ;;  %v2354_v6 = vld [vmem:[%s3580_s1 + $0x1d8] sm:$0xff]  ;;  %85 = vmatpush1.msra.mxu0 %v2333_v2  ;;  %156 = vmatpush1.msra.mxu1 %v2344_v4  ;;  %v2361_v7 = vld [vmem:[%s3580_s1 + $0x1c0] sm:$0xff]  ;;  %v2366_v8 = vld [vmem:[%s3580_s1 + $0x1d0] sm:$0xff] }
   0x4   :  { %v2371_v9 = vld [vmem:[%s3580_s1 + $0x1a8] sm:$0xff]  ;;  %86 = vmatprep.subr.mxu0 %v2349_v5  ;;  %157 = vmatprep.subr.mxu1 %v2354_v6  ;;  %v2378_v10 = vld [vmem:[%s3580_s1 + $0x1b8] sm:$0xff]  ;;  %v2383_v11 = vld [vmem:[%s3580_s1 + $0x1a0] sm:$0xff] }
   0x5   :  { %v2388_v12 = vld [vmem:[%s3580_s1 + $0x1b0] sm:$0xff]  ;;  %87 = vmatpush1.msra.mxu0 %v2361_v7  ;;  %158 = vmatpush1.msra.mxu1 %v2366_v8  ;;  %v2395_v13 = vld [vmem:[%s3580_s1 + $0x188] sm:$0xff]  ;;  %v2400_v14 = vld [vmem:[%s3580_s1 + $0x198] sm:$0xff] }
   0x6   :  { %88 = vmatprep.subr.mxu0 %v2371_v9  ;;  %159 = vmatprep.subr.mxu1 %v2378_v10  ;;  %v2407_v15 = vld [vmem:[%s3580_s1 + $0x180] sm:$0xff]  ;;  %v2412_v16 = vld [vmem:[%s3580_s1 + $0x190] sm:$0xff]  ;;  %v2419_v17 = vld [vmem:[%s3580_s1 + $0x168] sm:$0xff] }
   0x7   :  { %89 = vmatpush1.msra.mxu0 %v2383_v11  ;;  %160 = vmatpush1.msra.mxu1 %v2388_v12  ;;  %v2424_v18 = vld [vmem:[%s3580_s1 + $0x178] sm:$0xff]  ;;  %v2431_v19 = vld [vmem:[%s3580_s1 + $0x160] sm:$0xff]  ;;  %v2436_v20 = vld [vmem:[%s3580_s1 + $0x170] sm:$0xff] }
   0x8   :  { %90 = vmatprep.subr.mxu0 %v2395_v13  ;;  %161 = vmatprep.subr.mxu1 %v2400_v14  ;;  %v2443_v21 = vld [vmem:[%s3580_s1 + $0x148] sm:$0xff]  ;;  %v2448_v22 = vld [vmem:[%s3580_s1 + $0x158] sm:$0xff]  ;;  %v2455_v23 = vld [vmem:[%s3580_s1 + $0x140] sm:$0xff] }
   0x9   :  { %91 = vmatpush1.msra.mxu0 %v2407_v15  ;;  %162 = vmatpush1.msra.mxu1 %v2412_v16  ;;  %v2460_v24 = vld [vmem:[%s3580_s1 + $0x150] sm:$0xff]  ;;  %v2467_v25 = vld [vmem:[%s3580_s1 + $0x128] sm:$0xff]  ;;  %v2472_v26 = vld [vmem:[%s3580_s1 + $0x138] sm:$0xff] }
   0xa   :  { %92 = vmatprep.subr.mxu0 %v2419_v17  ;;  %163 = vmatprep.subr.mxu1 %v2424_v18  ;;  %v2479_v27 = vld [vmem:[%s3580_s1 + $0x120] sm:$0xff]  ;;  %v2484_v28 = vld [vmem:[%s3580_s1 + $0x130] sm:$0xff]  ;;  %v2491_v29 = vld [vmem:[%s3580_s1 + $0x108] sm:$0xff] }
   0xb   :  { %93 = vmatpush1.msra.mxu0 %v2431_v19  ;;  %164 = vmatpush1.msra.mxu1 %v2436_v20  ;;  %v2496_v30 = vld [vmem:[%s3580_s1 + $0x118] sm:$0xff]  ;;  %v2503_v31 = vld [vmem:[%s3580_s1 + $0x100] sm:$0xff]  ;;  %v2508_v32 = vld [vmem:[%s3580_s1 + $0x110] sm:$0xff] }
   0xc   :  { %94 = vmatprep.subr.mxu0 %v2443_v21  ;;  %165 = vmatprep.subr.mxu1 %v2448_v22  ;;  %v2515_v33 = vld [vmem:[%s3580_s1 + $0xe8] sm:$0xff]  ;;  %v2520_v34 = vld [vmem:[%s3580_s1 + $0xf8] sm:$0xff]  ;;  %v2527_v35 = vld [vmem:[%s3580_s1 + $0xe0] sm:$0xff] }
   0xd   :  { %95 = vmatpush1.msra.mxu0 %v2455_v23  ;;  %166 = vmatpush1.msra.mxu1 %v2460_v24  ;;  %v2532_v36 = vld [vmem:[%s3580_s1 + $0xf0] sm:$0xff]  ;;  %v2539_v37 = vld [vmem:[%s3580_s1 + $0xc8] sm:$0xff]  ;;  %v2544_v38 = vld [vmem:[%s3580_s1 + $0xd8] sm:$0xff] }
   0xe   :  { %96 = vmatprep.subr.mxu0 %v2467_v25  ;;  %167 = vmatprep.subr.mxu1 %v2472_v26  ;;  %v2551_v39 = vld [vmem:[%s3580_s1 + $0xc0] sm:$0xff]  ;;  %v2556_v40 = vld [vmem:[%s3580_s1 + $0xd0] sm:$0xff]  ;;  %v2563_v41 = vld [vmem:[%s3580_s1 + $0xa8] sm:$0xff] }
   0xf   :  { %97 = vmatpush1.msra.mxu0 %v2479_v27  ;;  %168 = vmatpush1.msra.mxu1 %v2484_v28  ;;  %v2568_v42 = vld [vmem:[%s3580_s1 + $0xb8] sm:$0xff]  ;;  %v2575_v43 = vld [vmem:[%s3580_s1 + $0xa0] sm:$0xff]  ;;  %v2580_v44 = vld [vmem:[%s3580_s1 + $0xb0] sm:$0xff] }
  0x10   :  { %98 = vmatprep.subr.mxu0 %v2491_v29  ;;  %169 = vmatprep.subr.mxu1 %v2496_v30  ;;  %v2587_v45 = vld [vmem:[%s3580_s1 + $0x88] sm:$0xff]  ;;  %v2592_v46 = vld [vmem:[%s3580_s1 + $0x98] sm:$0xff]  ;;  %v2599_v47 = vld [vmem:[%s3580_s1 + $0x80] sm:$0xff] }
  0x11   :  { %99 = vmatpush1.msra.mxu0 %v2503_v31  ;;  %170 = vmatpush1.msra.mxu1 %v2508_v32  ;;  %v2604_v48 = vld [vmem:[%s3580_s1 + $0x90] sm:$0xff]  ;;  %v2611_v49 = vld [vmem:[%s3580_s1 + $0x68] sm:$0xff]  ;;  %v2616_v50 = vld [vmem:[%s3580_s1 + $0x78] sm:$0xff] }
  0x12   :  { %100 = vmatprep.subr.mxu0 %v2515_v33  ;;  %171 = vmatprep.subr.mxu1 %v2520_v34  ;;  %3665 = vst [vmem:[#allocation6_spill] sm:$0xff] %v2604_v48  ;;  %3666 = vst [vmem:[#allocation7_spill] sm:$0xff] %v2611_v49  ;;  %v2623_v51 = vld [vmem:[%s3580_s1 + $0x60] sm:$0xff]  ;;  %v2628_v52 = vld [vmem:[%s3580_s1 + $0x70] sm:$0xff] }
  0x13   :  { %101 = vmatpush1.msra.mxu0 %v2527_v35  ;;  %172 = vmatpush1.msra.mxu1 %v2532_v36  ;;  %3667 = vst [vmem:[#allocation8_spill] sm:$0xff] %v2616_v50  ;;  %3668 = vst [vmem:[#allocation9_spill] sm:$0xff] %v2623_v51  ;;  %v2635_v53 = vld [vmem:[%s3580_s1 + $0x48] sm:$0xff]  ;;  %v2640_v54 = vld [vmem:[%s3580_s1 + $0x58] sm:$0xff] }
  0x14   :  { %102 = vmatprep.subr.mxu0 %v2539_v37  ;;  %173 = vmatprep.subr.mxu1 %v2544_v38  ;;  %3669 = vst [vmem:[#allocation10_spill] sm:$0xff] %v2628_v52  ;;  %3670 = vst [vmem:[#allocation11_spill] sm:$0xff] %v2635_v53  ;;  %v2647_v55 = vld [vmem:[%s3580_s1 + $0x40] sm:$0xff]  ;;  %v2652_v56 = vld [vmem:[%s3580_s1 + $0x50] sm:$0xff] }
  0x15   :  { %103 = vmatpush1.msra.mxu0 %v2551_v39  ;;  %174 = vmatpush1.msra.mxu1 %v2556_v40  ;;  %3671 = vst [vmem:[#allocation12_spill] sm:$0xff] %v2640_v54  ;;  %3672 = vst [vmem:[#allocation13_spill] sm:$0xff] %v2647_v55  ;;  %v2659_v57 = vld [vmem:[%s3580_s1 + $0x28] sm:$0xff]  ;;  %v2664_v58 = vld [vmem:[%s3580_s1 + $0x38] sm:$0xff] }
  0x16   :  { %104 = vmatprep.subr.mxu0 %v2563_v41  ;;  %175 = vmatprep.subr.mxu1 %v2568_v42  ;;  %3673 = vst [vmem:[#allocation14_spill] sm:$0xff] %v2652_v56  ;;  %3674 = vst [vmem:[#allocation15_spill] sm:$0xff] %v2659_v57  ;;  %v2671_v59 = vld [vmem:[%s3580_s1 + $0x20] sm:$0xff]  ;;  %v2676_v60 = vld [vmem:[%s3580_s1 + $0x30] sm:$0xff] }
  0x17   :  { %105 = vmatpush1.msra.mxu0 %v2575_v43  ;;  %176 = vmatpush1.msra.mxu1 %v2580_v44  ;;  %3675 = vst [vmem:[#allocation16_spill] sm:$0xff] %v2664_v58  ;;  %3676 = vst [vmem:[#allocation17_spill] sm:$0xff] %v2671_v59  ;;  %v2683_v61 = vld [vmem:[%s3580_s1 + $0x8] sm:$0xff]  ;;  %v2688_v62 = vld [vmem:[%s3580_s1 + $0x18] sm:$0xff] }
  0x18   :  { %106 = vmatprep.subr.mxu0 %v2587_v45  ;;  %177 = vmatprep.subr.mxu1 %v2592_v46  ;;  %3677 = vst [vmem:[#allocation18_spill] sm:$0xff] %v2676_v60  ;;  %3678 = vst [vmem:[#allocation19_spill] sm:$0xff] %v2683_v61  ;;  %v2695_v63 = vld [vmem:[%s3580_s1] sm:$0xff]  ;;  %v2700_v3 = vld [vmem:[%s3580_s1 + $0x10] sm:$0xff] }
  0x19   :  { %107 = vmatpush1.msra.mxu0 %v2599_v47  ;;  %178 = vmatpush1.msra.mxu1 %v2604_v48  ;;  %3679 = vst [vmem:[#allocation20_spill] sm:$0xff] %v2688_v62  ;;  %3680 = vst [vmem:[#allocation21_spill] sm:$0xff] %v2695_v63 }
  0x1a   :  { %108 = vmatprep.subr.mxu0 %v2611_v49  ;;  %179 = vmatprep.subr.mxu1 %v2616_v50  ;;  %3681 = vst [vmem:[#allocation22_spill] sm:$0xff] %v2700_v3 }
  0x1b   :  { %109 = vmatpush1.msra.mxu0 %v2623_v51  ;;  %180 = vmatpush1.msra.mxu1 %v2628_v52 }
  0x1c   :  { %110 = vmatprep.subr.mxu0 %v2635_v53  ;;  %181 = vmatprep.subr.mxu1 %v2640_v54 }
  0x1d   :  { %111 = vmatpush1.msra.mxu0 %v2647_v55  ;;  %182 = vmatpush1.msra.mxu1 %v2652_v56  ;;  %v17_v56 = vld [vmem:[#allocation2] sm:$0x3] }
  0x1e   :  { %112 = vmatprep.subr.mxu0 %v2659_v57  ;;  %183 = vmatprep.subr.mxu1 %v2664_v58 }
  0x1f   :  { %113 = vmatpush1.msra.mxu0 %v2671_v59  ;;  %184 = vmatpush1.msra.mxu1 %v2676_v60 }
  0x20   :  { %114 = vmatprep.subr.mxu0 %v2683_v61  ;;  %185 = vmatprep.subr.mxu1 %v2688_v62 }
  0x21   :  { %115 = vmatpush1.msra.mxu0 %v2695_v63  ;;  %186 = vmatpush1.msra.mxu1 %v2700_v3 }
  0x22   :  { %149 = vmatmul.mubr.f32.vlgmr.msra.gmra.mxu0 %v17_v56  ;;  %220 = vmatmul.mubr.f32.vlgmr.msra.gmra.mxu1 %v17_v56  ;;  %v3682_v56 = vld [vmem:[#allocation14_spill] sm:$0xff] }
  0x23   :  { %347 = vmatprep.subr.mxu0 %v2323_v0  ;;  %418 = vmatprep.subr.mxu1 %v2328_v1 }
  0x24   :  { %348 = vmatpush1.msra.mxu0 %v2333_v2  ;;  %419 = vmatpush1.msra.mxu1 %v2344_v4 }
  0x25   :  { %349 = vmatprep.subr.mxu0 %v2349_v5  ;;  %420 = vmatprep.subr.mxu1 %v2354_v6 }
  0x26   :  { %350 = vmatpush1.msra.mxu0 %v2361_v7  ;;  %421 = vmatpush1.msra.mxu1 %v2366_v8 }
  0x27   :  { %351 = vmatprep.subr.mxu0 %v2371_v9  ;;  %422 = vmatprep.subr.mxu1 %v2378_v10 }
  0x28   :  { %352 = vmatpush1.msra.mxu0 %v2383_v11  ;;  %423 = vmatpush1.msra.mxu1 %v2388_v12 }
  0x29   :  { %353 = vmatprep.subr.mxu0 %v2395_v13  ;;  %424 = vmatprep.subr.mxu1 %v2400_v14 }
  0x2a   :  { %354 = vmatpush1.msra.mxu0 %v2407_v15  ;;  %425 = vmatpush1.msra.mxu1 %v2412_v16 }
  0x2b   :  { %355 = vmatprep.subr.mxu0 %v2419_v17  ;;  %426 = vmatprep.subr.mxu1 %v2424_v18 }
  0x2c   :  { %356 = vmatpush1.msra.mxu0 %v2431_v19  ;;  %427 = vmatpush1.msra.mxu1 %v2436_v20 }
  0x2d   :  { %357 = vmatprep.subr.mxu0 %v2443_v21  ;;  %428 = vmatprep.subr.mxu1 %v2448_v22 }
  0x2e   :  { %358 = vmatpush1.msra.mxu0 %v2455_v23  ;;  %429 = vmatpush1.msra.mxu1 %v2460_v24 }
  0x2f   :  { %359 = vmatprep.subr.mxu0 %v2467_v25  ;;  %430 = vmatprep.subr.mxu1 %v2472_v26 }
  0x30   :  { %360 = vmatpush1.msra.mxu0 %v2479_v27  ;;  %431 = vmatpush1.msra.mxu1 %v2484_v28 }
  0x31   :  { %361 = vmatprep.subr.mxu0 %v2491_v29  ;;  %432 = vmatprep.subr.mxu1 %v2496_v30 }
  0x32   :  { %362 = vmatpush1.msra.mxu0 %v2503_v31  ;;  %433 = vmatpush1.msra.mxu1 %v2508_v32 }
  0x33   :  { %363 = vmatprep.subr.mxu0 %v2515_v33  ;;  %434 = vmatprep.subr.mxu1 %v2520_v34 }
  0x34   :  { %364 = vmatpush1.msra.mxu0 %v2527_v35  ;;  %435 = vmatpush1.msra.mxu1 %v2532_v36 }
  0x35   :  { %365 = vmatprep.subr.mxu0 %v2539_v37  ;;  %436 = vmatprep.subr.mxu1 %v2544_v38 }
  0x36   :  { %366 = vmatpush1.msra.mxu0 %v2551_v39  ;;  %437 = vmatpush1.msra.mxu1 %v2556_v40 }
  0x37   :  { %367 = vmatprep.subr.mxu0 %v2563_v41  ;;  %438 = vmatprep.subr.mxu1 %v2568_v42 }
  0x38   :  { %368 = vmatpush1.msra.mxu0 %v2575_v43  ;;  %439 = vmatpush1.msra.mxu1 %v2580_v44 }
  0x39   :  { %369 = vmatprep.subr.mxu0 %v2587_v45  ;;  %440 = vmatprep.subr.mxu1 %v2592_v46 }
  0x3a   :  { %370 = vmatpush1.msra.mxu0 %v2599_v47  ;;  %441 = vmatpush1.msra.mxu1 %v2604_v48 }
  0x3b   :  { %371 = vmatprep.subr.mxu0 %v2611_v49  ;;  %442 = vmatprep.subr.mxu1 %v2616_v50 }
  0x3c   :  { %372 = vmatpush1.msra.mxu0 %v2623_v51  ;;  %443 = vmatpush1.msra.mxu1 %v2628_v52 }
  0x3d   :  { %373 = vmatprep.subr.mxu0 %v2635_v53  ;;  %444 = vmatprep.subr.mxu1 %v2640_v54  ;;  %v3683_v53 = vmov 0.0  }
  0x3e   :  { %374 = vmatpush1.msra.mxu0 %v2647_v55  ;;  %445 = vmatpush1.msra.mxu1 %v3682_v56 }
  0x3f   :  { %375 = vmatprep.subr.mxu0 %v2659_v57  ;;  %446 = vmatprep.subr.mxu1 %v2664_v58  ;;  %v2304_v58 = vmov 1983009808   ;;  %v235_v57 = vlaneseq }
  0x40   :  { %376 = vmatpush1.msra.mxu0 %v2671_v59  ;;  %447 = vmatpush1.msra.mxu1 %v2676_v60  ;;  %v233_v59 = vunpack.c.l.s4 %v2304_v58 }
  0x41   :  { %377 = vmatprep.subr.mxu0 %v2683_v61  ;;  %448 = vmatprep.subr.mxu1 %v2688_v62  ;;  %v236_v56 = vshrl.u32 %v235_v57, 7 }
  0x42   :  { %378 = vmatpush1.msra.mxu0 %v2695_v63  ;;  %411 = vmatprep.mubr.f32.mxu0 %v3683_v53  ;;  %v234_v60 = vunpack.c.0.s8 %v233_v59 }
  0x43   :  { %449 = vmatpush1.msra.mxu1 %v2700_v3  ;;  %482 = vmatprep.mubr.f32.mxu1 %v3683_v53 }
  0x44   :  { %611 = vmatprep.subr.mxu0 %v2323_v0  ;;  %682 = vmatprep.subr.mxu1 %v2328_v1  ;;  %v2776_v62 = vsub.s32 %v234_v60, %v236_v56  ;;  %v19_v1 = vld [vmem:[%s3581_s0] sm:$0xff] }
  0xe2   :  { %v150_v61 = vpop.f32.mrf.mxu0  ;;  %v221_v55 = vpop.f32.mrf.mxu1 }
  0xe4   :  { %v152_v63 = vpop.f32.mrf.mxu0  ;;  %v223_v54 = vpop.f32.mrf.mxu1 }
  0xe5   :  { %v230_v52 = vcombine.low %v150_v61, %v152_v63  ;;  %v231_v51 = vcombine.low %v221_v55, %v223_v54 }
  0xe7   :  { %v238_v3 = vrot.slane %v230_v52, %v2776_v62  ;;  %v245_v53 = vrot.slane %v231_v51, %v2776_v62 }
  0xe9   :  { %v246_v58 = vcombine.low %v238_v3, %v245_v53  ;;  %v18_v3 = vld [vmem:[#allocation3] sm:$0x3] }
  0xeb   :  { %v248_v0 = vadd.f32 %v246_v58, %v19_v1 }
  0xed   :  { %v2135_v59 = vmul.f32 -1.442695, %v248_v0  ;;  %v256_v57 = vrot.slane %v248_v0, 2  ;;  %v267_v60 = vrot.slane %v248_v0, 6  ;;  %v264_v61 = vrot.slane %v248_v0, 4 }
  0xef   :  { %2175 = vpow2.f32 %v2135_v59  ;;  %v2136_v50 = vmul.f32 -1.442695, %v256_v57  ;;  %v2137_v56 = vmul.f32 -1.442695, %v267_v60 }
  0xf1   :  { %2177 = vpow2.f32 %v2136_v50 }
  0xf2   :  { %2179 = vpow2.f32 %v2137_v56  ;;  %v3684_v56 = vld [vmem:[#allocation7_spill] sm:$0xff] }
  0xfc   :  { %v2176_v49 = vpop.eup %2175 }
  0xfd   :  { %v252_v54 = vadd.f32 1.0, %v2176_v49 }
  0xfe   :  { %v2178_v55 = vpop.eup %2177 }
  0xff   :  { %2181 = vrcp.f32 %v252_v54  ;;  %v261_v51 = vadd.f32 1.0, %v2178_v55  ;;  %v2180_v52 = vpop.eup %2179  ;;  %v3686_v54 = vld [vmem:[#allocation9_spill] sm:$0xff]  ;;  %v3687_v55 = vld [vmem:[#allocation10_spill] sm:$0xff] }
 0x100   :  { %2183 = vtanh.f32 %v264_v61  ;;  %v272_v58 = vadd.f32 1.0, %v2180_v52  ;;  %v3685_v61 = vld [vmem:[#allocation8_spill] sm:$0xff] }
 0x101   :  { %2185 = vrcp.f32 %v261_v51  ;;  %v3688_v51 = vld [vmem:[#allocation11_spill] sm:$0xff]  ;;  %v3689_v52 = vld [vmem:[#allocation12_spill] sm:$0xff] }
 0x102   :  { %2187 = vrcp.f32 %v272_v58  ;;  %v3694_v58 = vld [vmem:[#allocation17_spill] sm:$0xff] }
 0x10c   :  { %v2182_v63 = vpop.eup %2181 }
 0x10d   :  { %v2184_v1 = vpop.eup %2183 }
 0x10e   :  { %v2186_v53 = vpop.eup %2185  ;;  %v276_v57 = vmul.f32 %v2184_v1, %v2182_v63  ;;  %v3690_v63 = vld [vmem:[#allocation13_spill] sm:$0xff]  ;;  %v3692_v1 = vld [vmem:[#allocation15_spill] sm:$0xff] }
 0x10f   :  { %v275_v59 = vmul.f32 %v2186_v53, %v18_v3  ;;  %v2188_v0 = vpop.eup %2187  ;;  %v3691_v3 = vld [vmem:[#allocation14_spill] sm:$0xff]  ;;  %v3693_v53 = vld [vmem:[#allocation16_spill] sm:$0xff] }
 0x111   :  { %v2783_v50 = vadd.f32 %v276_v57, %v275_v59  ;;  %v3695_v59 = vld [vmem:[#allocation18_spill] sm:$0xff]  ;;  %v3696_v57 = vld [vmem:[#allocation19_spill] sm:$0xff] }
 0x113   :  { %2189 = vtanh.f32 %v2783_v50 }
 0x120   :  { %v2190_v49 = vpop.eup %2189 }
 0x121   :  { %v279_v60 = vmul.f32 %v2190_v49, %v2188_v0  ;;  %v3697_v0 = vld [vmem:[#allocation20_spill] sm:$0xff]  ;;  %v3698_v49 = vld [vmem:[#allocation21_spill] sm:$0xff] }
 0x123   :  { %280 = vst [vmem:[%s3582_s2] sm:$0x3] %v279_v60  ;;  %412 = vmatmul.mubr.f32.vlgmr.msra.gmra.mxu0 %v279_v60  ;;  %483 = vmatmul.mubr.f32.vlgmr.msra.gmra.mxu1 %v279_v60  ;;  %v3699_v60 = vmov 0.0  }
 0x124   :  { %612 = vmatpush1.msra.mxu0 %v2333_v2  ;;  %683 = vmatpush1.msra.mxu1 %v2344_v4 }
 0x125   :  { %613 = vmatprep.subr.mxu0 %v2349_v5  ;;  %684 = vmatprep.subr.mxu1 %v2354_v6 }
 0x126   :  { %614 = vmatpush1.msra.mxu0 %v2361_v7  ;;  %685 = vmatpush1.msra.mxu1 %v2366_v8 }
 0x127   :  { %615 = vmatprep.subr.mxu0 %v2371_v9  ;;  %686 = vmatprep.subr.mxu1 %v2378_v10 }
 0x128   :  { %616 = vmatpush1.msra.mxu0 %v2383_v11  ;;  %687 = vmatpush1.msra.mxu1 %v2388_v12 }
 0x129   :  { %617 = vmatprep.subr.mxu0 %v2395_v13  ;;  %688 = vmatprep.subr.mxu1 %v2400_v14 }
 0x12a   :  { %618 = vmatpush1.msra.mxu0 %v2407_v15  ;;  %689 = vmatpush1.msra.mxu1 %v2412_v16 }
 0x12b   :  { %619 = vmatprep.subr.mxu0 %v2419_v17  ;;  %690 = vmatprep.subr.mxu1 %v2424_v18 }
 0x12c   :  { %620 = vmatpush1.msra.mxu0 %v2431_v19  ;;  %691 = vmatpush1.msra.mxu1 %v2436_v20 }
 0x12d   :  { %621 = vmatprep.subr.mxu0 %v2443_v21  ;;  %692 = vmatprep.subr.mxu1 %v2448_v22 }
 0x12e   :  { %622 = vmatpush1.msra.mxu0 %v2455_v23  ;;  %693 = vmatpush1.msra.mxu1 %v2460_v24 }
 0x12f   :  { %623 = vmatprep.subr.mxu0 %v2467_v25  ;;  %694 = vmatprep.subr.mxu1 %v2472_v26 }
 0x130   :  { %624 = vmatpush1.msra.mxu0 %v2479_v27  ;;  %695 = vmatpush1.msra.mxu1 %v2484_v28 }
 0x131   :  { %625 = vmatprep.subr.mxu0 %v2491_v29  ;;  %696 = vmatprep.subr.mxu1 %v2496_v30 }
 0x132   :  { %626 = vmatpush1.msra.mxu0 %v2503_v31  ;;  %697 = vmatpush1.msra.mxu1 %v2508_v32 }
 0x133   :  { %627 = vmatprep.subr.mxu0 %v2515_v33  ;;  %698 = vmatprep.subr.mxu1 %v2520_v34 }
 0x134   :  { %628 = vmatpush1.msra.mxu0 %v2527_v35  ;;  %699 = vmatpush1.msra.mxu1 %v2532_v36 }
 0x135   :  { %629 = vmatprep.subr.mxu0 %v2539_v37  ;;  %700 = vmatprep.subr.mxu1 %v2544_v38 }
 0x136   :  { %630 = vmatpush1.msra.mxu0 %v2551_v39  ;;  %701 = vmatpush1.msra.mxu1 %v2556_v40 }
 0x137   :  { %631 = vmatprep.subr.mxu0 %v2563_v41  ;;  %702 = vmatprep.subr.mxu1 %v2568_v42 }
 0x138   :  { %632 = vmatpush1.msra.mxu0 %v2575_v43  ;;  %703 = vmatpush1.msra.mxu1 %v2580_v44 }
 0x139   :  { %633 = vmatprep.subr.mxu0 %v2587_v45  ;;  %704 = vmatprep.subr.mxu1 %v2592_v46 }
 0x13a   :  { %634 = vmatpush1.msra.mxu0 %v2599_v47  ;;  %705 = vmatpush1.msra.mxu1 %v2604_v48 }
 0x13b   :  { %635 = vmatprep.subr.mxu0 %v3684_v56  ;;  %706 = vmatprep.subr.mxu1 %v3685_v61 }
 0x13c   :  { %636 = vmatpush1.msra.mxu0 %v3686_v54  ;;  %707 = vmatpush1.msra.mxu1 %v3687_v55 }
 0x13d   :  { %637 = vmatprep.subr.mxu0 %v3688_v51  ;;  %708 = vmatprep.subr.mxu1 %v3689_v52  ;;  %v3700_v52 = vld [vmem:[#allocation22_spill] sm:$0xff] }
 0x13e   :  { %638 = vmatpush1.msra.mxu0 %v3690_v63  ;;  %709 = vmatpush1.msra.mxu1 %v3691_v3  ;;  %v3701_v3 = vld [vmem:[#allocation4_spill] sm:$0xff] }
 0x13f   :  { %639 = vmatprep.subr.mxu0 %v3692_v1  ;;  %710 = vmatprep.subr.mxu1 %v3693_v53  ;;  %v3702_v1 = vld [vmem:[#allocation5_spill] sm:$0xff] }
 0x140   :  { %640 = vmatpush1.msra.mxu0 %v3694_v58  ;;  %711 = vmatpush1.msra.mxu1 %v3695_v59 }
 0x141   :  { %641 = vmatprep.subr.mxu0 %v3696_v57  ;;  %712 = vmatprep.subr.mxu1 %v3697_v0 }
 0x142   :  { %642 = vmatpush1.msra.mxu0 %v3698_v49  ;;  %675 = vmatprep.mubr.f32.mxu0 %v3699_v60 }
 0x143   :  { %713 = vmatpush1.msra.mxu1 %v3700_v52  ;;  %746 = vmatprep.mubr.f32.mxu1 %v3699_v60  ;;  %v2138_v52 = vld [vmem:[%s3581_s0 + $0x8] sm:$0xff] }
 0x144   :  { %875 = vmatprep.subr.mxu0 %v3701_v3  ;;  %946 = vmatprep.subr.mxu1 %v3702_v1 }
 0x1e3   :  { %v413_v53 = vpop.f32.mrf.mxu0  ;;  %v484_v58 = vpop.f32.mrf.mxu1 }
 0x1e5   :  { %v415_v63 = vpop.f32.mrf.mxu0  ;;  %v486_v59 = vpop.f32.mrf.mxu1 }
 0x1e6   :  { %v493_v51 = vcombine.low %v413_v53, %v415_v63  ;;  %v494_v57 = vcombine.low %v484_v58, %v486_v59 }
 0x1e8   :  { %v501_v0 = vrot.slane %v493_v51, %v2776_v62  ;;  %v508_v49 = vrot.slane %v494_v57, %v2776_v62 }
 0x1ea   :  { %v509_v55 = vcombine.low %v501_v0, %v508_v49 }
 0x1ec   :  { %v511_v60 = vadd.f32 %v2138_v52, %v509_v55 }
 0x1ee   :  { %v2139_v54 = vmul.f32 -1.442695, %v511_v60  ;;  %v519_v3 = vrot.slane %v511_v60, 2  ;;  %v530_v61 = vrot.slane %v511_v60, 6  ;;  %v527_v63 = vrot.slane %v511_v60, 4 }
 0x1f0   :  { %2191 = vpow2.f32 %v2139_v54  ;;  %v2140_v1 = vmul.f32 -1.442695, %v519_v3  ;;  %v2141_v56 = vmul.f32 -1.442695, %v530_v61 }
 0x1f2   :  { %2193 = vpow2.f32 %v2140_v1 }
 0x1f3   :  { %2195 = vpow2.f32 %v2141_v56 }
 0x1fd   :  { %v2192_v48 = vpop.eup %2191 }
 0x1fe   :  { %v515_v53 = vadd.f32 1.0, %v2192_v48 }
 0x1ff   :  { %v2194_v58 = vpop.eup %2193 }
 0x200   :  { %2197 = vrcp.f32 %v515_v53  ;;  %v524_v51 = vadd.f32 1.0, %v2194_v58  ;;  %v2196_v59 = vpop.eup %2195  ;;  %v2948_v58 = vld [vmem:[%s3580_s1 + $0x1e8] sm:$0xff] }
 0x201   :  { %2199 = vtanh.f32 %v527_v63  ;;  %v535_v52 = vadd.f32 1.0, %v2196_v59  ;;  %3721 = vst [vmem:[#allocation4_spill] sm:$0xff] %v2948_v58  ;;  %v2958_v59 = vld [vmem:[%s3580_s1 + $0x1e0] sm:$0xff] }
 0x202   :  { %2201 = vrcp.f32 %v524_v51  ;;  %v2953_v51 = vld [vmem:[%s3580_s1 + $0x1f8] sm:$0xff] }
 0x203   :  { %2203 = vrcp.f32 %v535_v52  ;;  %3722 = vst [vmem:[#allocation5_spill] sm:$0xff] %v2953_v51  ;;  %v2982_v52 = vld [vmem:[%s3580_s1 + $0x1c0] sm:$0xff] }
 0x20d   :  { %v2198_v57 = vpop.eup %2197 }
 0x20e   :  { %v2200_v0 = vpop.eup %2199 }
 0x20f   :  { %v2202_v55 = vpop.eup %2201  ;;  %v539_v49 = vmul.f32 %v2200_v0, %v2198_v57  ;;  %v2965_v57 = vld [vmem:[%s3580_s1 + $0x1f0] sm:$0xff]  ;;  %v2970_v0 = vld [vmem:[%s3580_s1 + $0x1c8] sm:$0xff] }
 0x210   :  { %v538_v54 = vmul.f32 %v2202_v55, %v2783_v50  ;;  %v2204_v48 = vpop.eup %2203  ;;  %v2975_v55 = vld [vmem:[%s3580_s1 + $0x1d8] sm:$0xff] }
 0x212   :  { %v2861_v3 = vadd.f32 %v539_v49, %v538_v54  ;;  %v2987_v54 = vld [vmem:[%s3580_s1 + $0x1d0] sm:$0xff]  ;;  %v2992_v49 = vld [vmem:[%s3580_s1 + $0x1a8] sm:$0xff] }
 0x214   :  { %2205 = vtanh.f32 %v2861_v3 }
 0x221   :  { %v2206_v61 = vpop.eup %2205 }
 0x222   :  { %v542_v56 = vmul.f32 %v2206_v61, %v2204_v48  ;;  %v3004_v48 = vld [vmem:[%s3580_s1 + $0x1a0] sm:$0xff]  ;;  %v3009_v61 = vld [vmem:[%s3580_s1 + $0x1b0] sm:$0xff] }
 0x224   :  { %2142 = vst [vmem:[%s3582_s2 + $0x2] sm:$0x3] %v542_v56  ;;  %676 = vmatmul.mubr.f32.vlgmr.msra.gmra.mxu0 %v542_v56  ;;  %747 = vmatmul.mubr.f32.vlgmr.msra.gmra.mxu1 %v542_v56  ;;  %v3016_v56 = vld [vmem:[%s3580_s1 + $0x188] sm:$0xff] }
 0x225   :  { %876 = vmatpush1.msra.mxu0 %v2333_v2  ;;  %947 = vmatpush1.msra.mxu1 %v2344_v4  ;;  %v3703_v2 = vld [vmem:[#allocation6_spill] sm:$0xff]  ;;  %v3704_v4 = vld [vmem:[#allocation7_spill] sm:$0xff] }
 0x226   :  { %877 = vmatprep.subr.mxu0 %v2349_v5  ;;  %948 = vmatprep.subr.mxu1 %v2354_v6  ;;  %v3705_v5 = vld [vmem:[#allocation8_spill] sm:$0xff]  ;;  %v3706_v6 = vld [vmem:[#allocation9_spill] sm:$0xff] }
 0x227   :  { %878 = vmatpush1.msra.mxu0 %v2361_v7  ;;  %949 = vmatpush1.msra.mxu1 %v2366_v8  ;;  %v3707_v7 = vld [vmem:[#allocation10_spill] sm:$0xff]  ;;  %v3708_v8 = vld [vmem:[#allocation11_spill] sm:$0xff] }
 0x228   :  { %879 = vmatprep.subr.mxu0 %v2371_v9  ;;  %950 = vmatprep.subr.mxu1 %v2378_v10  ;;  %v3709_v9 = vld [vmem:[#allocation12_spill] sm:$0xff]  ;;  %v3710_v10 = vld [vmem:[#allocation13_spill] sm:$0xff] }
 0x229   :  { %880 = vmatpush1.msra.mxu0 %v2383_v11  ;;  %951 = vmatpush1.msra.mxu1 %v2388_v12  ;;  %v3711_v11 = vld [vmem:[#allocation14_spill] sm:$0xff]  ;;  %v3712_v12 = vld [vmem:[#allocation15_spill] sm:$0xff] }
 0x22a   :  { %881 = vmatprep.subr.mxu0 %v2395_v13  ;;  %952 = vmatprep.subr.mxu1 %v2400_v14  ;;  %v3713_v13 = vld [vmem:[#allocation16_spill] sm:$0xff]  ;;  %v3714_v14 = vld [vmem:[#allocation17_spill] sm:$0xff] }
 0x22b   :  { %882 = vmatpush1.msra.mxu0 %v2407_v15  ;;  %953 = vmatpush1.msra.mxu1 %v2412_v16  ;;  %v3715_v15 = vld [vmem:[#allocation18_spill] sm:$0xff]  ;;  %v3716_v16 = vld [vmem:[#allocation19_spill] sm:$0xff] }
 0x22c   :  { %883 = vmatprep.subr.mxu0 %v2419_v17  ;;  %954 = vmatprep.subr.mxu1 %v2424_v18  ;;  %v3717_v17 = vld [vmem:[#allocation20_spill] sm:$0xff]  ;;  %v3718_v18 = vld [vmem:[#allocation21_spill] sm:$0xff] }
 0x22d   :  { %884 = vmatpush1.msra.mxu0 %v2431_v19  ;;  %955 = vmatpush1.msra.mxu1 %v2436_v20  ;;  %v3719_v19 = vmov 0.0   ;;  %v3720_v20 = vld [vmem:[#allocation22_spill] sm:$0xff] }
 0x22e   :  { %885 = vmatprep.subr.mxu0 %v2443_v21  ;;  %956 = vmatprep.subr.mxu1 %v2448_v22 }
 0x22f   :  { %886 = vmatpush1.msra.mxu0 %v2455_v23  ;;  %957 = vmatpush1.msra.mxu1 %v2460_v24 }
 0x230   :  { %887 = vmatprep.subr.mxu0 %v2467_v25  ;;  %958 = vmatprep.subr.mxu1 %v2472_v26 }
 0x231   :  { %888 = vmatpush1.msra.mxu0 %v2479_v27  ;;  %959 = vmatpush1.msra.mxu1 %v2484_v28 }
 0x232   :  { %889 = vmatprep.subr.mxu0 %v2491_v29  ;;  %960 = vmatprep.subr.mxu1 %v2496_v30  ;;  %v2143_v29 = vld [vmem:[%s3581_s0 + $0x10] sm:$0xff] }
 0x233   :  { %890 = vmatpush1.msra.mxu0 %v2503_v31  ;;  %961 = vmatpush1.msra.mxu1 %v2508_v32 }
 0x234   :  { %891 = vmatprep.subr.mxu0 %v2515_v33  ;;  %962 = vmatprep.subr.mxu1 %v2520_v34 }
 0x235   :  { %892 = vmatpush1.msra.mxu0 %v2527_v35  ;;  %963 = vmatpush1.msra.mxu1 %v2532_v36 }
 0x236   :  { %893 = vmatprep.subr.mxu0 %v2539_v37  ;;  %964 = vmatprep.subr.mxu1 %v2544_v38 }
 0x237   :  { %894 = vmatpush1.msra.mxu0 %v2551_v39  ;;  %965 = vmatpush1.msra.mxu1 %v2556_v40 }
 0x238   :  { %895 = vmatprep.subr.mxu0 %v2563_v41  ;;  %966 = vmatprep.subr.mxu1 %v2568_v42 }
 0x239   :  { %896 = vmatpush1.msra.mxu0 %v2575_v43  ;;  %967 = vmatpush1.msra.mxu1 %v2580_v44 }
 0x23a   :  { %897 = vmatprep.subr.mxu0 %v2587_v45  ;;  %968 = vmatprep.subr.mxu1 %v2592_v46 }
 0x23b   :  { %898 = vmatpush1.msra.mxu0 %v2599_v47  ;;  %969 = vmatpush1.msra.mxu1 %v3703_v2  ;;  %v3021_v2 = vld [vmem:[%s3580_s1 + $0x198] sm:$0xff] }
 0x23c   :  { %899 = vmatprep.subr.mxu0 %v3704_v4  ;;  %970 = vmatprep.subr.mxu1 %v3705_v5  ;;  %v3028_v4 = vld [vmem:[%s3580_s1 + $0x180] sm:$0xff]  ;;  %v3033_v5 = vld [vmem:[%s3580_s1 + $0x190] sm:$0xff] }
 0x23d   :  { %900 = vmatpush1.msra.mxu0 %v3706_v6  ;;  %971 = vmatpush1.msra.mxu1 %v3707_v7  ;;  %v3040_v6 = vld [vmem:[%s3580_s1 + $0x168] sm:$0xff]  ;;  %v3045_v7 = vld [vmem:[%s3580_s1 + $0x178] sm:$0xff] }
 0x23e   :  { %901 = vmatprep.subr.mxu0 %v3708_v8  ;;  %972 = vmatprep.subr.mxu1 %v3709_v9  ;;  %v3052_v8 = vld [vmem:[%s3580_s1 + $0x160] sm:$0xff]  ;;  %v3057_v9 = vld [vmem:[%s3580_s1 + $0x170] sm:$0xff] }
 0x23f   :  { %902 = vmatpush1.msra.mxu0 %v3710_v10  ;;  %973 = vmatpush1.msra.mxu1 %v3711_v11  ;;  %v3064_v10 = vld [vmem:[%s3580_s1 + $0x148] sm:$0xff]  ;;  %v3069_v11 = vld [vmem:[%s3580_s1 + $0x158] sm:$0xff] }
 0x240   :  { %903 = vmatprep.subr.mxu0 %v3712_v12  ;;  %974 = vmatprep.subr.mxu1 %v3713_v13  ;;  %v3076_v12 = vld [vmem:[%s3580_s1 + $0x140] sm:$0xff]  ;;  %v3081_v13 = vld [vmem:[%s3580_s1 + $0x150] sm:$0xff] }
 0x241   :  { %904 = vmatpush1.msra.mxu0 %v3714_v14  ;;  %975 = vmatpush1.msra.mxu1 %v3715_v15  ;;  %v3088_v14 = vld [vmem:[%s3580_s1 + $0x128] sm:$0xff]  ;;  %v3093_v15 = vld [vmem:[%s3580_s1 + $0x138] sm:$0xff] }
 0x242   :  { %905 = vmatprep.subr.mxu0 %v3716_v16  ;;  %976 = vmatprep.subr.mxu1 %v3717_v17  ;;  %v3100_v16 = vld [vmem:[%s3580_s1 + $0x120] sm:$0xff]  ;;  %v3105_v17 = vld [vmem:[%s3580_s1 + $0x130] sm:$0xff] }
 0x243   :  { %906 = vmatpush1.msra.mxu0 %v3718_v18  ;;  %939 = vmatprep.mubr.f32.mxu0 %v3719_v19  ;;  %v3112_v18 = vld [vmem:[%s3580_s1 + $0x108] sm:$0xff] }
 0x244   :  { %977 = vmatpush1.msra.mxu1 %v3720_v20  ;;  %1010 = vmatprep.mubr.f32.mxu1 %v3719_v19  ;;  %v3117_v20 = vld [vmem:[%s3580_s1 + $0x118] sm:$0xff] }
 0x245   :  { %1139 = vmatprep.subr.mxu0 %v2948_v58  ;;  %1210 = vmatprep.subr.mxu1 %v2953_v51 }
 0x2e4   :  { %v677_v21 = vpop.f32.mrf.mxu0  ;;  %v748_v22 = vpop.f32.mrf.mxu1 }
 0x2e6   :  { %v679_v23 = vpop.f32.mrf.mxu0  ;;  %v750_v24 = vpop.f32.mrf.mxu1 }
 0x2e7   :  { %v757_v25 = vcombine.low %v677_v21, %v679_v23  ;;  %v758_v26 = vcombine.low %v748_v22, %v750_v24  ;;  %v3124_v21 = vld [vmem:[%s3580_s1 + $0x100] sm:$0xff]  ;;  %v3129_v22 = vld [vmem:[%s3580_s1 + $0x110] sm:$0xff]  ;;  %v3136_v23 = vld [vmem:[%s3580_s1 + $0xe8] sm:$0xff] }
 0x2e8   :  { %v3141_v24 = vld [vmem:[%s3580_s1 + $0xf8] sm:$0xff] }
 0x2e9   :  { %v765_v27 = vrot.slane %v757_v25, %v2776_v62  ;;  %v772_v28 = vrot.slane %v758_v26, %v2776_v62  ;;  %v3148_v25 = vld [vmem:[%s3580_s1 + $0xe0] sm:$0xff]  ;;  %v3153_v26 = vld [vmem:[%s3580_s1 + $0xf0] sm:$0xff] }
 0x2eb   :  { %v773_v30 = vcombine.low %v765_v27, %v772_v28  ;;  %v3160_v27 = vld [vmem:[%s3580_s1 + $0xc8] sm:$0xff]  ;;  %v3165_v28 = vld [vmem:[%s3580_s1 + $0xd8] sm:$0xff] }
 0x2ed   :  { %v775_v31 = vadd.f32 %v2143_v29, %v773_v30  ;;  %v3172_v29 = vld [vmem:[%s3580_s1 + $0xc0] sm:$0xff]  ;;  %v3177_v30 = vld [vmem:[%s3580_s1 + $0xd0] sm:$0xff] }
 0x2ef   :  { %v2144_v32 = vmul.f32 -1.442695, %v775_v31  ;;  %v783_v33 = vrot.slane %v775_v31, 2  ;;  %v794_v35 = vrot.slane %v775_v31, 6  ;;  %v791_v38 = vrot.slane %v775_v31, 4  ;;  %v3184_v31 = vld [vmem:[%s3580_s1 + $0xa8] sm:$0xff] }
 0x2f1   :  { %2207 = vpow2.f32 %v2144_v32  ;;  %v2145_v34 = vmul.f32 -1.442695, %v783_v33  ;;  %v2146_v36 = vmul.f32 -1.442695, %v794_v35  ;;  %v3189_v32 = vld [vmem:[%s3580_s1 + $0xb8] sm:$0xff]  ;;  %v3196_v33 = vld [vmem:[%s3580_s1 + $0xa0] sm:$0xff] }
 0x2f2   :  { %v3208_v35 = vld [vmem:[%s3580_s1 + $0x88] sm:$0xff] }
 0x2f3   :  { %2209 = vpow2.f32 %v2145_v34  ;;  %v3201_v34 = vld [vmem:[%s3580_s1 + $0xb0] sm:$0xff] }
 0x2f4   :  { %2211 = vpow2.f32 %v2146_v36  ;;  %v3213_v36 = vld [vmem:[%s3580_s1 + $0x98] sm:$0xff] }
 0x2fe   :  { %v2208_v37 = vpop.eup %2207 }
 0x2ff   :  { %v779_v39 = vadd.f32 1.0, %v2208_v37  ;;  %v3220_v37 = vld [vmem:[%s3580_s1 + $0x80] sm:$0xff] }
 0x300   :  { %v2210_v40 = vpop.eup %2209 }
 0x301   :  { %2213 = vrcp.f32 %v779_v39  ;;  %v788_v41 = vadd.f32 1.0, %v2210_v40  ;;  %v2212_v42 = vpop.eup %2211  ;;  %v3232_v39 = vld [vmem:[%s3580_s1 + $0x68] sm:$0xff]  ;;  %v3237_v40 = vld [vmem:[%s3580_s1 + $0x78] sm:$0xff] }
 0x302   :  { %2215 = vtanh.f32 %v791_v38  ;;  %v799_v46 = vadd.f32 1.0, %v2212_v42  ;;  %v3225_v38 = vld [vmem:[%s3580_s1 + $0x90] sm:$0xff]  ;;  %3724 = vst [vmem:[#allocation7_spill] sm:$0xff] %v3232_v39  ;;  %3725 = vst [vmem:[#allocation8_spill] sm:$0xff] %v3237_v40 }
 0x303   :  { %2217 = vrcp.f32 %v788_v41  ;;  %3723 = vst [vmem:[#allocation6_spill] sm:$0xff] %v3225_v38  ;;  %v3244_v41 = vld [vmem:[%s3580_s1 + $0x60] sm:$0xff]  ;;  %v3249_v42 = vld [vmem:[%s3580_s1 + $0x70] sm:$0xff] }
 0x304   :  { %2219 = vrcp.f32 %v799_v46  ;;  %3726 = vst [vmem:[#allocation9_spill] sm:$0xff] %v3244_v41  ;;  %3727 = vst [vmem:[#allocation10_spill] sm:$0xff] %v3249_v42  ;;  %v3273_v46 = vld [vmem:[%s3580_s1 + $0x50] sm:$0xff] }
 0x305   :  { %3731 = vst [vmem:[#allocation14_spill] sm:$0xff] %v3273_v46 }
 0x30e   :  { %v2214_v43 = vpop.eup %2213 }
 0x30f   :  { %v2216_v44 = vpop.eup %2215 }
 0x310   :  { %v2218_v45 = vpop.eup %2217  ;;  %v803_v50 = vmul.f32 %v2216_v44, %v2214_v43  ;;  %v3256_v43 = vld [vmem:[%s3580_s1 + $0x48] sm:$0xff]  ;;  %v3261_v44 = vld [vmem:[%s3580_s1 + $0x58] sm:$0xff] }
 0x311   :  { %v802_v47 = vmul.f32 %v2218_v45, %v2861_v3  ;;  %v2220_v1 = vpop.eup %2219  ;;  %v2999_v3 = vld [vmem:[%s3580_s1 + $0x1b8] sm:$0xff]  ;;  %3728 = vst [vmem:[#allocation11_spill] sm:$0xff] %v3256_v43  ;;  %3729 = vst [vmem:[#allocation12_spill] sm:$0xff] %v3261_v44  ;;  %v3268_v45 = vld [vmem:[%s3580_s1 + $0x40] sm:$0xff] }
 0x312   :  { %3730 = vst [vmem:[#allocation13_spill] sm:$0xff] %v3268_v45 }
 0x313   :  { %v2937_v60 = vadd.f32 %v803_v50, %v802_v47  ;;  %v3280_v47 = vld [vmem:[%s3580_s1 + $0x28] sm:$0xff]  ;;  %v3285_v50 = vld [vmem:[%s3580_s1 + $0x38] sm:$0xff] }
 0x314   :  { %3732 = vst [vmem:[#allocation15_spill] sm:$0xff] %v3280_v47  ;;  %3733 = vst [vmem:[#allocation16_spill] sm:$0xff] %v3285_v50 }
 0x315   :  { %2221 = vtanh.f32 %v2937_v60 }
 0x322   :  { %v2222_v63 = vpop.eup %2221 }
 0x323   :  { %v806_v53 = vmul.f32 %v2222_v63, %v2220_v1  ;;  %v3292_v1 = vld [vmem:[%s3580_s1 + $0x20] sm:$0xff]  ;;  %v3297_v63 = vld [vmem:[%s3580_s1 + $0x30] sm:$0xff] }
 0x324   :  { %3734 = vst [vmem:[#allocation17_spill] sm:$0xff] %v3292_v1  ;;  %3735 = vst [vmem:[#allocation18_spill] sm:$0xff] %v3297_v63 }
 0x325   :  { %2147 = vst [vmem:[%s3582_s2 + $0x4] sm:$0x3] %v806_v53  ;;  %940 = vmatmul.mubr.f32.vlgmr.msra.gmra.mxu0 %v806_v53  ;;  %1011 = vmatmul.mubr.f32.vlgmr.msra.gmra.mxu1 %v806_v53  ;;  %v3304_v53 = vld [vmem:[%s3580_s1 + $0x8] sm:$0xff] }
 0x326   :  { %1203 = vmatprep.mubr.f32.mxu0 %v3719_v19  ;;  %1274 = vmatprep.mubr.f32.mxu1 %v3719_v19  ;;  %3736 = vst [vmem:[#allocation19_spill] sm:$0xff] %v3304_v53  ;;  %v3309_v19 = vld [vmem:[%s3580_s1 + $0x18] sm:$0xff] }
 0x327   :  { %1140 = vmatpush1.msra.mxu0 %v2958_v59  ;;  %1211 = vmatpush1.msra.mxu1 %v2965_v57  ;;  %3737 = vst [vmem:[#allocation20_spill] sm:$0xff] %v3309_v19 }
 0x328   :  { %1141 = vmatprep.subr.mxu0 %v2970_v0  ;;  %1212 = vmatprep.subr.mxu1 %v2975_v55 }
 0x329   :  { %1142 = vmatpush1.msra.mxu0 %v2982_v52  ;;  %1213 = vmatpush1.msra.mxu1 %v2987_v54 }
 0x32a   :  { %1143 = vmatprep.subr.mxu0 %v2992_v49  ;;  %1214 = vmatprep.subr.mxu1 %v2999_v3 }
 0x32b   :  { %1144 = vmatpush1.msra.mxu0 %v3004_v48  ;;  %1215 = vmatpush1.msra.mxu1 %v3009_v61 }
 0x32c   :  { %1145 = vmatprep.subr.mxu0 %v3016_v56  ;;  %1216 = vmatprep.subr.mxu1 %v3021_v2 }
 0x32d   :  { %1146 = vmatpush1.msra.mxu0 %v3028_v4  ;;  %1217 = vmatpush1.msra.mxu1 %v3033_v5 }
 0x32e   :  { %1147 = vmatprep.subr.mxu0 %v3040_v6  ;;  %1218 = vmatprep.subr.mxu1 %v3045_v7 }
 0x32f   :  { %1148 = vmatpush1.msra.mxu0 %v3052_v8  ;;  %1219 = vmatpush1.msra.mxu1 %v3057_v9 }
 0x330   :  { %1149 = vmatprep.subr.mxu0 %v3064_v10  ;;  %1220 = vmatprep.subr.mxu1 %v3069_v11 }
 0x331   :  { %1150 = vmatpush1.msra.mxu0 %v3076_v12  ;;  %1221 = vmatpush1.msra.mxu1 %v3081_v13 }
 0x332   :  { %1151 = vmatprep.subr.mxu0 %v3088_v14  ;;  %1222 = vmatprep.subr.mxu1 %v3093_v15 }
 0x333   :  { %1152 = vmatpush1.msra.mxu0 %v3100_v16  ;;  %1223 = vmatpush1.msra.mxu1 %v3105_v17 }
 0x334   :  { %1153 = vmatprep.subr.mxu0 %v3112_v18  ;;  %1224 = vmatprep.subr.mxu1 %v3117_v20 }
 0x335   :  { %1154 = vmatpush1.msra.mxu0 %v3124_v21  ;;  %1225 = vmatpush1.msra.mxu1 %v3129_v22 }
 0x336   :  { %1155 = vmatprep.subr.mxu0 %v3136_v23  ;;  %1226 = vmatprep.subr.mxu1 %v3141_v24 }
 0x337   :  { %1156 = vmatpush1.msra.mxu0 %v3148_v25  ;;  %1227 = vmatpush1.msra.mxu1 %v3153_v26 }
 0x338   :  { %1157 = vmatprep.subr.mxu0 %v3160_v27  ;;  %1228 = vmatprep.subr.mxu1 %v3165_v28 }
 0x339   :  { %1158 = vmatpush1.msra.mxu0 %v3172_v29  ;;  %1229 = vmatpush1.msra.mxu1 %v3177_v30 }
 0x33a   :  { %1159 = vmatprep.subr.mxu0 %v3184_v31  ;;  %1230 = vmatprep.subr.mxu1 %v3189_v32 }
 0x33b   :  { %1160 = vmatpush1.msra.mxu0 %v3196_v33  ;;  %1231 = vmatpush1.msra.mxu1 %v3201_v34 }
 0x33c   :  { %1161 = vmatprep.subr.mxu0 %v3208_v35  ;;  %1232 = vmatprep.subr.mxu1 %v3213_v36 }
 0x33d   :  { %1162 = vmatpush1.msra.mxu0 %v3220_v37  ;;  %1233 = vmatpush1.msra.mxu1 %v3225_v38 }
 0x33e   :  { %1163 = vmatprep.subr.mxu0 %v3232_v39  ;;  %1234 = vmatprep.subr.mxu1 %v3237_v40 }
 0x33f   :  { %1164 = vmatpush1.msra.mxu0 %v3244_v41  ;;  %1235 = vmatpush1.msra.mxu1 %v3249_v42 }
 0x340   :  { %1165 = vmatprep.subr.mxu0 %v3256_v43  ;;  %1236 = vmatprep.subr.mxu1 %v3261_v44 }
 0x341   :  { %1166 = vmatpush1.msra.mxu0 %v3268_v45  ;;  %1237 = vmatpush1.msra.mxu1 %v3273_v46  ;;  %v3316_v45 = vld [vmem:[%s3580_s1] sm:$0xff]  ;;  %v3321_v46 = vld [vmem:[%s3580_s1 + $0x10] sm:$0xff] }
 0x342   :  { %1167 = vmatprep.subr.mxu0 %v3280_v47  ;;  %1238 = vmatprep.subr.mxu1 %v3285_v50  ;;  %3738 = vst [vmem:[#allocation21_spill] sm:$0xff] %v3316_v45  ;;  %3739 = vst [vmem:[#allocation22_spill] sm:$0xff] %v3321_v46 }
 0x343   :  { %1168 = vmatpush1.msra.mxu0 %v3292_v1  ;;  %1239 = vmatpush1.msra.mxu1 %v3297_v63 }
 0x344   :  { %1169 = vmatprep.subr.mxu0 %v3304_v53  ;;  %1240 = vmatprep.subr.mxu1 %v3309_v19 }
 0x345   :  { %1170 = vmatpush1.msra.mxu0 %v3316_v45  ;;  %1241 = vmatpush1.msra.mxu1 %v3321_v46  ;;  %v2148_v45 = vld [vmem:[%s3581_s0 + $0x18] sm:$0xff] }
 0x346   :  { %1403 = vmatprep.subr.mxu0 %v2948_v58  ;;  %1474 = vmatprep.subr.mxu1 %v2953_v51 }
 0x3e5   :  { %v941_v50 = vpop.f32.mrf.mxu0  ;;  %v1012_v47 = vpop.f32.mrf.mxu1 }
 0x3e7   :  { %v943_v44 = vpop.f32.mrf.mxu0  ;;  %v1014_v43 = vpop.f32.mrf.mxu1 }
 0x3e8   :  { %v1021_v42 = vcombine.low %v941_v50, %v943_v44  ;;  %v1022_v1 = vcombine.low %v1012_v47, %v1014_v43 }
 0x3ea   :  { %v1029_v63 = vrot.slane %v1021_v42, %v2776_v62  ;;  %v1036_v53 = vrot.slane %v1022_v1, %v2776_v62 }
 0x3ec   :  { %v1037_v19 = vcombine.low %v1029_v63, %v1036_v53  ;;  %v3742_v53 = vld [vmem:[#allocation8_spill] sm:$0xff] }
 0x3ee   :  { %v1039_v46 = vadd.f32 %v2148_v45, %v1037_v19 }
 0x3f0   :  { %v2149_v41 = vmul.f32 -1.442695, %v1039_v46  ;;  %v1047_v58 = vrot.slane %v1039_v46, 2  ;;  %v1058_v40 = vrot.slane %v1039_v46, 6  ;;  %v1055_v44 = vrot.slane %v1039_v46, 4  ;;  %v3741_v46 = vld [vmem:[#allocation7_spill] sm:$0xff] }
 0x3f2   :  { %2223 = vpow2.f32 %v2149_v41  ;;  %v2150_v51 = vmul.f32 -1.442695, %v1047_v58  ;;  %v2151_v39 = vmul.f32 -1.442695, %v1058_v40 }
 0x3f4   :  { %2225 = vpow2.f32 %v2150_v51 }
 0x3f5   :  { %2227 = vpow2.f32 %v2151_v39 }
 0x3ff   :  { %v2224_v38 = vpop.eup %2223 }
 0x400   :  { %v1043_v43 = vadd.f32 1.0, %v2224_v38 }
 0x401   :  { %v2226_v47 = vpop.eup %2225 }
 0x402   :  { %2229 = vrcp.f32 %v1043_v43  ;;  %v1052_v42 = vadd.f32 1.0, %v2226_v47  ;;  %v2228_v50 = vpop.eup %2227  ;;  %v3744_v43 = vld [vmem:[#allocation10_spill] sm:$0xff]  ;;  %v3745_v47 = vld [vmem:[#allocation11_spill] sm:$0xff] }
 0x403   :  { %2231 = vtanh.f32 %v1055_v44  ;;  %v1063_v45 = vadd.f32 1.0, %v2228_v50  ;;  %v3743_v44 = vld [vmem:[#allocation9_spill] sm:$0xff] }
 0x404   :  { %2233 = vrcp.f32 %v1052_v42  ;;  %v3746_v42 = vld [vmem:[#allocation12_spill] sm:$0xff]  ;;  %v3747_v50 = vld [vmem:[#allocation13_spill] sm:$0xff] }
 0x405   :  { %2235 = vrcp.f32 %v1063_v45  ;;  %v3751_v45 = vld [vmem:[#allocation17_spill] sm:$0xff] }
 0x40f   :  { %v2230_v1 = vpop.eup %2229 }
 0x410   :  { %v2232_v63 = vpop.eup %2231 }
 0x411   :  { %v2234_v19 = vpop.eup %2233  ;;  %v1067_v58 = vmul.f32 %v2232_v63, %v2230_v1  ;;  %v3748_v1 = vld [vmem:[#allocation14_spill] sm:$0xff]  ;;  %v3749_v63 = vld [vmem:[#allocation15_spill] sm:$0xff] }
 0x412   :  { %v1066_v41 = vmul.f32 %v2234_v19, %v2937_v60  ;;  %v2236_v38 = vpop.eup %2235  ;;  %v3740_v60 = vld [vmem:[#allocation6_spill] sm:$0xff]  ;;  %v3750_v19 = vld [vmem:[#allocation16_spill] sm:$0xff] }
 0x414   :  { %v3337_v51 = vadd.f32 %v1067_v58, %v1066_v41  ;;  %v3752_v41 = vld [vmem:[#allocation18_spill] sm:$0xff]  ;;  %v3753_v58 = vld [vmem:[#allocation19_spill] sm:$0xff] }
 0x416   :  { %2237 = vtanh.f32 %v3337_v51 }
 0x423   :  { %v2238_v40 = vpop.eup %2237 }
 0x424   :  { %v1070_v39 = vmul.f32 %v2238_v40, %v2236_v38  ;;  %v3754_v38 = vld [vmem:[#allocation20_spill] sm:$0xff]  ;;  %v3755_v40 = vld [vmem:[#allocation21_spill] sm:$0xff] }
 0x426   :  { %2152 = vst [vmem:[%s3582_s2 + $0x6] sm:$0x3] %v1070_v39  ;;  %1204 = vmatmul.mubr.f32.vlgmr.msra.gmra.mxu0 %v1070_v39  ;;  %1275 = vmatmul.mubr.f32.vlgmr.msra.gmra.mxu1 %v1070_v39  ;;  %v3756_v39 = vmov 0.0  }
 0x427   :  { %1404 = vmatpush1.msra.mxu0 %v2958_v59  ;;  %1475 = vmatpush1.msra.mxu1 %v2965_v57 }
 0x428   :  { %1405 = vmatprep.subr.mxu0 %v2970_v0  ;;  %1476 = vmatprep.subr.mxu1 %v2975_v55 }
 0x429   :  { %1406 = vmatpush1.msra.mxu0 %v2982_v52  ;;  %1477 = vmatpush1.msra.mxu1 %v2987_v54 }
 0x42a   :  { %1407 = vmatprep.subr.mxu0 %v2992_v49  ;;  %1478 = vmatprep.subr.mxu1 %v2999_v3 }
 0x42b   :  { %1408 = vmatpush1.msra.mxu0 %v3004_v48  ;;  %1479 = vmatpush1.msra.mxu1 %v3009_v61 }
 0x42c   :  { %1409 = vmatprep.subr.mxu0 %v3016_v56  ;;  %1480 = vmatprep.subr.mxu1 %v3021_v2 }
 0x42d   :  { %1410 = vmatpush1.msra.mxu0 %v3028_v4  ;;  %1481 = vmatpush1.msra.mxu1 %v3033_v5 }
 0x42e   :  { %1411 = vmatprep.subr.mxu0 %v3040_v6  ;;  %1482 = vmatprep.subr.mxu1 %v3045_v7 }
 0x42f   :  { %1412 = vmatpush1.msra.mxu0 %v3052_v8  ;;  %1483 = vmatpush1.msra.mxu1 %v3057_v9 }
 0x430   :  { %1413 = vmatprep.subr.mxu0 %v3064_v10  ;;  %1484 = vmatprep.subr.mxu1 %v3069_v11 }
 0x431   :  { %1414 = vmatpush1.msra.mxu0 %v3076_v12  ;;  %1485 = vmatpush1.msra.mxu1 %v3081_v13 }
 0x432   :  { %1415 = vmatprep.subr.mxu0 %v3088_v14  ;;  %1486 = vmatprep.subr.mxu1 %v3093_v15 }
 0x433   :  { %1416 = vmatpush1.msra.mxu0 %v3100_v16  ;;  %1487 = vmatpush1.msra.mxu1 %v3105_v17 }
 0x434   :  { %1417 = vmatprep.subr.mxu0 %v3112_v18  ;;  %1488 = vmatprep.subr.mxu1 %v3117_v20 }
 0x435   :  { %1418 = vmatpush1.msra.mxu0 %v3124_v21  ;;  %1489 = vmatpush1.msra.mxu1 %v3129_v22 }
 0x436   :  { %1419 = vmatprep.subr.mxu0 %v3136_v23  ;;  %1490 = vmatprep.subr.mxu1 %v3141_v24 }
 0x437   :  { %1420 = vmatpush1.msra.mxu0 %v3148_v25  ;;  %1491 = vmatpush1.msra.mxu1 %v3153_v26 }
 0x438   :  { %1421 = vmatprep.subr.mxu0 %v3160_v27  ;;  %1492 = vmatprep.subr.mxu1 %v3165_v28 }
 0x439   :  { %1422 = vmatpush1.msra.mxu0 %v3172_v29  ;;  %1493 = vmatpush1.msra.mxu1 %v3177_v30 }
 0x43a   :  { %1423 = vmatprep.subr.mxu0 %v3184_v31  ;;  %1494 = vmatprep.subr.mxu1 %v3189_v32 }
 0x43b   :  { %1424 = vmatpush1.msra.mxu0 %v3196_v33  ;;  %1495 = vmatpush1.msra.mxu1 %v3201_v34 }
 0x43c   :  { %1425 = vmatprep.subr.mxu0 %v3208_v35  ;;  %1496 = vmatprep.subr.mxu1 %v3213_v36 }
 0x43d   :  { %1426 = vmatpush1.msra.mxu0 %v3220_v37  ;;  %1497 = vmatpush1.msra.mxu1 %v3740_v60 }
 0x43e   :  { %1427 = vmatprep.subr.mxu0 %v3741_v46  ;;  %1498 = vmatprep.subr.mxu1 %v3742_v53 }
 0x43f   :  { %1428 = vmatpush1.msra.mxu0 %v3743_v44  ;;  %1499 = vmatpush1.msra.mxu1 %v3744_v43 }
 0x440   :  { %1429 = vmatprep.subr.mxu0 %v3745_v47  ;;  %1500 = vmatprep.subr.mxu1 %v3746_v42  ;;  %v3757_v42 = vld [vmem:[#allocation22_spill] sm:$0xff] }
 0x441   :  { %1430 = vmatpush1.msra.mxu0 %v3747_v50  ;;  %1501 = vmatpush1.msra.mxu1 %v3748_v1  ;;  %v3758_v1 = vld [vmem:[#allocation4_spill] sm:$0xff] }
 0x442   :  { %1431 = vmatprep.subr.mxu0 %v3749_v63  ;;  %1502 = vmatprep.subr.mxu1 %v3750_v19  ;;  %v3759_v63 = vld [vmem:[#allocation5_spill] sm:$0xff] }
 0x443   :  { %1432 = vmatpush1.msra.mxu0 %v3751_v45  ;;  %1503 = vmatpush1.msra.mxu1 %v3752_v41 }
 0x444   :  { %1433 = vmatprep.subr.mxu0 %v3753_v58  ;;  %1504 = vmatprep.subr.mxu1 %v3754_v38 }
 0x445   :  { %1434 = vmatpush1.msra.mxu0 %v3755_v40  ;;  %1467 = vmatprep.mubr.f32.mxu0 %v3756_v39 }
 0x446   :  { %1505 = vmatpush1.msra.mxu1 %v3757_v42  ;;  %1538 = vmatprep.mubr.f32.mxu1 %v3756_v39  ;;  %v2153_v42 = vld [vmem:[%s3581_s0 + $0x20] sm:$0xff] }
 0x447   :  { %1667 = vmatprep.subr.mxu0 %v3758_v1  ;;  %1738 = vmatprep.subr.mxu1 %v3759_v63 }
 0x4e6   :  { %v1205_v19 = vpop.f32.mrf.mxu0  ;;  %v1276_v45 = vpop.f32.mrf.mxu1 }
 0x4e8   :  { %v1207_v50 = vpop.f32.mrf.mxu0  ;;  %v1278_v41 = vpop.f32.mrf.mxu1 }
 0x4e9   :  { %v1285_v47 = vcombine.low %v1205_v19, %v1207_v50  ;;  %v1286_v58 = vcombine.low %v1276_v45, %v1278_v41 }
 0x4eb   :  { %v1293_v38 = vrot.slane %v1285_v47, %v2776_v62  ;;  %v1300_v40 = vrot.slane %v1286_v58, %v2776_v62 }
 0x4ed   :  { %v1301_v43 = vcombine.low %v1293_v38, %v1300_v40  ;;  %v3761_v40 = vld [vmem:[#allocation7_spill] sm:$0xff] }
 0x4ef   :  { %v1303_v39 = vadd.f32 %v2153_v42, %v1301_v43 }
 0x4f1   :  { %v2154_v44 = vmul.f32 -1.442695, %v1303_v39  ;;  %v1311_v1 = vrot.slane %v1303_v39, 2  ;;  %v1322_v53 = vrot.slane %v1303_v39, 6  ;;  %v1319_v50 = vrot.slane %v1303_v39, 4  ;;  %v3762_v39 = vld [vmem:[#allocation8_spill] sm:$0xff] }
 0x4f3   :  { %2239 = vpow2.f32 %v2154_v44  ;;  %v2155_v63 = vmul.f32 -1.442695, %v1311_v1  ;;  %v2156_v46 = vmul.f32 -1.442695, %v1322_v53 }
 0x4f5   :  { %2241 = vpow2.f32 %v2155_v63 }
 0x4f6   :  { %2243 = vpow2.f32 %v2156_v46 }
 0x500   :  { %v2240_v60 = vpop.eup %2239 }
 0x501   :  { %v1307_v19 = vadd.f32 1.0, %v2240_v60 }
 0x502   :  { %v2242_v45 = vpop.eup %2241 }
 0x503   :  { %2245 = vrcp.f32 %v1307_v19  ;;  %v1316_v47 = vadd.f32 1.0, %v2242_v45  ;;  %v2244_v41 = vpop.eup %2243  ;;  %v3764_v19 = vld [vmem:[#allocation10_spill] sm:$0xff]  ;;  %v3765_v45 = vld [vmem:[#allocation11_spill] sm:$0xff] }
 0x504   :  { %2247 = vtanh.f32 %v1319_v50  ;;  %v1327_v42 = vadd.f32 1.0, %v2244_v41  ;;  %v3763_v50 = vld [vmem:[#allocation9_spill] sm:$0xff] }
 0x505   :  { %2249 = vrcp.f32 %v1316_v47  ;;  %v3766_v47 = vld [vmem:[#allocation12_spill] sm:$0xff]  ;;  %v3767_v41 = vld [vmem:[#allocation13_spill] sm:$0xff] }
 0x506   :  { %2251 = vrcp.f32 %v1327_v42  ;;  %v3771_v42 = vld [vmem:[#allocation17_spill] sm:$0xff] }
 0x510   :  { %v2246_v58 = vpop.eup %2245 }
 0x511   :  { %v2248_v38 = vpop.eup %2247 }
 0x512   :  { %v2250_v43 = vpop.eup %2249  ;;  %v1331_v1 = vmul.f32 %v2248_v38, %v2246_v58  ;;  %v3768_v58 = vld [vmem:[#allocation14_spill] sm:$0xff]  ;;  %v3769_v38 = vld [vmem:[#allocation15_spill] sm:$0xff] }
 0x513   :  { %v1330_v44 = vmul.f32 %v2250_v43, %v3337_v51  ;;  %v2252_v60 = vpop.eup %2251  ;;  %v3760_v51 = vld [vmem:[#allocation6_spill] sm:$0xff]  ;;  %v3770_v43 = vld [vmem:[#allocation16_spill] sm:$0xff] }
 0x515   :  { %v3415_v63 = vadd.f32 %v1331_v1, %v1330_v44  ;;  %v3772_v44 = vld [vmem:[#allocation18_spill] sm:$0xff]  ;;  %v3773_v1 = vld [vmem:[#allocation19_spill] sm:$0xff] }
 0x517   :  { %2253 = vtanh.f32 %v3415_v63 }
 0x524   :  { %v2254_v53 = vpop.eup %2253 }
 0x525   :  { %v1334_v46 = vmul.f32 %v2254_v53, %v2252_v60  ;;  %v3774_v60 = vld [vmem:[#allocation20_spill] sm:$0xff]  ;;  %v3775_v53 = vld [vmem:[#allocation21_spill] sm:$0xff] }
 0x527   :  { %2157 = vst [vmem:[%s3582_s2 + $0x8] sm:$0x3] %v1334_v46  ;;  %1468 = vmatmul.mubr.f32.vlgmr.msra.gmra.mxu0 %v1334_v46  ;;  %1539 = vmatmul.mubr.f32.vlgmr.msra.gmra.mxu1 %v1334_v46  ;;  %v3776_v46 = vmov 0.0  }
 0x528   :  { %1668 = vmatpush1.msra.mxu0 %v2958_v59  ;;  %1739 = vmatpush1.msra.mxu1 %v2965_v57 }
 0x529   :  { %1669 = vmatprep.subr.mxu0 %v2970_v0  ;;  %1740 = vmatprep.subr.mxu1 %v2975_v55 }
 0x52a   :  { %1670 = vmatpush1.msra.mxu0 %v2982_v52  ;;  %1741 = vmatpush1.msra.mxu1 %v2987_v54 }
 0x52b   :  { %1671 = vmatprep.subr.mxu0 %v2992_v49  ;;  %1742 = vmatprep.subr.mxu1 %v2999_v3 }
 0x52c   :  { %1672 = vmatpush1.msra.mxu0 %v3004_v48  ;;  %1743 = vmatpush1.msra.mxu1 %v3009_v61 }
 0x52d   :  { %1673 = vmatprep.subr.mxu0 %v3016_v56  ;;  %1744 = vmatprep.subr.mxu1 %v3021_v2 }
 0x52e   :  { %1674 = vmatpush1.msra.mxu0 %v3028_v4  ;;  %1745 = vmatpush1.msra.mxu1 %v3033_v5 }
 0x52f   :  { %1675 = vmatprep.subr.mxu0 %v3040_v6  ;;  %1746 = vmatprep.subr.mxu1 %v3045_v7 }
 0x530   :  { %1676 = vmatpush1.msra.mxu0 %v3052_v8  ;;  %1747 = vmatpush1.msra.mxu1 %v3057_v9 }
 0x531   :  { %1677 = vmatprep.subr.mxu0 %v3064_v10  ;;  %1748 = vmatprep.subr.mxu1 %v3069_v11 }
 0x532   :  { %1678 = vmatpush1.msra.mxu0 %v3076_v12  ;;  %1749 = vmatpush1.msra.mxu1 %v3081_v13 }
 0x533   :  { %1679 = vmatprep.subr.mxu0 %v3088_v14  ;;  %1750 = vmatprep.subr.mxu1 %v3093_v15 }
 0x534   :  { %1680 = vmatpush1.msra.mxu0 %v3100_v16  ;;  %1751 = vmatpush1.msra.mxu1 %v3105_v17 }
 0x535   :  { %1681 = vmatprep.subr.mxu0 %v3112_v18  ;;  %1752 = vmatprep.subr.mxu1 %v3117_v20 }
 0x536   :  { %1682 = vmatpush1.msra.mxu0 %v3124_v21  ;;  %1753 = vmatpush1.msra.mxu1 %v3129_v22 }
 0x537   :  { %1683 = vmatprep.subr.mxu0 %v3136_v23  ;;  %1754 = vmatprep.subr.mxu1 %v3141_v24 }
 0x538   :  { %1684 = vmatpush1.msra.mxu0 %v3148_v25  ;;  %1755 = vmatpush1.msra.mxu1 %v3153_v26 }
 0x539   :  { %1685 = vmatprep.subr.mxu0 %v3160_v27  ;;  %1756 = vmatprep.subr.mxu1 %v3165_v28 }
 0x53a   :  { %1686 = vmatpush1.msra.mxu0 %v3172_v29  ;;  %1757 = vmatpush1.msra.mxu1 %v3177_v30 }
 0x53b   :  { %1687 = vmatprep.subr.mxu0 %v3184_v31  ;;  %1758 = vmatprep.subr.mxu1 %v3189_v32 }
 0x53c   :  { %1688 = vmatpush1.msra.mxu0 %v3196_v33  ;;  %1759 = vmatpush1.msra.mxu1 %v3201_v34 }
 0x53d   :  { %1689 = vmatprep.subr.mxu0 %v3208_v35  ;;  %1760 = vmatprep.subr.mxu1 %v3213_v36 }
 0x53e   :  { %1690 = vmatpush1.msra.mxu0 %v3220_v37  ;;  %1761 = vmatpush1.msra.mxu1 %v3760_v51 }
 0x53f   :  { %1691 = vmatprep.subr.mxu0 %v3761_v40  ;;  %1762 = vmatprep.subr.mxu1 %v3762_v39 }
 0x540   :  { %1692 = vmatpush1.msra.mxu0 %v3763_v50  ;;  %1763 = vmatpush1.msra.mxu1 %v3764_v19 }
 0x541   :  { %1693 = vmatprep.subr.mxu0 %v3765_v45  ;;  %1764 = vmatprep.subr.mxu1 %v3766_v47  ;;  %v3777_v47 = vld [vmem:[#allocation22_spill] sm:$0xff] }
 0x542   :  { %1694 = vmatpush1.msra.mxu0 %v3767_v41  ;;  %1765 = vmatpush1.msra.mxu1 %v3768_v58  ;;  %v3778_v58 = vld [vmem:[#allocation4_spill] sm:$0xff] }
 0x543   :  { %1695 = vmatprep.subr.mxu0 %v3769_v38  ;;  %1766 = vmatprep.subr.mxu1 %v3770_v43  ;;  %v3779_v38 = vld [vmem:[#allocation5_spill] sm:$0xff] }
 0x544   :  { %1696 = vmatpush1.msra.mxu0 %v3771_v42  ;;  %1767 = vmatpush1.msra.mxu1 %v3772_v44 }
 0x545   :  { %1697 = vmatprep.subr.mxu0 %v3773_v1  ;;  %1768 = vmatprep.subr.mxu1 %v3774_v60 }
 0x546   :  { %1698 = vmatpush1.msra.mxu0 %v3775_v53  ;;  %1731 = vmatprep.mubr.f32.mxu0 %v3776_v46 }
 0x547   :  { %1769 = vmatpush1.msra.mxu1 %v3777_v47  ;;  %1802 = vmatprep.mubr.f32.mxu1 %v3776_v46  ;;  %v2158_v47 = vld [vmem:[%s3581_s0 + $0x28] sm:$0xff] }
 0x548   :  { %1931 = vmatprep.subr.mxu0 %v3778_v58  ;;  %2002 = vmatprep.subr.mxu1 %v3779_v38 }
 0x5e7   :  { %v1469_v43 = vpop.f32.mrf.mxu0  ;;  %v1540_v42 = vpop.f32.mrf.mxu1 }
 0x5e9   :  { %v1471_v41 = vpop.f32.mrf.mxu0  ;;  %v1542_v44 = vpop.f32.mrf.mxu1 }
 0x5ea   :  { %v1549_v45 = vcombine.low %v1469_v43, %v1471_v41  ;;  %v1550_v1 = vcombine.low %v1540_v42, %v1542_v44 }
 0x5ec   :  { %v1557_v60 = vrot.slane %v1549_v45, %v2776_v62  ;;  %v1564_v53 = vrot.slane %v1550_v1, %v2776_v62 }
 0x5ee   :  { %v1565_v19 = vcombine.low %v1557_v60, %v1564_v53 }
 0x5f0   :  { %v1567_v46 = vadd.f32 %v2158_v47, %v1565_v19 }
 0x5f2   :  { %v2159_v50 = vmul.f32 -1.442695, %v1567_v46  ;;  %v1575_v58 = vrot.slane %v1567_v46, 2  ;;  %v1586_v39 = vrot.slane %v1567_v46, 6  ;;  %v1583_v41 = vrot.slane %v1567_v46, 4 }
 0x5f4   :  { %2255 = vpow2.f32 %v2159_v50  ;;  %v2160_v38 = vmul.f32 -1.442695, %v1575_v58  ;;  %v2161_v40 = vmul.f32 -1.442695, %v1586_v39 }
 0x5f6   :  { %2257 = vpow2.f32 %v2160_v38 }
 0x5f7   :  { %2259 = vpow2.f32 %v2161_v40 }
 0x601   :  { %v2256_v51 = vpop.eup %2255 }
 0x602   :  { %v1571_v43 = vadd.f32 1.0, %v2256_v51 }
 0x603   :  { %v2258_v42 = vpop.eup %2257 }
 0x604   :  { %2261 = vrcp.f32 %v1571_v43  ;;  %v1580_v45 = vadd.f32 1.0, %v2258_v42  ;;  %v2260_v44 = vpop.eup %2259 }
 0x605   :  { %2263 = vtanh.f32 %v1583_v41  ;;  %v1591_v47 = vadd.f32 1.0, %v2260_v44 }
 0x606   :  { %2265 = vrcp.f32 %v1580_v45 }
 0x607   :  { %2267 = vrcp.f32 %v1591_v47 }
 0x611   :  { %v2262_v1 = vpop.eup %2261 }
 0x612   :  { %v2264_v60 = vpop.eup %2263 }
 0x613   :  { %v2266_v19 = vpop.eup %2265  ;;  %v1595_v53 = vmul.f32 %v2264_v60, %v2262_v1 }
 0x614   :  { %v1594_v50 = vmul.f32 %v2266_v19, %v3415_v63  ;;  %v2268_v51 = vpop.eup %2267 }
 0x616   :  { %v3493_v58 = vadd.f32 %v1595_v53, %v1594_v50  ;;  %v2168_v53 = vld [vmem:[%s3581_s0 + $0x38] sm:$0xff] }
 0x618   :  { %2269 = vtanh.f32 %v3493_v58 }
 0x625   :  { %v2270_v39 = vpop.eup %2269 }
 0x626   :  { %v1598_v40 = vmul.f32 %v2270_v39, %v2268_v51 }
 0x628   :  { %2162 = vst [vmem:[%s3582_s2 + $0xa] sm:$0x3] %v1598_v40  ;;  %1732 = vmatmul.mubr.f32.vlgmr.msra.gmra.mxu0 %v1598_v40  ;;  %1803 = vmatmul.mubr.f32.vlgmr.msra.gmra.mxu1 %v1598_v40 }
 0x629   :  { %1932 = vmatpush1.msra.mxu0 %v2958_v59  ;;  %2003 = vmatpush1.msra.mxu1 %v2965_v57  ;;  %v3780_v59 = vld [vmem:[#allocation6_spill] sm:$0xff]  ;;  %v3781_v57 = vld [vmem:[#allocation7_spill] sm:$0xff] }
 0x62a   :  { %1933 = vmatprep.subr.mxu0 %v2970_v0  ;;  %2004 = vmatprep.subr.mxu1 %v2975_v55  ;;  %v3782_v0 = vld [vmem:[#allocation8_spill] sm:$0xff]  ;;  %v3783_v55 = vld [vmem:[#allocation9_spill] sm:$0xff] }
 0x62b   :  { %1934 = vmatpush1.msra.mxu0 %v2982_v52  ;;  %2005 = vmatpush1.msra.mxu1 %v2987_v54  ;;  %v3784_v52 = vld [vmem:[#allocation10_spill] sm:$0xff]  ;;  %v3785_v54 = vld [vmem:[#allocation11_spill] sm:$0xff] }
 0x62c   :  { %1935 = vmatprep.subr.mxu0 %v2992_v49  ;;  %2006 = vmatprep.subr.mxu1 %v2999_v3  ;;  %v3786_v49 = vld [vmem:[#allocation12_spill] sm:$0xff]  ;;  %v3787_v3 = vld [vmem:[#allocation13_spill] sm:$0xff] }
 0x62d   :  { %1936 = vmatpush1.msra.mxu0 %v3004_v48  ;;  %2007 = vmatpush1.msra.mxu1 %v3009_v61  ;;  %v3788_v48 = vld [vmem:[#allocation14_spill] sm:$0xff]  ;;  %v3789_v61 = vld [vmem:[#allocation15_spill] sm:$0xff] }
 0x62e   :  { %1937 = vmatprep.subr.mxu0 %v3016_v56  ;;  %2008 = vmatprep.subr.mxu1 %v3021_v2  ;;  %v3790_v56 = vld [vmem:[#allocation16_spill] sm:$0xff]  ;;  %v3791_v2 = vld [vmem:[#allocation17_spill] sm:$0xff] }
 0x62f   :  { %1938 = vmatpush1.msra.mxu0 %v3028_v4  ;;  %2009 = vmatpush1.msra.mxu1 %v3033_v5  ;;  %v3792_v4 = vld [vmem:[#allocation18_spill] sm:$0xff]  ;;  %v3793_v5 = vld [vmem:[#allocation19_spill] sm:$0xff] }
 0x630   :  { %1939 = vmatprep.subr.mxu0 %v3040_v6  ;;  %2010 = vmatprep.subr.mxu1 %v3045_v7  ;;  %v3794_v6 = vld [vmem:[#allocation20_spill] sm:$0xff]  ;;  %v3795_v7 = vld [vmem:[#allocation21_spill] sm:$0xff] }
 0x631   :  { %1940 = vmatpush1.msra.mxu0 %v3052_v8  ;;  %2011 = vmatpush1.msra.mxu1 %v3057_v9  ;;  %v3796_v8 = vmov 0.0   ;;  %v3797_v9 = vld [vmem:[#allocation22_spill] sm:$0xff] }
 0x632   :  { %1941 = vmatprep.subr.mxu0 %v3064_v10  ;;  %2012 = vmatprep.subr.mxu1 %v3069_v11 }
 0x633   :  { %1942 = vmatpush1.msra.mxu0 %v3076_v12  ;;  %2013 = vmatpush1.msra.mxu1 %v3081_v13 }
 0x634   :  { %1943 = vmatprep.subr.mxu0 %v3088_v14  ;;  %2014 = vmatprep.subr.mxu1 %v3093_v15 }
 0x635   :  { %1944 = vmatpush1.msra.mxu0 %v3100_v16  ;;  %2015 = vmatpush1.msra.mxu1 %v3105_v17 }
 0x636   :  { %1945 = vmatprep.subr.mxu0 %v3112_v18  ;;  %2016 = vmatprep.subr.mxu1 %v3117_v20  ;;  %v2163_v18 = vld [vmem:[%s3581_s0 + $0x30] sm:$0xff] }
 0x637   :  { %1946 = vmatpush1.msra.mxu0 %v3124_v21  ;;  %2017 = vmatpush1.msra.mxu1 %v3129_v22 }
 0x638   :  { %1947 = vmatprep.subr.mxu0 %v3136_v23  ;;  %2018 = vmatprep.subr.mxu1 %v3141_v24 }
 0x639   :  { %1948 = vmatpush1.msra.mxu0 %v3148_v25  ;;  %2019 = vmatpush1.msra.mxu1 %v3153_v26 }
 0x63a   :  { %1949 = vmatprep.subr.mxu0 %v3160_v27  ;;  %2020 = vmatprep.subr.mxu1 %v3165_v28 }
 0x63b   :  { %1950 = vmatpush1.msra.mxu0 %v3172_v29  ;;  %2021 = vmatpush1.msra.mxu1 %v3177_v30 }
 0x63c   :  { %1951 = vmatprep.subr.mxu0 %v3184_v31  ;;  %2022 = vmatprep.subr.mxu1 %v3189_v32 }
 0x63d   :  { %1952 = vmatpush1.msra.mxu0 %v3196_v33  ;;  %2023 = vmatpush1.msra.mxu1 %v3201_v34 }
 0x63e   :  { %1953 = vmatprep.subr.mxu0 %v3208_v35  ;;  %2024 = vmatprep.subr.mxu1 %v3213_v36 }
 0x63f   :  { %1954 = vmatpush1.msra.mxu0 %v3220_v37  ;;  %2025 = vmatpush1.msra.mxu1 %v3780_v59 }
 0x640   :  { %1955 = vmatprep.subr.mxu0 %v3781_v57  ;;  %2026 = vmatprep.subr.mxu1 %v3782_v0 }
 0x641   :  { %1956 = vmatpush1.msra.mxu0 %v3783_v55  ;;  %2027 = vmatpush1.msra.mxu1 %v3784_v52 }
 0x642   :  { %1957 = vmatprep.subr.mxu0 %v3785_v54  ;;  %2028 = vmatprep.subr.mxu1 %v3786_v49 }
 0x643   :  { %1958 = vmatpush1.msra.mxu0 %v3787_v3  ;;  %2029 = vmatpush1.msra.mxu1 %v3788_v48 }
 0x644   :  { %1959 = vmatprep.subr.mxu0 %v3789_v61  ;;  %2030 = vmatprep.subr.mxu1 %v3790_v56 }
 0x645   :  { %1960 = vmatpush1.msra.mxu0 %v3791_v2  ;;  %2031 = vmatpush1.msra.mxu1 %v3792_v4 }
 0x646   :  { %1961 = vmatprep.subr.mxu0 %v3793_v5  ;;  %2032 = vmatprep.subr.mxu1 %v3794_v6 }
 0x647   :  { %1962 = vmatpush1.msra.mxu0 %v3795_v7  ;;  %1995 = vmatprep.mubr.f32.mxu0 %v3796_v8 }
 0x648   :  { %2033 = vmatpush1.msra.mxu1 %v3797_v9  ;;  %2066 = vmatprep.mubr.f32.mxu1 %v3796_v8 }
 0x6e8   :  { %v1733_v10 = vpop.f32.mrf.mxu0  ;;  %v1804_v11 = vpop.f32.mrf.mxu1 }
 0x6ea   :  { %v1735_v12 = vpop.f32.mrf.mxu0  ;;  %v1806_v13 = vpop.f32.mrf.mxu1 }
 0x6eb   :  { %v1813_v14 = vcombine.low %v1733_v10, %v1735_v12  ;;  %v1814_v15 = vcombine.low %v1804_v11, %v1806_v13 }
 0x6ed   :  { %v1821_v16 = vrot.slane %v1813_v14, %v2776_v62  ;;  %v1828_v17 = vrot.slane %v1814_v15, %v2776_v62 }
 0x6ef   :  { %v1829_v20 = vcombine.low %v1821_v16, %v1828_v17 }
 0x6f1   :  { %v1831_v21 = vadd.f32 %v2163_v18, %v1829_v20 }
 0x6f3   :  { %v2164_v22 = vmul.f32 -1.442695, %v1831_v21  ;;  %v1839_v23 = vrot.slane %v1831_v21, 2  ;;  %v1850_v25 = vrot.slane %v1831_v21, 6  ;;  %v1847_v28 = vrot.slane %v1831_v21, 4 }
 0x6f5   :  { %2271 = vpow2.f32 %v2164_v22  ;;  %v2165_v24 = vmul.f32 -1.442695, %v1839_v23  ;;  %v2166_v26 = vmul.f32 -1.442695, %v1850_v25 }
 0x6f7   :  { %2273 = vpow2.f32 %v2165_v24 }
 0x6f8   :  { %2275 = vpow2.f32 %v2166_v26 }
 0x702   :  { %v2272_v27 = vpop.eup %2271 }
 0x703   :  { %v1835_v29 = vadd.f32 1.0, %v2272_v27 }
 0x704   :  { %v2274_v30 = vpop.eup %2273 }
 0x705   :  { %2277 = vrcp.f32 %v1835_v29  ;;  %v1844_v31 = vadd.f32 1.0, %v2274_v30  ;;  %v2276_v32 = vpop.eup %2275 }
 0x706   :  { %2279 = vtanh.f32 %v1847_v28  ;;  %v1855_v36 = vadd.f32 1.0, %v2276_v32 }
 0x707   :  { %2281 = vrcp.f32 %v1844_v31 }
 0x708   :  { %2283 = vrcp.f32 %v1855_v36 }
 0x712   :  { %v2278_v33 = vpop.eup %2277 }
 0x713   :  { %v2280_v34 = vpop.eup %2279 }
 0x714   :  { %v2282_v35 = vpop.eup %2281  ;;  %v1859_v63 = vmul.f32 %v2280_v34, %v2278_v33 }
 0x715   :  { %v1858_v37 = vmul.f32 %v2282_v35, %v3493_v58  ;;  %v2284_v38 = vpop.eup %2283 }
 0x717   :  { %v1860_v46 = vadd.f32 %v1859_v63, %v1858_v37 }
 0x719   :  { %2285 = vtanh.f32 %v1860_v46 }
 0x726   :  { %v2286_v41 = vpop.eup %2285 }
 0x727   :  { %v1862_v43 = vmul.f32 %v2286_v41, %v2284_v38 }
 0x729   :  { %2167 = vst [vmem:[%s3582_s2 + $0xc] sm:$0x3] %v1862_v43  ;;  %1996 = vmatmul.mubr.f32.vlgmr.msra.gmra.mxu0 %v1862_v43  ;;  %2067 = vmatmul.mubr.f32.vlgmr.msra.gmra.mxu1 %v1862_v43 }
 0x7e9   :  { %v1997_v42 = vpop.f32.mrf.mxu0  ;;  %v2068_v45 = vpop.f32.mrf.mxu1 }
 0x7eb   :  { %v1999_v44 = vpop.f32.mrf.mxu0  ;;  %v2070_v1 = vpop.f32.mrf.mxu1 }
 0x7ec   :  { %v2077_v60 = vcombine.low %v1997_v42, %v1999_v44  ;;  %v2078_v19 = vcombine.low %v2068_v45, %v2070_v1 }
 0x7ee   :  { %v2085_v47 = vrot.slane %v2077_v60, %v2776_v62  ;;  %v2092_v50 = vrot.slane %v2078_v19, %v2776_v62 }
 0x7f0   :  { %v2093_v58 = vcombine.low %v2085_v47, %v2092_v50 }
 0x7f2   :  { %v2095_v51 = vadd.f32 %v2168_v53, %v2093_v58 }
 0x7f4   :  { %v2169_v39 = vmul.f32 -1.442695, %v2095_v51  ;;  %v2103_v40 = vrot.slane %v2095_v51, 2  ;;  %v2114_v57 = vrot.slane %v2095_v51, 6  ;;  %v2111_v52 = vrot.slane %v2095_v51, 4 }
 0x7f6   :  { %2287 = vpow2.f32 %v2169_v39  ;;  %v2170_v59 = vmul.f32 -1.442695, %v2103_v40  ;;  %v2171_v0 = vmul.f32 -1.442695, %v2114_v57 }
 0x7f8   :  { %2289 = vpow2.f32 %v2170_v59 }
 0x7f9   :  { %2291 = vpow2.f32 %v2171_v0 }
 0x803   :  { %v2288_v55 = vpop.eup %2287 }
 0x804   :  { %v2099_v54 = vadd.f32 1.0, %v2288_v55 }
 0x805   :  { %v2290_v49 = vpop.eup %2289 }
 0x806   :  { %2293 = vrcp.f32 %v2099_v54  ;;  %v2108_v62 = vadd.f32 1.0, %v2290_v49  ;;  %v2292_v3 = vpop.eup %2291 }
 0x807   :  { %2295 = vtanh.f32 %v2111_v52  ;;  %v2119_v2 = vadd.f32 1.0, %v2292_v3 }
 0x808   :  { %2297 = vrcp.f32 %v2108_v62 }
 0x809   :  { %2299 = vrcp.f32 %v2119_v2 }
 0x813   :  { %v2294_v48 = vpop.eup %2293 }
 0x814   :  { %v2296_v61 = vpop.eup %2295 }
 0x815   :  { %v2298_v56 = vpop.eup %2297  ;;  %v2123_v5 = vmul.f32 %v2296_v61, %v2294_v48 }
 0x816   :  { %v2122_v4 = vmul.f32 %v2298_v56, %v1860_v46  ;;  %v2300_v7 = vpop.eup %2299 }
 0x818   :  { %v2124_v6 = vadd.f32 %v2123_v5, %v2122_v4 }
 0x81a   :  { %2301 = vtanh.f32 %v2124_v6  ;;  %2130 = vst [vmem:[#allocation3] sm:$0x3] %v2124_v6 }
 0x827   :  { %v2302_v8 = vpop.eup %2301 }
 0x828   :  { %v2126_v9 = vmul.f32 %v2302_v8, %v2300_v7 }
 0x82a   :  { %2172 = vst [vmem:[%s3582_s2 + $0xe] sm:$0x3] %v2126_v9  ;;  %2129 = vst [vmem:[#allocation2] sm:$0x3] %v2126_v9 }

</bundles_post_ra>
